<compile_context>
chip_gen: v7x
topology: tpu7x:2x2x1
jax: 0.10.0
libtpu: 0.0.40
codegen_flags: <defaults>
</compile_context>

<pallas_src>
import functools
import math

import jax
import jax.numpy as jnp
from jax import lax
from jax.experimental import pallas as pl
from jax.experimental.pallas import tpu as pltpu

F32 = jnp.float32
BF16 = jnp.bfloat16


# ------------------------------- fused kernel --------------------------------

def _encoder_kernel(
        # scalar prefetch (SMEM)
        xlen_ref, ylen_ref,
        # per-batch inputs
        xe_ref, spk_ref, y_ref,
        # shared weights
        lmw_ref, lmb_ref, spkw_ref, spkb_ref,
        # stacked per-layer weights (leading L axis, VMEM-resident)
        wq_s_ref, bq_s_ref, wk_s_ref, bk_s_ref, wv_s_ref, bv_s_ref,
        wo_s_ref, bo_s_ref, ek_ref, ev_ref, g0_ref, be0_ref,
        wq_c_ref, bq_c_ref, wk_c_ref, bk_c_ref, wv_c_ref, bv_c_ref,
        wo_c_ref, bo_c_ref, g1_ref, be1_ref,
        wf1_ref, bf1_ref, wf2_ref, bf2_ref, g2_ref, be2_ref,
        # shared post projection (lane-padded)
        postw_ref, postb_ref,
        # output (lane-padded)
        out_ref,
        *, H, Dh, W, Tx, Ty, C, L):
    b = pl.program_id(0)
    R = 2 * W + 1

    xlen = xlen_ref[b]
    ylen = ylen_ref[b]

    # ---- masks & banded one-hots: built ONCE per batch element --------------
    x_row_mask = (jax.lax.broadcasted_iota(jnp.int32, (Tx, 1), 0) < xlen
                  ).astype(F32)                                          # (Tx, 1)
    x_key_valid = jax.lax.broadcasted_iota(jnp.int32, (Tx, Tx), 1) < xlen
    y_key_valid = jax.lax.broadcasted_iota(jnp.int32, (Tx, Ty), 1) < ylen
    rel = (jax.lax.broadcasted_iota(jnp.int32, (Tx, Tx), 1)
           - jax.lax.broadcasted_iota(jnp.int32, (Tx, Tx), 0))           # s - t
    band_onehot = [(rel == (j - W)).astype(F32) for j in range(R)]       # R x (Tx,Tx)

    def layer_norm(v, g, beta):
        mu = jnp.mean(v, axis=-1, keepdims=True)
        var = jnp.mean(jnp.square(v - mu), axis=-1, keepdims=True)
        return (v - mu) * jax.lax.rsqrt(var + 1e-5) * g + beta

    def masked_softmax(scores, key_valid):
        scores = jnp.where(key_valid, scores, -1e4)
        m = jnp.max(scores, axis=-1, keepdims=True)
        e = jnp.exp(scores - m)
        return e * pl.reciprocal(jnp.sum(e, axis=-1, keepdims=True), approx=True)

    # ---- one-time projections (resident for all layers) ---------------------
    spk_proj = (jnp.dot(spk_ref[0].astype(BF16), spkw_ref[...],
                        preferred_element_type=F32) + spkb_ref[...])     # (1, C)
    x0 = (xe_ref[0] + spk_proj) * x_row_mask                             # (Tx, C) f32
    h = (jnp.dot(y_ref[0].astype(BF16), lmw_ref[...],
                 preferred_element_type=F32) + lmb_ref[...])             # (Ty, C) f32
    h_bf = h.astype(BF16)

    def layer_body(l, x):
        xb = x.astype(BF16)

        # -------- self-attention with banded relative positions --------------
        ek_l = ek_ref[l]                                                 # (R, Dh) bf16
        ev_l = ev_ref[l]                                                 # (R, Dh) bf16
        heads = []
        # TODO(synk): convert to lax.fori_loop over heads + flash Tq/Ts tiling
        # before scaling to production sequence lengths (v7x VMEM ceiling).
        for hh in range(H):
            qh = (jnp.dot(xb, wq_s_ref[l, hh], preferred_element_type=F32)
                  + bq_s_ref[l, hh]).astype(BF16)                        # (Tx, Dh)
            kh = (jnp.dot(xb, wk_s_ref[l, hh], preferred_element_type=F32)
                  + bk_s_ref[l, hh]).astype(BF16)
            vh = (jnp.dot(xb, wv_s_ref[l, hh], preferred_element_type=F32)
                  + bv_s_ref[l, hh]).astype(BF16)
            scores = lax.dot_general(qh, kh, (((1,), (1,)), ((), ())),
                                     preferred_element_type=F32)         # (Tx, Tx)
            # relative-key logits (Tx, 2W+1), scattered onto diagonals using the
            # hoisted one-hot band masks (no per-head/per-layer compares).
            rlog = lax.dot_general(qh, ek_l, (((1,), (1,)), ((), ())),
                                   preferred_element_type=F32)
            for j in range(R):
                scores = scores + band_onehot[j] * rlog[:, j:j + 1]
            p = masked_softmax(scores, x_key_valid)                      # (Tx, Tx) f32
            oh = jnp.dot(p.astype(BF16), vh, preferred_element_type=F32)  # (Tx, Dh)
            # relative-value term: banded gather -> ONE small MXU matmul
            pband = jnp.concatenate(
                [jnp.sum(p * band_onehot[j], axis=-1, keepdims=True)
                 for j in range(R)], axis=-1)                            # (Tx, R)
            oh = oh + jnp.dot(pband.astype(BF16), ev_l,
                              preferred_element_type=F32)
            heads.append(oh)
        attn = jnp.concatenate(heads, axis=-1)                           # (Tx, C)
        attn = (jnp.dot(attn.astype(BF16), wo_s_ref[l],
                        preferred_element_type=F32) + bo_s_ref[l])
        x = layer_norm(x + attn, g0_ref[l], be0_ref[l])

        # -------- cross-attention over LM features (no rel-pos) --------------
        xb = x.astype(BF16)
        heads = []
        for hh in range(H):
            qh = (jnp.dot(xb, wq_c_ref[l, hh], preferred_element_type=F32)
                  + bq_c_ref[l, hh]).astype(BF16)                        # (Tx, Dh)
            kh = (jnp.dot(h_bf, wk_c_ref[l, hh], preferred_element_type=F32)
                  + bk_c_ref[l, hh]).astype(BF16)                        # (Ty, Dh)
            vh = (jnp.dot(h_bf, wv_c_ref[l, hh], preferred_element_type=F32)
                  + bv_c_ref[l, hh]).astype(BF16)
            scores = lax.dot_general(qh, kh, (((1,), (1,)), ((), ())),
                                     preferred_element_type=F32)         # (Tx, Ty)
            p = masked_softmax(scores, y_key_valid)
            heads.append(jnp.dot(p.astype(BF16), vh,
                                 preferred_element_type=F32))
        attn = jnp.concatenate(heads, axis=-1)                           # (Tx, C)
        attn = (jnp.dot(attn.astype(BF16), wo_c_ref[l],
                        preferred_element_type=F32) + bo_c_ref[l])
        x = layer_norm(x + attn, g1_ref[l], be1_ref[l])

        # -------- FFN (kernel_size=1 convs), masked as in VITS ---------------
        hmid = (jnp.dot((x * x_row_mask).astype(BF16), wf1_ref[l],
                        preferred_element_type=F32) + bf1_ref[l])
        hmid = jnp.maximum(hmid, 0.0) * x_row_mask
        ff = (jnp.dot(hmid.astype(BF16), wf2_ref[l],
                      preferred_element_type=F32) + bf2_ref[l]) * x_row_mask
        x = layer_norm(x + ff, g2_ref[l], be2_ref[l])
        return x

    x_final = lax.fori_loop(0, L, layer_body, x0)

    # -------- post 1x1 conv, lane-padded output write -------------------------
    post = (jnp.dot(x_final.astype(BF16), postw_ref[...],
                    preferred_element_type=F32) + postb_ref[...])        # (Tx, Cp)
    out_ref[0] = post * x_row_mask


# ----------------------------- parameter packing ------------------------------

def pack_params(params, cfg):
    """Stack per-layer weights on a leading L axis, split Q/K/V per head
    ((L,H,C,Dh) so the kernel never lane-slices activations), fold the
    1/sqrt(Dh) query scale, lane-pad the post projection, and cast to bf16."""
    C = cfg['internal_channels']
    H = cfg['n_heads']
    Dh = C // H
    content = cfg['content_channels']
    scale = 1.0 / math.sqrt(Dh)
    layers = params['layers']

    def heads_w(w, s=1.0):                      # (C, C) -> (H, C, Dh)
        return (w * s).reshape(C, H, Dh).transpose(1, 0, 2)

    def heads_b(b, s=1.0):                      # (C,) -> (H, 1, Dh)
        return (b * s).reshape(H, 1, Dh)

    def st(fn, dtype=None):
        a = jnp.stack([fn(l) for l in layers], axis=0)
        return a.astype(dtype) if dtype is not None else a

    Cp = ((2 * content + 127) // 128) * 128     # lane-dense output width
    post_w = jnp.zeros((C, Cp), F32).at[:, :2 * content].set(params['post_w'])
    post_b = jnp.zeros((1, Cp), F32).at[:, :2 * content].set(
        params['post_b'][None, :])

    return dict(
        phoneme_emb=params['phoneme_emb'], lang_emb=params['lang_emb'],
        lm_w=params['lm_w'].astype(BF16), lm_b=params['lm_b'].reshape(1, -1),
        spk_w=params['spk_w'].astype(BF16), spk_b=params['spk_b'].reshape(1, -1),
        wq_s=st(lambda l: heads_w(l['self']['wq'], scale), BF16),
        bq_s=st(lambda l: heads_b(l['self']['bq'], scale)),
        wk_s=st(lambda l: heads_w(l['self']['wk']), BF16),
        bk_s=st(lambda l: heads_b(l['self']['bk'])),
        wv_s=st(lambda l: heads_w(l['self']['wv']), BF16),
        bv_s=st(lambda l: heads_b(l['self']['bv'])),
        wo_s=st(lambda l: l['self']['wo'], BF16),
        bo_s=st(lambda l: l['self']['bo'][None, :]),
        emb_k=st(lambda l: l['emb_rel_k'], BF16),
        emb_v=st(lambda l: l['emb_rel_v'], BF16),
        g0=st(lambda l: l['g0'][None, :]), be0=st(lambda l: l['be0'][None, :]),
        wq_c=st(lambda l: heads_w(l['cross']['wq'], scale), BF16),
        bq_c=st(lambda l: heads_b(l['cross']['bq'], scale)),
        wk_c=st(lambda l: heads_w(l['cross']['wk']), BF16),
        bk_c=st(lambda l: heads_b(l['cross']['bk'])),
        wv_c=st(lambda l: heads_w(l['cross']['wv']), BF16),
        bv_c=st(lambda l: heads_b(l['cross']['bv'])),
        wo_c=st(lambda l: l['cross']['wo'], BF16),
        bo_c=st(lambda l: l['cross']['bo'][None, :]),
        g1=st(lambda l: l['g1'][None, :]), be1=st(lambda l: l['be1'][None, :]),
        wf1=st(lambda l: l['ffn_w1'], BF16), bf1=st(lambda l: l['ffn_b1'][None, :]),
        wf2=st(lambda l: l['ffn_w2'], BF16), bf2=st(lambda l: l['ffn_b2'][None, :]),
        g2=st(lambda l: l['g2'][None, :]), be2=st(lambda l: l['be2'][None, :]),
        post_w=post_w.astype(BF16), post_b=post_b,
    )


# --------------------------------- forward ------------------------------------

def text_encoder_forward(packed, cfg, x, x_length, y, y_length, spk, lang, noise_key):
    B, Tx = x.shape
    Ty = y.shape[1]
    C = cfg['internal_channels']
    H = cfg['n_heads']
    Dh = C // H
    W = cfg['window_size']
    content = cfg['content_channels']
    L = cfg['num_layers']
    Cp = packed['post_w'].shape[1]

    # embedding gathers in XLA glue (TODO(synk): no clean Pallas gather here)
    xe = packed['phoneme_emb'][x] + packed['lang_emb'][lang][:, None, :]  # (B, Tx, C)
    spk3 = jnp.transpose(spk, (0, 2, 1))                                  # (B, 1, spk_dim)

    p = packed

    def bspec(shape):       # per-batch blocks
        zeros = (0,) * (len(shape) - 1)
        return pl.BlockSpec((1,) + tuple(shape[1:]),
                            lambda b, xl, yl: (b,) + zeros)

    def wspec(shape):       # whole-array weight blocks, fetched once, VMEM-resident
        zeros = (0,) * len(shape)
        return pl.BlockSpec(tuple(shape), lambda b, xl, yl: zeros)

    ins = [
        (xe, bspec), (spk3, bspec), (y, bspec),
        (p['lm_w'], wspec), (p['lm_b'], wspec),
        (p['spk_w'], wspec), (p['spk_b'], wspec),
        (p['wq_s'], wspec), (p['bq_s'], wspec),
        (p['wk_s'], wspec), (p['bk_s'], wspec),
        (p['wv_s'], wspec), (p['bv_s'], wspec),
        (p['wo_s'], wspec), (p['bo_s'], wspec),
        (p['emb_k'], wspec), (p['emb_v'], wspec),
        (p['g0'], wspec), (p['be0'], wspec),
        (p['wq_c'], wspec), (p['bq_c'], wspec),
        (p['wk_c'], wspec), (p['bk_c'], wspec),
        (p['wv_c'], wspec), (p['bv_c'], wspec),
        (p['wo_c'], wspec), (p['bo_c'], wspec),
        (p['g1'], wspec), (p['be1'], wspec),
        (p['wf1'], wspec), (p['bf1'], wspec),
        (p['wf2'], wspec), (p['bf2'], wspec),
        (p['g2'], wspec), (p['be2'], wspec),
        (p['post_w'], wspec), (p['post_b'], wspec),
    ]
    inputs = [a for a, _ in ins]
    in_specs = [mk(a.shape) for a, mk in ins]

    kernel = functools.partial(_encoder_kernel, H=H, Dh=Dh, W=W, Tx=Tx, Ty=Ty,
                               C=C, L=L)

    post_out = pl.pallas_call(
        kernel,
        out_shape=jax.ShapeDtypeStruct((B, Tx, Cp), F32),
        grid_spec=pltpu.PrefetchScalarGridSpec(
            num_scalar_prefetch=2,
            grid=(B,),
            in_specs=in_specs,
            out_specs=pl.BlockSpec((1, Tx, Cp), lambda b, xl, yl: (b, 0, 0)),
        ),
        compiler_params=pltpu.CompilerParams(
            dimension_semantics=("parallel",)),
    )(x_length.astype(jnp.int32), y_length.astype(jnp.int32), *inputs)

    # split / sample z in cheap XLA glue (elementwise)
    x_mask = (jnp.arange(Tx)[None, :] < x_length[:, None]).astype(F32)    # (B, Tx)
    mean = post_out[..., :content]
    logvar = post_out[..., content:2 * content]
    noise = jax.random.normal(noise_key, mean.shape, F32)                 # randn_like
    z = mean + noise * jnp.exp(logvar) * x_mask[:, :, None]

    to_nct = lambda t: jnp.transpose(t, (0, 2, 1))                        # back to (B, C, T)
    z_mask = x_mask[:, None, :]                                           # (B, 1, Tx)
    return to_nct(z), to_nct(mean), to_nct(logvar), z_mask


# ----------------------------- parameter init ---------------------------------

def init_params(key, cfg):
    C = cfg['internal_channels']
    Fc = C * 4
    Dh = C // cfg['n_heads']
    W = cfg['window_size']
    ks = iter(jax.random.split(key, 256))

    def nrm(shape, s=0.02):
        return s * jax.random.normal(next(ks), shape, F32)

    def attn_params():
        return {'wq': nrm((C, C)), 'bq': jnp.zeros((C,), F32),
                'wk': nrm((C, C)), 'bk': jnp.zeros((C,), F32),
                'wv': nrm((C, C)), 'bv': jnp.zeros((C,), F32),
                'wo': nrm((C, C)), 'bo': jnp.zeros((C,), F32)}

    params = {
        'lm_w': nrm((cfg['lm_dim'], C)), 'lm_b': jnp.zeros((C,), F32),
        'phoneme_emb': nrm((cfg['num_phonemes'], C), 0.1),
        'lang_emb': nrm((cfg['num_languages'], C), 0.1),
        'spk_w': nrm((cfg['speaker_embedding_dim'], C)),
        'spk_b': jnp.zeros((C,), F32),
        'post_w': nrm((C, 2 * cfg['content_channels'])),
        'post_b': jnp.zeros((2 * cfg['content_channels'],), F32),
        'layers': [],
    }
    for _ in range(cfg['num_layers']):
        params['layers'].append({
            'self': attn_params(),
            'emb_rel_k': nrm((2 * W + 1, Dh), Dh ** -0.5),
            'emb_rel_v': nrm((2 * W + 1, Dh), Dh ** -0.5),
            'g0': jnp.ones((C,), F32), 'be0': jnp.zeros((C,), F32),
            'cross': attn_params(),
            'g1': jnp.ones((C,), F32), 'be1': jnp.zeros((C,), F32),
            'ffn_w1': nrm((C, Fc)), 'ffn_b1': jnp.zeros((Fc,), F32),
            'ffn_w2': nrm((Fc, C)), 'ffn_b2': jnp.zeros((C,), F32),
            'g2': jnp.ones((C,), F32), 'be2': jnp.zeros((C,), F32),
        })
    return params


# ----------------------------------- main --------------------------------------

if __name__ == "__main__":
    cfg = dict(num_phonemes=40, num_languages=8, internal_channels=32,
               speaker_embedding_dim=16, content_channels=8, n_heads=4,
               lm_dim=48, kernel_size=1, dropout=0.0, window_size=4,
               num_layers=2)
    key = jax.random.PRNGKey(0)
    kp, kx, ky, kspk, kn = jax.random.split(key, 5)
    params = init_params(kp, cfg)
    packed = pack_params(params, cfg)      # one-time weight packing / bf16 cast

    B, Tx, Ty = 2, 8, 12
    x = jax.random.randint(kx, (B, Tx), 0, cfg['num_phonemes'], dtype=jnp.int32)
    x_length = jnp.array([8, 5], dtype=jnp.int32)
    y = jax.random.normal(ky, (B, Ty, cfg['lm_dim']), F32)
    y_length = jnp.array([12, 9], dtype=jnp.int32)
    spk = jax.random.normal(kspk, (B, cfg['speaker_embedding_dim'], 1), F32)
    lang = jnp.array([1, 3], dtype=jnp.int32)

    z, mean, logvar, z_mask = text_encoder_forward(
        packed, cfg, x, x_length, y, y_length, spk, lang, kn)
    jax.block_until_ready((z, mean, logvar, z_mask))

    assert z.shape == (B, cfg['content_channels'], Tx)
    assert mean.shape == (B, cfg['content_channels'], Tx)
    assert logvar.shape == (B, cfg['content_channels'], Tx)
    assert z_mask.shape == (B, 1, Tx)
    assert bool(jnp.all(jnp.isfinite(z)))
    assert bool(jnp.all(jnp.isfinite(mean)))
    assert bool(jnp.all(jnp.isfinite(logvar)))
    print("KERNEL_OK")
</pallas_src>

<mosaic_0001>
module attributes {stable_mosaic.version = 11 : i64} {
  func.func @_encoder_kernel(%arg0: i32, %arg1: memref<2xi32, #tpu.memory_space<smem>>, %arg2: memref<2xi32, #tpu.memory_space<smem>>, %arg3: memref<1x8x32xf32, #tpu.memory_space<vmem>>, %arg4: memref<1x1x16xf32, #tpu.memory_space<vmem>>, %arg5: memref<1x12x48xf32, #tpu.memory_space<vmem>>, %arg6: memref<48x32xbf16, #tpu.memory_space<vmem>>, %arg7: memref<1x32xf32, #tpu.memory_space<vmem>>, %arg8: memref<16x32xbf16, #tpu.memory_space<vmem>>, %arg9: memref<1x32xf32, #tpu.memory_space<vmem>>, %arg10: memref<2x4x32x8xbf16, #tpu.memory_space<vmem>>, %arg11: memref<2x4x1x8xf32, #tpu.memory_space<vmem>>, %arg12: memref<2x4x32x8xbf16, #tpu.memory_space<vmem>>, %arg13: memref<2x4x1x8xf32, #tpu.memory_space<vmem>>, %arg14: memref<2x4x32x8xbf16, #tpu.memory_space<vmem>>, %arg15: memref<2x4x1x8xf32, #tpu.memory_space<vmem>>, %arg16: memref<2x32x32xbf16, #tpu.memory_space<vmem>>, %arg17: memref<2x1x32xf32, #tpu.memory_space<vmem>>, %arg18: memref<2x9x8xbf16, #tpu.memory_space<vmem>>, %arg19: memref<2x9x8xbf16, #tpu.memory_space<vmem>>, %arg20: memref<2x1x32xf32, #tpu.memory_space<vmem>>, %arg21: memref<2x1x32xf32, #tpu.memory_space<vmem>>, %arg22: memref<2x4x32x8xbf16, #tpu.memory_space<vmem>>, %arg23: memref<2x4x1x8xf32, #tpu.memory_space<vmem>>, %arg24: memref<2x4x32x8xbf16, #tpu.memory_space<vmem>>, %arg25: memref<2x4x1x8xf32, #tpu.memory_space<vmem>>, %arg26: memref<2x4x32x8xbf16, #tpu.memory_space<vmem>>, %arg27: memref<2x4x1x8xf32, #tpu.memory_space<vmem>>, %arg28: memref<2x32x32xbf16, #tpu.memory_space<vmem>>, %arg29: memref<2x1x32xf32, #tpu.memory_space<vmem>>, %arg30: memref<2x1x32xf32, #tpu.memory_space<vmem>>, %arg31: memref<2x1x32xf32, #tpu.memory_space<vmem>>, %arg32: memref<2x32x128xbf16, #tpu.memory_space<vmem>>, %arg33: memref<2x1x128xf32, #tpu.memory_space<vmem>>, %arg34: memref<2x128x32xbf16, #tpu.memory_space<vmem>>, %arg35: memref<2x1x32xf32, #tpu.memory_space<vmem>>, %arg36: memref<2x1x32xf32, #tpu.memory_space<vmem>>, %arg37: memref<2x1x32xf32, #tpu.memory_space<vmem>>, %arg38: memref<32x128xbf16, #tpu.memory_space<vmem>>, %arg39: memref<1x128xf32, #tpu.memory_space<vmem>>, %arg40: memref<1x8x128xf32, #tpu.memory_space<vmem>>) attributes {dimension_semantics = [#tpu.dimension_semantics<parallel>], iteration_bounds = array<i64: 2>, scalar_prefetch = 2 : i64, scratch_operands = 0 : i64, tpu.core_type = #tpu.core_type<tc>, window_params = [{transform_indices = @transform_0, window_bounds = array<i64: 1, 8, 32>}, {transform_indices = @transform_1, window_bounds = array<i64: 1, 1, 16>}, {transform_indices = @transform_2, window_bounds = array<i64: 1, 12, 48>}, {pipeline_mode = #tpu.pipeline_mode<synchronous>, transform_indices = @transform_3, window_bounds = array<i64: 48, 32>}, {pipeline_mode = #tpu.pipeline_mode<synchronous>, transform_indices = @transform_4, window_bounds = array<i64: 1, 32>}, {pipeline_mode = #tpu.pipeline_mode<synchronous>, transform_indices = @transform_5, window_bounds = array<i64: 16, 32>}, {pipeline_mode = #tpu.pipeline_mode<synchronous>, transform_indices = @transform_6, window_bounds = array<i64: 1, 32>}, {pipeline_mode = #tpu.pipeline_mode<synchronous>, transform_indices = @transform_7, window_bounds = array<i64: 2, 4, 32, 8>}, {pipeline_mode = #tpu.pipeline_mode<synchronous>, transform_indices = @transform_8, window_bounds = array<i64: 2, 4, 1, 8>}, {pipeline_mode = #tpu.pipeline_mode<synchronous>, transform_indices = @transform_9, window_bounds = array<i64: 2, 4, 32, 8>}, {pipeline_mode = #tpu.pipeline_mode<synchronous>, transform_indices = @transform_10, window_bounds = array<i64: 2, 4, 1, 8>}, {pipeline_mode = #tpu.pipeline_mode<synchronous>, transform_indices = @transform_11, window_bounds = array<i64: 2, 4, 32, 8>}, {pipeline_mode = #tpu.pipeline_mode<synchronous>, transform_indices = @transform_12, window_bounds = array<i64: 2, 4, 1, 8>}, {pipeline_mode = #tpu.pipeline_mode<synchronous>, transform_indices = @transform_13, window_bounds = array<i64: 2, 32, 32>}, {pipeline_mode = #tpu.pipeline_mode<synchronous>, transform_indices = @transform_14, window_bounds = array<i64: 2, 1, 32>}, {pipeline_mode = #tpu.pipeline_mode<synchronous>, transform_indices = @transform_15, window_bounds = array<i64: 2, 9, 8>}, {pipeline_mode = #tpu.pipeline_mode<synchronous>, transform_indices = @transform_16, window_bounds = array<i64: 2, 9, 8>}, {pipeline_mode = #tpu.pipeline_mode<synchronous>, transform_indices = @transform_17, window_bounds = array<i64: 2, 1, 32>}, {pipeline_mode = #tpu.pipeline_mode<synchronous>, transform_indices = @transform_18, window_bounds = array<i64: 2, 1, 32>}, {pipeline_mode = #tpu.pipeline_mode<synchronous>, transform_indices = @transform_19, window_bounds = array<i64: 2, 4, 32, 8>}, {pipeline_mode = #tpu.pipeline_mode<synchronous>, transform_indices = @transform_20, window_bounds = array<i64: 2, 4, 1, 8>}, {pipeline_mode = #tpu.pipeline_mode<synchronous>, transform_indices = @transform_21, window_bounds = array<i64: 2, 4, 32, 8>}, {pipeline_mode = #tpu.pipeline_mode<synchronous>, transform_indices = @transform_22, window_bounds = array<i64: 2, 4, 1, 8>}, {pipeline_mode = #tpu.pipeline_mode<synchronous>, transform_indices = @transform_23, window_bounds = array<i64: 2, 4, 32, 8>}, {pipeline_mode = #tpu.pipeline_mode<synchronous>, transform_indices = @transform_24, window_bounds = array<i64: 2, 4, 1, 8>}, {pipeline_mode = #tpu.pipeline_mode<synchronous>, transform_indices = @transform_25, window_bounds = array<i64: 2, 32, 32>}, {pipeline_mode = #tpu.pipeline_mode<synchronous>, transform_indices = @transform_26, window_bounds = array<i64: 2, 1, 32>}, {pipeline_mode = #tpu.pipeline_mode<synchronous>, transform_indices = @transform_27, window_bounds = array<i64: 2, 1, 32>}, {pipeline_mode = #tpu.pipeline_mode<synchronous>, transform_indices = @transform_28, window_bounds = array<i64: 2, 1, 32>}, {pipeline_mode = #tpu.pipeline_mode<synchronous>, transform_indices = @transform_29, window_bounds = array<i64: 2, 32, 128>}, {pipeline_mode = #tpu.pipeline_mode<synchronous>, transform_indices = @transform_30, window_bounds = array<i64: 2, 1, 128>}, {pipeline_mode = #tpu.pipeline_mode<synchronous>, transform_indices = @transform_31, window_bounds = array<i64: 2, 128, 32>}, {pipeline_mode = #tpu.pipeline_mode<synchronous>, transform_indices = @transform_32, window_bounds = array<i64: 2, 1, 32>}, {pipeline_mode = #tpu.pipeline_mode<synchronous>, transform_indices = @transform_33, window_bounds = array<i64: 2, 1, 32>}, {pipeline_mode = #tpu.pipeline_mode<synchronous>, transform_indices = @transform_34, window_bounds = array<i64: 2, 1, 32>}, {pipeline_mode = #tpu.pipeline_mode<synchronous>, transform_indices = @transform_35, window_bounds = array<i64: 32, 128>}, {pipeline_mode = #tpu.pipeline_mode<synchronous>, transform_indices = @transform_36, window_bounds = array<i64: 1, 128>}, {transform_indices = @transform_37, window_bounds = array<i64: 1, 8, 128>}]} {
    %0 = arith.index_cast %arg0 : i32 to index
    %1 = memref.load %arg1[%0] : memref<2xi32, #tpu.memory_space<smem>>
    %2 = arith.index_cast %arg0 : i32 to index
    %3 = memref.load %arg2[%2] : memref<2xi32, #tpu.memory_space<smem>>
    %4 = tpu.iota {dimensions = array<i32: 0>} : vector<8x1xi32>
    %5 = vector.broadcast %1 : i32 to vector<8x1xi32>
    %6 = arith.cmpi slt, %4, %5 : vector<8x1xi32>
    %7 = arith.extui %6 : vector<8x1xi1> to vector<8x1xi32>
    %8 = arith.sitofp %7 : vector<8x1xi32> to vector<8x1xf32>
    %9 = tpu.iota {dimensions = array<i32: 1>} : vector<8x8xi32>
    %10 = vector.broadcast %1 : i32 to vector<8x8xi32>
    %11 = arith.cmpi slt, %9, %10 : vector<8x8xi32>
    %12 = tpu.iota {dimensions = array<i32: 1>} : vector<8x12xi32>
    %13 = vector.broadcast %3 : i32 to vector<8x12xi32>
    %14 = arith.cmpi slt, %12, %13 : vector<8x12xi32>
    %15 = tpu.iota {dimensions = array<i32: 1>} : vector<8x8xi32>
    %16 = tpu.iota {dimensions = array<i32: 0>} : vector<8x8xi32>
    %17 = arith.subi %15, %16 : vector<8x8xi32>
    %c-4_i32 = arith.constant -4 : i32
    %18 = vector.broadcast %c-4_i32 : i32 to vector<8x8xi32>
    %19 = arith.cmpi eq, %17, %18 : vector<8x8xi32>
    %20 = arith.extui %19 : vector<8x8xi1> to vector<8x8xi32>
    %21 = arith.sitofp %20 : vector<8x8xi32> to vector<8x8xf32>
    %c-3_i32 = arith.constant -3 : i32
    %22 = vector.broadcast %c-3_i32 : i32 to vector<8x8xi32>
    %23 = arith.cmpi eq, %17, %22 : vector<8x8xi32>
    %24 = arith.extui %23 : vector<8x8xi1> to vector<8x8xi32>
    %25 = arith.sitofp %24 : vector<8x8xi32> to vector<8x8xf32>
    %c-2_i32 = arith.constant -2 : i32
    %26 = vector.broadcast %c-2_i32 : i32 to vector<8x8xi32>
    %27 = arith.cmpi eq, %17, %26 : vector<8x8xi32>
    %28 = arith.extui %27 : vector<8x8xi1> to vector<8x8xi32>
    %29 = arith.sitofp %28 : vector<8x8xi32> to vector<8x8xf32>
    %c-1_i32 = arith.constant -1 : i32
    %30 = vector.broadcast %c-1_i32 : i32 to vector<8x8xi32>
    %31 = arith.cmpi eq, %17, %30 : vector<8x8xi32>
    %32 = arith.extui %31 : vector<8x8xi1> to vector<8x8xi32>
    %33 = arith.sitofp %32 : vector<8x8xi32> to vector<8x8xf32>
    %c0_i32 = arith.constant 0 : i32
    %34 = vector.broadcast %c0_i32 : i32 to vector<8x8xi32>
    %35 = arith.cmpi eq, %17, %34 : vector<8x8xi32>
    %36 = arith.extui %35 : vector<8x8xi1> to vector<8x8xi32>
    %37 = arith.sitofp %36 : vector<8x8xi32> to vector<8x8xf32>
    %c1_i32 = arith.constant 1 : i32
    %38 = vector.broadcast %c1_i32 : i32 to vector<8x8xi32>
    %39 = arith.cmpi eq, %17, %38 : vector<8x8xi32>
    %40 = arith.extui %39 : vector<8x8xi1> to vector<8x8xi32>
    %41 = arith.sitofp %40 : vector<8x8xi32> to vector<8x8xf32>
    %c2_i32 = arith.constant 2 : i32
    %42 = vector.broadcast %c2_i32 : i32 to vector<8x8xi32>
    %43 = arith.cmpi eq, %17, %42 : vector<8x8xi32>
    %44 = arith.extui %43 : vector<8x8xi1> to vector<8x8xi32>
    %45 = arith.sitofp %44 : vector<8x8xi32> to vector<8x8xf32>
    %c3_i32 = arith.constant 3 : i32
    %46 = vector.broadcast %c3_i32 : i32 to vector<8x8xi32>
    %47 = arith.cmpi eq, %17, %46 : vector<8x8xi32>
    %48 = arith.extui %47 : vector<8x8xi1> to vector<8x8xi32>
    %49 = arith.sitofp %48 : vector<8x8xi32> to vector<8x8xf32>
    %c4_i32 = arith.constant 4 : i32
    %50 = vector.broadcast %c4_i32 : i32 to vector<8x8xi32>
    %51 = arith.cmpi eq, %17, %50 : vector<8x8xi32>
    %52 = arith.extui %51 : vector<8x8xi1> to vector<8x8xi32>
    %53 = arith.sitofp %52 : vector<8x8xi32> to vector<8x8xf32>
    %c0 = arith.constant 0 : index
    %c0_0 = arith.constant 0 : index
    %c0_1 = arith.constant 0 : index
    %54 = vector.load %arg4[%c0, %c0_0, %c0_1] : memref<1x1x16xf32, #tpu.memory_space<vmem>>, vector<1x1x16xf32>
    %55 = vector.shape_cast %54 : vector<1x1x16xf32> to vector<1x16xf32>
    %56 = arith.truncf %55 : vector<1x16xf32> to vector<1x16xbf16>
    %c0_2 = arith.constant 0 : index
    %c0_3 = arith.constant 0 : index
    %57 = vector.load %arg8[%c0_2, %c0_3] : memref<16x32xbf16, #tpu.memory_space<vmem>>, vector<16x32xbf16>
    %cst = arith.constant dense<0.000000e+00> : vector<1x32xf32>
    %58 = tpu.matmul %56, %57, %cst {dimension_numbers = #tpu.dot_dimension_numbers<[1], [0], [0], [1], [0, 0, 1, 1], [], []>} : vector<1x16xbf16>, vector<16x32xbf16>, vector<1x32xf32> -> vector<1x32xf32>
    %c0_4 = arith.constant 0 : index
    %c0_5 = arith.constant 0 : index
    %59 = vector.load %arg9[%c0_4, %c0_5] : memref<1x32xf32, #tpu.memory_space<vmem>>, vector<1x32xf32>
    %60 = arith.addf %58, %59 : vector<1x32xf32>
    %c0_6 = arith.constant 0 : index
    %c0_7 = arith.constant 0 : index
    %c0_8 = arith.constant 0 : index
    %61 = vector.load %arg3[%c0_6, %c0_7, %c0_8] : memref<1x8x32xf32, #tpu.memory_space<vmem>>, vector<1x8x32xf32>
    %62 = vector.shape_cast %61 : vector<1x8x32xf32> to vector<8x32xf32>
    %63 = vector.broadcast %60 : vector<1x32xf32> to vector<8x32xf32>
    %64 = arith.addf %62, %63 : vector<8x32xf32>
    %65 = vector.broadcast %8 : vector<8x1xf32> to vector<8x32xf32>
    %66 = arith.mulf %64, %65 : vector<8x32xf32>
    %c0_9 = arith.constant 0 : index
    %c0_10 = arith.constant 0 : index
    %c0_11 = arith.constant 0 : index
    %67 = vector.load %arg5[%c0_9, %c0_10, %c0_11] : memref<1x12x48xf32, #tpu.memory_space<vmem>>, vector<1x12x48xf32>
    %68 = vector.shape_cast %67 : vector<1x12x48xf32> to vector<12x48xf32>
    %69 = arith.truncf %68 : vector<12x48xf32> to vector<12x48xbf16>
    %c0_12 = arith.constant 0 : index
    %c0_13 = arith.constant 0 : index
    %70 = vector.load %arg6[%c0_12, %c0_13] : memref<48x32xbf16, #tpu.memory_space<vmem>>, vector<48x32xbf16>
    %cst_14 = arith.constant dense<0.000000e+00> : vector<12x32xf32>
    %71 = tpu.matmul %69, %70, %cst_14 {dimension_numbers = #tpu.dot_dimension_numbers<[1], [0], [0], [1], [0, 0, 1, 1], [], []>} : vector<12x48xbf16>, vector<48x32xbf16>, vector<12x32xf32> -> vector<12x32xf32>
    %c0_15 = arith.constant 0 : index
    %c0_16 = arith.constant 0 : index
    %72 = vector.load %arg7[%c0_15, %c0_16] : memref<1x32xf32, #tpu.memory_space<vmem>>, vector<1x32xf32>
    %73 = vector.broadcast %72 : vector<1x32xf32> to vector<12x32xf32>
    %74 = arith.addf %71, %73 : vector<12x32xf32>
    %75 = arith.truncf %74 : vector<12x32xf32> to vector<12x32xbf16>
    %c0_i32_17 = arith.constant 0 : i32
    %c2_i32_18 = arith.constant 2 : i32
    %76 = arith.addi %c0_i32_17, %c2_i32_18 : i32
    %c1_i32_19 = arith.constant 1 : i32
    %77 = scf.for %arg41 = %c0_i32_17 to %76 step %c1_i32_19 iter_args(%arg42 = %66) -> (vector<8x32xf32>)  : i32 {
      %89 = arith.truncf %arg42 : vector<8x32xf32> to vector<8x32xbf16>
      %90 = arith.index_cast %arg41 : i32 to index
      %c0_29 = arith.constant 0 : index
      %c0_30 = arith.constant 0 : index
      %91 = vector.load %arg18[%90, %c0_29, %c0_30] : memref<2x9x8xbf16, #tpu.memory_space<vmem>>, vector<1x9x8xbf16>
      %92 = vector.shape_cast %91 : vector<1x9x8xbf16> to vector<9x8xbf16>
      %93 = arith.index_cast %arg41 : i32 to index
      %c0_31 = arith.constant 0 : index
      %c0_32 = arith.constant 0 : index
      %94 = vector.load %arg19[%93, %c0_31, %c0_32] : memref<2x9x8xbf16, #tpu.memory_space<vmem>>, vector<1x9x8xbf16>
      %95 = vector.shape_cast %94 : vector<1x9x8xbf16> to vector<9x8xbf16>
      %96 = arith.index_cast %arg41 : i32 to index
      %c0_33 = arith.constant 0 : index
      %c0_34 = arith.constant 0 : index
      %c0_35 = arith.constant 0 : index
      %97 = vector.load %arg10[%96, %c0_33, %c0_34, %c0_35] : memref<2x4x32x8xbf16, #tpu.memory_space<vmem>>, vector<1x1x32x8xbf16>
      %98 = vector.shape_cast %97 : vector<1x1x32x8xbf16> to vector<32x8xbf16>
      %cst_36 = arith.constant dense<0.000000e+00> : vector<8x8xf32>
      %99 = tpu.matmul %89, %98, %cst_36 {dimension_numbers = #tpu.dot_dimension_numbers<[1], [0], [0], [1], [0, 0, 1, 1], [], []>} : vector<8x32xbf16>, vector<32x8xbf16>, vector<8x8xf32> -> vector<8x8xf32>
      %100 = arith.index_cast %arg41 : i32 to index
      %c0_37 = arith.constant 0 : index
      %c0_38 = arith.constant 0 : index
      %c0_39 = arith.constant 0 : index
      %101 = vector.load %arg11[%100, %c0_37, %c0_38, %c0_39] : memref<2x4x1x8xf32, #tpu.memory_space<vmem>>, vector<1x1x1x8xf32>
      %102 = vector.shape_cast %101 : vector<1x1x1x8xf32> to vector<1x8xf32>
      %103 = vector.broadcast %102 : vector<1x8xf32> to vector<8x8xf32>
      %104 = arith.addf %99, %103 : vector<8x8xf32>
      %105 = arith.truncf %104 : vector<8x8xf32> to vector<8x8xbf16>
      %106 = arith.index_cast %arg41 : i32 to index
      %c0_40 = arith.constant 0 : index
      %c0_41 = arith.constant 0 : index
      %c0_42 = arith.constant 0 : index
      %107 = vector.load %arg12[%106, %c0_40, %c0_41, %c0_42] : memref<2x4x32x8xbf16, #tpu.memory_space<vmem>>, vector<1x1x32x8xbf16>
      %108 = vector.shape_cast %107 : vector<1x1x32x8xbf16> to vector<32x8xbf16>
      %cst_43 = arith.constant dense<0.000000e+00> : vector<8x8xf32>
      %109 = tpu.matmul %89, %108, %cst_43 {dimension_numbers = #tpu.dot_dimension_numbers<[1], [0], [0], [1], [0, 0, 1, 1], [], []>} : vector<8x32xbf16>, vector<32x8xbf16>, vector<8x8xf32> -> vector<8x8xf32>
      %110 = arith.index_cast %arg41 : i32 to index
      %c0_44 = arith.constant 0 : index
      %c0_45 = arith.constant 0 : index
      %c0_46 = arith.constant 0 : index
      %111 = vector.load %arg13[%110, %c0_44, %c0_45, %c0_46] : memref<2x4x1x8xf32, #tpu.memory_space<vmem>>, vector<1x1x1x8xf32>
      %112 = vector.shape_cast %111 : vector<1x1x1x8xf32> to vector<1x8xf32>
      %113 = vector.broadcast %112 : vector<1x8xf32> to vector<8x8xf32>
      %114 = arith.addf %109, %113 : vector<8x8xf32>
      %115 = arith.truncf %114 : vector<8x8xf32> to vector<8x8xbf16>
      %116 = arith.index_cast %arg41 : i32 to index
      %c0_47 = arith.constant 0 : index
      %c0_48 = arith.constant 0 : index
      %c0_49 = arith.constant 0 : index
      %117 = vector.load %arg14[%116, %c0_47, %c0_48, %c0_49] : memref<2x4x32x8xbf16, #tpu.memory_space<vmem>>, vector<1x1x32x8xbf16>
      %118 = vector.shape_cast %117 : vector<1x1x32x8xbf16> to vector<32x8xbf16>
      %cst_50 = arith.constant dense<0.000000e+00> : vector<8x8xf32>
      %119 = tpu.matmul %89, %118, %cst_50 {dimension_numbers = #tpu.dot_dimension_numbers<[1], [0], [0], [1], [0, 0, 1, 1], [], []>} : vector<8x32xbf16>, vector<32x8xbf16>, vector<8x8xf32> -> vector<8x8xf32>
      %120 = arith.index_cast %arg41 : i32 to index
      %c0_51 = arith.constant 0 : index
      %c0_52 = arith.constant 0 : index
      %c0_53 = arith.constant 0 : index
      %121 = vector.load %arg15[%120, %c0_51, %c0_52, %c0_53] : memref<2x4x1x8xf32, #tpu.memory_space<vmem>>, vector<1x1x1x8xf32>
      %122 = vector.shape_cast %121 : vector<1x1x1x8xf32> to vector<1x8xf32>
      %123 = vector.broadcast %122 : vector<1x8xf32> to vector<8x8xf32>
      %124 = arith.addf %119, %123 : vector<8x8xf32>
      %125 = arith.truncf %124 : vector<8x8xf32> to vector<8x8xbf16>
      %cst_54 = arith.constant dense<0.000000e+00> : vector<8x8xf32>
      %126 = tpu.matmul %105, %115, %cst_54 {dimension_numbers = #tpu.dot_dimension_numbers<[1], [1], [0], [0], [0, 0, 1, 0], [], []>} : vector<8x8xbf16>, vector<8x8xbf16>, vector<8x8xf32> -> vector<8x8xf32>
      %cst_55 = arith.constant dense<0.000000e+00> : vector<8x9xf32>
      %127 = tpu.matmul %105, %92, %cst_55 {dimension_numbers = #tpu.dot_dimension_numbers<[1], [1], [0], [0], [0, 0, 1, 0], [], []>} : vector<8x8xbf16>, vector<9x8xbf16>, vector<8x9xf32> -> vector<8x9xf32>
      %128 = vector.extract_strided_slice %127 {offsets = [0, 0], sizes = [8, 1], strides = [1, 1]} : vector<8x9xf32> to vector<8x1xf32>
      %129 = vector.broadcast %128 : vector<8x1xf32> to vector<8x8xf32>
      %130 = arith.mulf %21, %129 : vector<8x8xf32>
      %131 = arith.addf %126, %130 : vector<8x8xf32>
      %132 = vector.extract_strided_slice %127 {offsets = [0, 1], sizes = [8, 1], strides = [1, 1]} : vector<8x9xf32> to vector<8x1xf32>
      %133 = vector.broadcast %132 : vector<8x1xf32> to vector<8x8xf32>
      %134 = arith.mulf %25, %133 : vector<8x8xf32>
      %135 = arith.addf %131, %134 : vector<8x8xf32>
      %136 = vector.extract_strided_slice %127 {offsets = [0, 2], sizes = [8, 1], strides = [1, 1]} : vector<8x9xf32> to vector<8x1xf32>
      %137 = vector.broadcast %136 : vector<8x1xf32> to vector<8x8xf32>
      %138 = arith.mulf %29, %137 : vector<8x8xf32>
      %139 = arith.addf %135, %138 : vector<8x8xf32>
      %140 = vector.extract_strided_slice %127 {offsets = [0, 3], sizes = [8, 1], strides = [1, 1]} : vector<8x9xf32> to vector<8x1xf32>
      %141 = vector.broadcast %140 : vector<8x1xf32> to vector<8x8xf32>
      %142 = arith.mulf %33, %141 : vector<8x8xf32>
      %143 = arith.addf %139, %142 : vector<8x8xf32>
      %144 = vector.extract_strided_slice %127 {offsets = [0, 4], sizes = [8, 1], strides = [1, 1]} : vector<8x9xf32> to vector<8x1xf32>
      %145 = vector.broadcast %144 : vector<8x1xf32> to vector<8x8xf32>
      %146 = arith.mulf %37, %145 : vector<8x8xf32>
      %147 = arith.addf %143, %146 : vector<8x8xf32>
      %148 = vector.extract_strided_slice %127 {offsets = [0, 5], sizes = [8, 1], strides = [1, 1]} : vector<8x9xf32> to vector<8x1xf32>
      %149 = vector.broadcast %148 : vector<8x1xf32> to vector<8x8xf32>
      %150 = arith.mulf %41, %149 : vector<8x8xf32>
      %151 = arith.addf %147, %150 : vector<8x8xf32>
      %152 = vector.extract_strided_slice %127 {offsets = [0, 6], sizes = [8, 1], strides = [1, 1]} : vector<8x9xf32> to vector<8x1xf32>
      %153 = vector.broadcast %152 : vector<8x1xf32> to vector<8x8xf32>
      %154 = arith.mulf %45, %153 : vector<8x8xf32>
      %155 = arith.addf %151, %154 : vector<8x8xf32>
      %156 = vector.extract_strided_slice %127 {offsets = [0, 7], sizes = [8, 1], strides = [1, 1]} : vector<8x9xf32> to vector<8x1xf32>
      %157 = vector.broadcast %156 : vector<8x1xf32> to vector<8x8xf32>
      %158 = arith.mulf %49, %157 : vector<8x8xf32>
      %159 = arith.addf %155, %158 : vector<8x8xf32>
      %160 = vector.extract_strided_slice %127 {offsets = [0, 8], sizes = [8, 1], strides = [1, 1]} : vector<8x9xf32> to vector<8x1xf32>
      %161 = vector.broadcast %160 : vector<8x1xf32> to vector<8x8xf32>
      %162 = arith.mulf %53, %161 : vector<8x8xf32>
      %163 = arith.addf %159, %162 : vector<8x8xf32>
      %cst_56 = arith.constant -1.000000e+04 : f32
      %164 = vector.broadcast %cst_56 : f32 to vector<8x8xf32>
      %165 = arith.select %11, %163, %164 : vector<8x8xi1>, vector<8x8xf32>
      %cst_57 = arith.constant dense<0xFF800000> : vector<8xf32>
      %166 = vector.multi_reduction <maximumf>, %165, %cst_57 [1] : vector<8x8xf32> to vector<8xf32>
      %167 = vector.shape_cast %166 : vector<8xf32> to vector<8x1xf32>
      %168 = vector.broadcast %167 : vector<8x1xf32> to vector<8x8xf32>
      %169 = arith.subf %165, %168 : vector<8x8xf32>
      %170 = math.exp %169 : vector<8x8xf32>
      %cst_58 = arith.constant dense<0.000000e+00> : vector<8xf32>
      %171 = vector.multi_reduction <add>, %170, %cst_58 [1] : vector<8x8xf32> to vector<8xf32>
      %172 = vector.shape_cast %171 : vector<8xf32> to vector<8x1xf32>
      %173 = tpu.reciprocal %172 {approx = true} : vector<8x1xf32> -> vector<8x1xf32>
      %174 = vector.broadcast %173 : vector<8x1xf32> to vector<8x8xf32>
      %175 = arith.mulf %170, %174 : vector<8x8xf32>
      %176 = arith.truncf %175 : vector<8x8xf32> to vector<8x8xbf16>
      %cst_59 = arith.constant dense<0.000000e+00> : vector<8x8xf32>
      %177 = tpu.matmul %176, %125, %cst_59 {dimension_numbers = #tpu.dot_dimension_numbers<[1], [0], [0], [1], [0, 0, 1, 1], [], []>} : vector<8x8xbf16>, vector<8x8xbf16>, vector<8x8xf32> -> vector<8x8xf32>
      %178 = arith.mulf %175, %21 : vector<8x8xf32>
      %cst_60 = arith.constant dense<0.000000e+00> : vector<8xf32>
      %179 = vector.multi_reduction <add>, %178, %cst_60 [1] : vector<8x8xf32> to vector<8xf32>
      %180 = vector.shape_cast %179 : vector<8xf32> to vector<8x1xf32>
      %181 = arith.mulf %175, %25 : vector<8x8xf32>
      %cst_61 = arith.constant dense<0.000000e+00> : vector<8xf32>
      %182 = vector.multi_reduction <add>, %181, %cst_61 [1] : vector<8x8xf32> to vector<8xf32>
      %183 = vector.shape_cast %182 : vector<8xf32> to vector<8x1xf32>
      %184 = arith.mulf %175, %29 : vector<8x8xf32>
      %cst_62 = arith.constant dense<0.000000e+00> : vector<8xf32>
      %185 = vector.multi_reduction <add>, %184, %cst_62 [1] : vector<8x8xf32> to vector<8xf32>
      %186 = vector.shape_cast %185 : vector<8xf32> to vector<8x1xf32>
      %187 = arith.mulf %175, %33 : vector<8x8xf32>
      %cst_63 = arith.constant dense<0.000000e+00> : vector<8xf32>
      %188 = vector.multi_reduction <add>, %187, %cst_63 [1] : vector<8x8xf32> to vector<8xf32>
      %189 = vector.shape_cast %188 : vector<8xf32> to vector<8x1xf32>
      %190 = arith.mulf %175, %37 : vector<8x8xf32>
      %cst_64 = arith.constant dense<0.000000e+00> : vector<8xf32>
      %191 = vector.multi_reduction <add>, %190, %cst_64 [1] : vector<8x8xf32> to vector<8xf32>
      %192 = vector.shape_cast %191 : vector<8xf32> to vector<8x1xf32>
      %193 = arith.mulf %175, %41 : vector<8x8xf32>
      %cst_65 = arith.constant dense<0.000000e+00> : vector<8xf32>
      %194 = vector.multi_reduction <add>, %193, %cst_65 [1] : vector<8x8xf32> to vector<8xf32>
      %195 = vector.shape_cast %194 : vector<8xf32> to vector<8x1xf32>
      %196 = arith.mulf %175, %45 : vector<8x8xf32>
      %cst_66 = arith.constant dense<0.000000e+00> : vector<8xf32>
      %197 = vector.multi_reduction <add>, %196, %cst_66 [1] : vector<8x8xf32> to vector<8xf32>
      %198 = vector.shape_cast %197 : vector<8xf32> to vector<8x1xf32>
      %199 = arith.mulf %175, %49 : vector<8x8xf32>
      %cst_67 = arith.constant dense<0.000000e+00> : vector<8xf32>
      %200 = vector.multi_reduction <add>, %199, %cst_67 [1] : vector<8x8xf32> to vector<8xf32>
      %201 = vector.shape_cast %200 : vector<8xf32> to vector<8x1xf32>
      %202 = arith.mulf %175, %53 : vector<8x8xf32>
      %cst_68 = arith.constant dense<0.000000e+00> : vector<8xf32>
      %203 = vector.multi_reduction <add>, %202, %cst_68 [1] : vector<8x8xf32> to vector<8xf32>
      %204 = vector.shape_cast %203 : vector<8xf32> to vector<8x1xf32>
      %205 = tpu.concatenate %180, %183, %186, %189, %192, %195, %198, %201, %204 in 1 : vector<8x1xf32>, vector<8x1xf32>, vector<8x1xf32>, vector<8x1xf32>, vector<8x1xf32>, vector<8x1xf32>, vector<8x1xf32>, vector<8x1xf32>, vector<8x1xf32> -> vector<8x9xf32>
      %206 = arith.truncf %205 : vector<8x9xf32> to vector<8x9xbf16>
      %cst_69 = arith.constant dense<0.000000e+00> : vector<8x8xf32>
      %207 = tpu.matmul %206, %95, %cst_69 {dimension_numbers = #tpu.dot_dimension_numbers<[1], [0], [0], [1], [0, 0, 1, 1], [], []>} : vector<8x9xbf16>, vector<9x8xbf16>, vector<8x8xf32> -> vector<8x8xf32>
      %208 = arith.addf %177, %207 : vector<8x8xf32>
      %209 = arith.index_cast %arg41 : i32 to index
      %c1 = arith.constant 1 : index
      %c0_70 = arith.constant 0 : index
      %c0_71 = arith.constant 0 : index
      %210 = vector.load %arg10[%209, %c1, %c0_70, %c0_71] : memref<2x4x32x8xbf16, #tpu.memory_space<vmem>>, vector<1x1x32x8xbf16>
      %211 = vector.shape_cast %210 : vector<1x1x32x8xbf16> to vector<32x8xbf16>
      %cst_72 = arith.constant dense<0.000000e+00> : vector<8x8xf32>
      %212 = tpu.matmul %89, %211, %cst_72 {dimension_numbers = #tpu.dot_dimension_numbers<[1], [0], [0], [1], [0, 0, 1, 1], [], []>} : vector<8x32xbf16>, vector<32x8xbf16>, vector<8x8xf32> -> vector<8x8xf32>
      %213 = arith.index_cast %arg41 : i32 to index
      %c1_73 = arith.constant 1 : index
      %c0_74 = arith.constant 0 : index
      %c0_75 = arith.constant 0 : index
      %214 = vector.load %arg11[%213, %c1_73, %c0_74, %c0_75] : memref<2x4x1x8xf32, #tpu.memory_space<vmem>>, vector<1x1x1x8xf32>
      %215 = vector.shape_cast %214 : vector<1x1x1x8xf32> to vector<1x8xf32>
      %216 = vector.broadcast %215 : vector<1x8xf32> to vector<8x8xf32>
      %217 = arith.addf %212, %216 : vector<8x8xf32>
      %218 = arith.truncf %217 : vector<8x8xf32> to vector<8x8xbf16>
      %219 = arith.index_cast %arg41 : i32 to index
      %c1_76 = arith.constant 1 : index
      %c0_77 = arith.constant 0 : index
      %c0_78 = arith.constant 0 : index
      %220 = vector.load %arg12[%219, %c1_76, %c0_77, %c0_78] : memref<2x4x32x8xbf16, #tpu.memory_space<vmem>>, vector<1x1x32x8xbf16>
      %221 = vector.shape_cast %220 : vector<1x1x32x8xbf16> to vector<32x8xbf16>
      %cst_79 = arith.constant dense<0.000000e+00> : vector<8x8xf32>
      %222 = tpu.matmul %89, %221, %cst_79 {dimension_numbers = #tpu.dot_dimension_numbers<[1], [0], [0], [1], [0, 0, 1, 1], [], []>} : vector<8x32xbf16>, vector<32x8xbf16>, vector<8x8xf32> -> vector<8x8xf32>
      %223 = arith.index_cast %arg41 : i32 to index
      %c1_80 = arith.constant 1 : index
      %c0_81 = arith.constant 0 : index
      %c0_82 = arith.constant 0 : index
      %224 = vector.load %arg13[%223, %c1_80, %c0_81, %c0_82] : memref<2x4x1x8xf32, #tpu.memory_space<vmem>>, vector<1x1x1x8xf32>
      %225 = vector.shape_cast %224 : vector<1x1x1x8xf32> to vector<1x8xf32>
      %226 = vector.broadcast %225 : vector<1x8xf32> to vector<8x8xf32>
      %227 = arith.addf %222, %226 : vector<8x8xf32>
      %228 = arith.truncf %227 : vector<8x8xf32> to vector<8x8xbf16>
      %229 = arith.index_cast %arg41 : i32 to index
      %c1_83 = arith.constant 1 : index
      %c0_84 = arith.constant 0 : index
      %c0_85 = arith.constant 0 : index
      %230 = vector.load %arg14[%229, %c1_83, %c0_84, %c0_85] : memref<2x4x32x8xbf16, #tpu.memory_space<vmem>>, vector<1x1x32x8xbf16>
      %231 = vector.shape_cast %230 : vector<1x1x32x8xbf16> to vector<32x8xbf16>
      %cst_86 = arith.constant dense<0.000000e+00> : vector<8x8xf32>
      %232 = tpu.matmul %89, %231, %cst_86 {dimension_numbers = #tpu.dot_dimension_numbers<[1], [0], [0], [1], [0, 0, 1, 1], [], []>} : vector<8x32xbf16>, vector<32x8xbf16>, vector<8x8xf32> -> vector<8x8xf32>
      %233 = arith.index_cast %arg41 : i32 to index
      %c1_87 = arith.constant 1 : index
      %c0_88 = arith.constant 0 : index
      %c0_89 = arith.constant 0 : index
      %234 = vector.load %arg15[%233, %c1_87, %c0_88, %c0_89] : memref<2x4x1x8xf32, #tpu.memory_space<vmem>>, vector<1x1x1x8xf32>
      %235 = vector.shape_cast %234 : vector<1x1x1x8xf32> to vector<1x8xf32>
      %236 = vector.broadcast %235 : vector<1x8xf32> to vector<8x8xf32>
      %237 = arith.addf %232, %236 : vector<8x8xf32>
      %238 = arith.truncf %237 : vector<8x8xf32> to vector<8x8xbf16>
      %cst_90 = arith.constant dense<0.000000e+00> : vector<8x8xf32>
      %239 = tpu.matmul %218, %228, %cst_90 {dimension_numbers = #tpu.dot_dimension_numbers<[1], [1], [0], [0], [0, 0, 1, 0], [], []>} : vector<8x8xbf16>, vector<8x8xbf16>, vector<8x8xf32> -> vector<8x8xf32>
      %cst_91 = arith.constant dense<0.000000e+00> : vector<8x9xf32>
      %240 = tpu.matmul %218, %92, %cst_91 {dimension_numbers = #tpu.dot_dimension_numbers<[1], [1], [0], [0], [0, 0, 1, 0], [], []>} : vector<8x8xbf16>, vector<9x8xbf16>, vector<8x9xf32> -> vector<8x9xf32>
      %241 = vector.extract_strided_slice %240 {offsets = [0, 0], sizes = [8, 1], strides = [1, 1]} : vector<8x9xf32> to vector<8x1xf32>
      %242 = vector.broadcast %241 : vector<8x1xf32> to vector<8x8xf32>
      %243 = arith.mulf %21, %242 : vector<8x8xf32>
      %244 = arith.addf %239, %243 : vector<8x8xf32>
      %245 = vector.extract_strided_slice %240 {offsets = [0, 1], sizes = [8, 1], strides = [1, 1]} : vector<8x9xf32> to vector<8x1xf32>
      %246 = vector.broadcast %245 : vector<8x1xf32> to vector<8x8xf32>
      %247 = arith.mulf %25, %246 : vector<8x8xf32>
      %248 = arith.addf %244, %247 : vector<8x8xf32>
      %249 = vector.extract_strided_slice %240 {offsets = [0, 2], sizes = [8, 1], strides = [1, 1]} : vector<8x9xf32> to vector<8x1xf32>
      %250 = vector.broadcast %249 : vector<8x1xf32> to vector<8x8xf32>
      %251 = arith.mulf %29, %250 : vector<8x8xf32>
      %252 = arith.addf %248, %251 : vector<8x8xf32>
      %253 = vector.extract_strided_slice %240 {offsets = [0, 3], sizes = [8, 1], strides = [1, 1]} : vector<8x9xf32> to vector<8x1xf32>
      %254 = vector.broadcast %253 : vector<8x1xf32> to vector<8x8xf32>
      %255 = arith.mulf %33, %254 : vector<8x8xf32>
      %256 = arith.addf %252, %255 : vector<8x8xf32>
      %257 = vector.extract_strided_slice %240 {offsets = [0, 4], sizes = [8, 1], strides = [1, 1]} : vector<8x9xf32> to vector<8x1xf32>
      %258 = vector.broadcast %257 : vector<8x1xf32> to vector<8x8xf32>
      %259 = arith.mulf %37, %258 : vector<8x8xf32>
      %260 = arith.addf %256, %259 : vector<8x8xf32>
      %261 = vector.extract_strided_slice %240 {offsets = [0, 5], sizes = [8, 1], strides = [1, 1]} : vector<8x9xf32> to vector<8x1xf32>
      %262 = vector.broadcast %261 : vector<8x1xf32> to vector<8x8xf32>
      %263 = arith.mulf %41, %262 : vector<8x8xf32>
      %264 = arith.addf %260, %263 : vector<8x8xf32>
      %265 = vector.extract_strided_slice %240 {offsets = [0, 6], sizes = [8, 1], strides = [1, 1]} : vector<8x9xf32> to vector<8x1xf32>
      %266 = vector.broadcast %265 : vector<8x1xf32> to vector<8x8xf32>
      %267 = arith.mulf %45, %266 : vector<8x8xf32>
      %268 = arith.addf %264, %267 : vector<8x8xf32>
      %269 = vector.extract_strided_slice %240 {offsets = [0, 7], sizes = [8, 1], strides = [1, 1]} : vector<8x9xf32> to vector<8x1xf32>
      %270 = vector.broadcast %269 : vector<8x1xf32> to vector<8x8xf32>
      %271 = arith.mulf %49, %270 : vector<8x8xf32>
      %272 = arith.addf %268, %271 : vector<8x8xf32>
      %273 = vector.extract_strided_slice %240 {offsets = [0, 8], sizes = [8, 1], strides = [1, 1]} : vector<8x9xf32> to vector<8x1xf32>
      %274 = vector.broadcast %273 : vector<8x1xf32> to vector<8x8xf32>
      %275 = arith.mulf %53, %274 : vector<8x8xf32>
      %276 = arith.addf %272, %275 : vector<8x8xf32>
      %cst_92 = arith.constant -1.000000e+04 : f32
      %277 = vector.broadcast %cst_92 : f32 to vector<8x8xf32>
      %278 = arith.select %11, %276, %277 : vector<8x8xi1>, vector<8x8xf32>
      %cst_93 = arith.constant dense<0xFF800000> : vector<8xf32>
      %279 = vector.multi_reduction <maximumf>, %278, %cst_93 [1] : vector<8x8xf32> to vector<8xf32>
      %280 = vector.shape_cast %279 : vector<8xf32> to vector<8x1xf32>
      %281 = vector.broadcast %280 : vector<8x1xf32> to vector<8x8xf32>
      %282 = arith.subf %278, %281 : vector<8x8xf32>
      %283 = math.exp %282 : vector<8x8xf32>
      %cst_94 = arith.constant dense<0.000000e+00> : vector<8xf32>
      %284 = vector.multi_reduction <add>, %283, %cst_94 [1] : vector<8x8xf32> to vector<8xf32>
      %285 = vector.shape_cast %284 : vector<8xf32> to vector<8x1xf32>
      %286 = tpu.reciprocal %285 {approx = true} : vector<8x1xf32> -> vector<8x1xf32>
      %287 = vector.broadcast %286 : vector<8x1xf32> to vector<8x8xf32>
      %288 = arith.mulf %283, %287 : vector<8x8xf32>
      %289 = arith.truncf %288 : vector<8x8xf32> to vector<8x8xbf16>
      %cst_95 = arith.constant dense<0.000000e+00> : vector<8x8xf32>
      %290 = tpu.matmul %289, %238, %cst_95 {dimension_numbers = #tpu.dot_dimension_numbers<[1], [0], [0], [1], [0, 0, 1, 1], [], []>} : vector<8x8xbf16>, vector<8x8xbf16>, vector<8x8xf32> -> vector<8x8xf32>
      %291 = arith.mulf %288, %21 : vector<8x8xf32>
      %cst_96 = arith.constant dense<0.000000e+00> : vector<8xf32>
      %292 = vector.multi_reduction <add>, %291, %cst_96 [1] : vector<8x8xf32> to vector<8xf32>
      %293 = vector.shape_cast %292 : vector<8xf32> to vector<8x1xf32>
      %294 = arith.mulf %288, %25 : vector<8x8xf32>
      %cst_97 = arith.constant dense<0.000000e+00> : vector<8xf32>
      %295 = vector.multi_reduction <add>, %294, %cst_97 [1] : vector<8x8xf32> to vector<8xf32>
      %296 = vector.shape_cast %295 : vector<8xf32> to vector<8x1xf32>
      %297 = arith.mulf %288, %29 : vector<8x8xf32>
      %cst_98 = arith.constant dense<0.000000e+00> : vector<8xf32>
      %298 = vector.multi_reduction <add>, %297, %cst_98 [1] : vector<8x8xf32> to vector<8xf32>
      %299 = vector.shape_cast %298 : vector<8xf32> to vector<8x1xf32>
      %300 = arith.mulf %288, %33 : vector<8x8xf32>
      %cst_99 = arith.constant dense<0.000000e+00> : vector<8xf32>
      %301 = vector.multi_reduction <add>, %300, %cst_99 [1] : vector<8x8xf32> to vector<8xf32>
      %302 = vector.shape_cast %301 : vector<8xf32> to vector<8x1xf32>
      %303 = arith.mulf %288, %37 : vector<8x8xf32>
      %cst_100 = arith.constant dense<0.000000e+00> : vector<8xf32>
      %304 = vector.multi_reduction <add>, %303, %cst_100 [1] : vector<8x8xf32> to vector<8xf32>
      %305 = vector.shape_cast %304 : vector<8xf32> to vector<8x1xf32>
      %306 = arith.mulf %288, %41 : vector<8x8xf32>
      %cst_101 = arith.constant dense<0.000000e+00> : vector<8xf32>
      %307 = vector.multi_reduction <add>, %306, %cst_101 [1] : vector<8x8xf32> to vector<8xf32>
      %308 = vector.shape_cast %307 : vector<8xf32> to vector<8x1xf32>
      %309 = arith.mulf %288, %45 : vector<8x8xf32>
      %cst_102 = arith.constant dense<0.000000e+00> : vector<8xf32>
      %310 = vector.multi_reduction <add>, %309, %cst_102 [1] : vector<8x8xf32> to vector<8xf32>
      %311 = vector.shape_cast %310 : vector<8xf32> to vector<8x1xf32>
      %312 = arith.mulf %288, %49 : vector<8x8xf32>
      %cst_103 = arith.constant dense<0.000000e+00> : vector<8xf32>
      %313 = vector.multi_reduction <add>, %312, %cst_103 [1] : vector<8x8xf32> to vector<8xf32>
      %314 = vector.shape_cast %313 : vector<8xf32> to vector<8x1xf32>
      %315 = arith.mulf %288, %53 : vector<8x8xf32>
      %cst_104 = arith.constant dense<0.000000e+00> : vector<8xf32>
      %316 = vector.multi_reduction <add>, %315, %cst_104 [1] : vector<8x8xf32> to vector<8xf32>
      %317 = vector.shape_cast %316 : vector<8xf32> to vector<8x1xf32>
      %318 = tpu.concatenate %293, %296, %299, %302, %305, %308, %311, %314, %317 in 1 : vector<8x1xf32>, vector<8x1xf32>, vector<8x1xf32>, vector<8x1xf32>, vector<8x1xf32>, vector<8x1xf32>, vector<8x1xf32>, vector<8x1xf32>, vector<8x1xf32> -> vector<8x9xf32>
      %319 = arith.truncf %318 : vector<8x9xf32> to vector<8x9xbf16>
      %cst_105 = arith.constant dense<0.000000e+00> : vector<8x8xf32>
      %320 = tpu.matmul %319, %95, %cst_105 {dimension_numbers = #tpu.dot_dimension_numbers<[1], [0], [0], [1], [0, 0, 1, 1], [], []>} : vector<8x9xbf16>, vector<9x8xbf16>, vector<8x8xf32> -> vector<8x8xf32>
      %321 = arith.addf %290, %320 : vector<8x8xf32>
      %322 = arith.index_cast %arg41 : i32 to index
      %c2 = arith.constant 2 : index
      %c0_106 = arith.constant 0 : index
      %c0_107 = arith.constant 0 : index
      %323 = vector.load %arg10[%322, %c2, %c0_106, %c0_107] : memref<2x4x32x8xbf16, #tpu.memory_space<vmem>>, vector<1x1x32x8xbf16>
      %324 = vector.shape_cast %323 : vector<1x1x32x8xbf16> to vector<32x8xbf16>
      %cst_108 = arith.constant dense<0.000000e+00> : vector<8x8xf32>
      %325 = tpu.matmul %89, %324, %cst_108 {dimension_numbers = #tpu.dot_dimension_numbers<[1], [0], [0], [1], [0, 0, 1, 1], [], []>} : vector<8x32xbf16>, vector<32x8xbf16>, vector<8x8xf32> -> vector<8x8xf32>
      %326 = arith.index_cast %arg41 : i32 to index
      %c2_109 = arith.constant 2 : index
      %c0_110 = arith.constant 0 : index
      %c0_111 = arith.constant 0 : index
      %327 = vector.load %arg11[%326, %c2_109, %c0_110, %c0_111] : memref<2x4x1x8xf32, #tpu.memory_space<vmem>>, vector<1x1x1x8xf32>
      %328 = vector.shape_cast %327 : vector<1x1x1x8xf32> to vector<1x8xf32>
      %329 = vector.broadcast %328 : vector<1x8xf32> to vector<8x8xf32>
      %330 = arith.addf %325, %329 : vector<8x8xf32>
      %331 = arith.truncf %330 : vector<8x8xf32> to vector<8x8xbf16>
      %332 = arith.index_cast %arg41 : i32 to index
      %c2_112 = arith.constant 2 : index
      %c0_113 = arith.constant 0 : index
      %c0_114 = arith.constant 0 : index
      %333 = vector.load %arg12[%332, %c2_112, %c0_113, %c0_114] : memref<2x4x32x8xbf16, #tpu.memory_space<vmem>>, vector<1x1x32x8xbf16>
      %334 = vector.shape_cast %333 : vector<1x1x32x8xbf16> to vector<32x8xbf16>
      %cst_115 = arith.constant dense<0.000000e+00> : vector<8x8xf32>
      %335 = tpu.matmul %89, %334, %cst_115 {dimension_numbers = #tpu.dot_dimension_numbers<[1], [0], [0], [1], [0, 0, 1, 1], [], []>} : vector<8x32xbf16>, vector<32x8xbf16>, vector<8x8xf32> -> vector<8x8xf32>
      %336 = arith.index_cast %arg41 : i32 to index
      %c2_116 = arith.constant 2 : index
      %c0_117 = arith.constant 0 : index
      %c0_118 = arith.constant 0 : index
      %337 = vector.load %arg13[%336, %c2_116, %c0_117, %c0_118] : memref<2x4x1x8xf32, #tpu.memory_space<vmem>>, vector<1x1x1x8xf32>
      %338 = vector.shape_cast %337 : vector<1x1x1x8xf32> to vector<1x8xf32>
      %339 = vector.broadcast %338 : vector<1x8xf32> to vector<8x8xf32>
      %340 = arith.addf %335, %339 : vector<8x8xf32>
      %341 = arith.truncf %340 : vector<8x8xf32> to vector<8x8xbf16>
      %342 = arith.index_cast %arg41 : i32 to index
      %c2_119 = arith.constant 2 : index
      %c0_120 = arith.constant 0 : index
      %c0_121 = arith.constant 0 : index
      %343 = vector.load %arg14[%342, %c2_119, %c0_120, %c0_121] : memref<2x4x32x8xbf16, #tpu.memory_space<vmem>>, vector<1x1x32x8xbf16>
      %344 = vector.shape_cast %343 : vector<1x1x32x8xbf16> to vector<32x8xbf16>
      %cst_122 = arith.constant dense<0.000000e+00> : vector<8x8xf32>
      %345 = tpu.matmul %89, %344, %cst_122 {dimension_numbers = #tpu.dot_dimension_numbers<[1], [0], [0], [1], [0, 0, 1, 1], [], []>} : vector<8x32xbf16>, vector<32x8xbf16>, vector<8x8xf32> -> vector<8x8xf32>
      %346 = arith.index_cast %arg41 : i32 to index
      %c2_123 = arith.constant 2 : index
      %c0_124 = arith.constant 0 : index
      %c0_125 = arith.constant 0 : index
      %347 = vector.load %arg15[%346, %c2_123, %c0_124, %c0_125] : memref<2x4x1x8xf32, #tpu.memory_space<vmem>>, vector<1x1x1x8xf32>
      %348 = vector.shape_cast %347 : vector<1x1x1x8xf32> to vector<1x8xf32>
      %349 = vector.broadcast %348 : vector<1x8xf32> to vector<8x8xf32>
      %350 = arith.addf %345, %349 : vector<8x8xf32>
      %351 = arith.truncf %350 : vector<8x8xf32> to vector<8x8xbf16>
      %cst_126 = arith.constant dense<0.000000e+00> : vector<8x8xf32>
      %352 = tpu.matmul %331, %341, %cst_126 {dimension_numbers = #tpu.dot_dimension_numbers<[1], [1], [0], [0], [0, 0, 1, 0], [], []>} : vector<8x8xbf16>, vector<8x8xbf16>, vector<8x8xf32> -> vector<8x8xf32>
      %cst_127 = arith.constant dense<0.000000e+00> : vector<8x9xf32>
      %353 = tpu.matmul %331, %92, %cst_127 {dimension_numbers = #tpu.dot_dimension_numbers<[1], [1], [0], [0], [0, 0, 1, 0], [], []>} : vector<8x8xbf16>, vector<9x8xbf16>, vector<8x9xf32> -> vector<8x9xf32>
      %354 = vector.extract_strided_slice %353 {offsets = [0, 0], sizes = [8, 1], strides = [1, 1]} : vector<8x9xf32> to vector<8x1xf32>
      %355 = vector.broadcast %354 : vector<8x1xf32> to vector<8x8xf32>
      %356 = arith.mulf %21, %355 : vector<8x8xf32>
      %357 = arith.addf %352, %356 : vector<8x8xf32>
      %358 = vector.extract_strided_slice %353 {offsets = [0, 1], sizes = [8, 1], strides = [1, 1]} : vector<8x9xf32> to vector<8x1xf32>
      %359 = vector.broadcast %358 : vector<8x1xf32> to vector<8x8xf32>
      %360 = arith.mulf %25, %359 : vector<8x8xf32>
      %361 = arith.addf %357, %360 : vector<8x8xf32>
      %362 = vector.extract_strided_slice %353 {offsets = [0, 2], sizes = [8, 1], strides = [1, 1]} : vector<8x9xf32> to vector<8x1xf32>
      %363 = vector.broadcast %362 : vector<8x1xf32> to vector<8x8xf32>
      %364 = arith.mulf %29, %363 : vector<8x8xf32>
      %365 = arith.addf %361, %364 : vector<8x8xf32>
      %366 = vector.extract_strided_slice %353 {offsets = [0, 3], sizes = [8, 1], strides = [1, 1]} : vector<8x9xf32> to vector<8x1xf32>
      %367 = vector.broadcast %366 : vector<8x1xf32> to vector<8x8xf32>
      %368 = arith.mulf %33, %367 : vector<8x8xf32>
      %369 = arith.addf %365, %368 : vector<8x8xf32>
      %370 = vector.extract_strided_slice %353 {offsets = [0, 4], sizes = [8, 1], strides = [1, 1]} : vector<8x9xf32> to vector<8x1xf32>
      %371 = vector.broadcast %370 : vector<8x1xf32> to vector<8x8xf32>
      %372 = arith.mulf %37, %371 : vector<8x8xf32>
      %373 = arith.addf %369, %372 : vector<8x8xf32>
      %374 = vector.extract_strided_slice %353 {offsets = [0, 5], sizes = [8, 1], strides = [1, 1]} : vector<8x9xf32> to vector<8x1xf32>
      %375 = vector.broadcast %374 : vector<8x1xf32> to vector<8x8xf32>
      %376 = arith.mulf %41, %375 : vector<8x8xf32>
      %377 = arith.addf %373, %376 : vector<8x8xf32>
      %378 = vector.extract_strided_slice %353 {offsets = [0, 6], sizes = [8, 1], strides = [1, 1]} : vector<8x9xf32> to vector<8x1xf32>
      %379 = vector.broadcast %378 : vector<8x1xf32> to vector<8x8xf32>
      %380 = arith.mulf %45, %379 : vector<8x8xf32>
      %381 = arith.addf %377, %380 : vector<8x8xf32>
      %382 = vector.extract_strided_slice %353 {offsets = [0, 7], sizes = [8, 1], strides = [1, 1]} : vector<8x9xf32> to vector<8x1xf32>
      %383 = vector.broadcast %382 : vector<8x1xf32> to vector<8x8xf32>
      %384 = arith.mulf %49, %383 : vector<8x8xf32>
      %385 = arith.addf %381, %384 : vector<8x8xf32>
      %386 = vector.extract_strided_slice %353 {offsets = [0, 8], sizes = [8, 1], strides = [1, 1]} : vector<8x9xf32> to vector<8x1xf32>
      %387 = vector.broadcast %386 : vector<8x1xf32> to vector<8x8xf32>
      %388 = arith.mulf %53, %387 : vector<8x8xf32>
      %389 = arith.addf %385, %388 : vector<8x8xf32>
      %cst_128 = arith.constant -1.000000e+04 : f32
      %390 = vector.broadcast %cst_128 : f32 to vector<8x8xf32>
      %391 = arith.select %11, %389, %390 : vector<8x8xi1>, vector<8x8xf32>
      %cst_129 = arith.constant dense<0xFF800000> : vector<8xf32>
      %392 = vector.multi_reduction <maximumf>, %391, %cst_129 [1] : vector<8x8xf32> to vector<8xf32>
      %393 = vector.shape_cast %392 : vector<8xf32> to vector<8x1xf32>
      %394 = vector.broadcast %393 : vector<8x1xf32> to vector<8x8xf32>
      %395 = arith.subf %391, %394 : vector<8x8xf32>
      %396 = math.exp %395 : vector<8x8xf32>
      %cst_130 = arith.constant dense<0.000000e+00> : vector<8xf32>
      %397 = vector.multi_reduction <add>, %396, %cst_130 [1] : vector<8x8xf32> to vector<8xf32>
      %398 = vector.shape_cast %397 : vector<8xf32> to vector<8x1xf32>
      %399 = tpu.reciprocal %398 {approx = true} : vector<8x1xf32> -> vector<8x1xf32>
      %400 = vector.broadcast %399 : vector<8x1xf32> to vector<8x8xf32>
      %401 = arith.mulf %396, %400 : vector<8x8xf32>
      %402 = arith.truncf %401 : vector<8x8xf32> to vector<8x8xbf16>
      %cst_131 = arith.constant dense<0.000000e+00> : vector<8x8xf32>
      %403 = tpu.matmul %402, %351, %cst_131 {dimension_numbers = #tpu.dot_dimension_numbers<[1], [0], [0], [1], [0, 0, 1, 1], [], []>} : vector<8x8xbf16>, vector<8x8xbf16>, vector<8x8xf32> -> vector<8x8xf32>
      %404 = arith.mulf %401, %21 : vector<8x8xf32>
      %cst_132 = arith.constant dense<0.000000e+00> : vector<8xf32>
      %405 = vector.multi_reduction <add>, %404, %cst_132 [1] : vector<8x8xf32> to vector<8xf32>
      %406 = vector.shape_cast %405 : vector<8xf32> to vector<8x1xf32>
      %407 = arith.mulf %401, %25 : vector<8x8xf32>
      %cst_133 = arith.constant dense<0.000000e+00> : vector<8xf32>
      %408 = vector.multi_reduction <add>, %407, %cst_133 [1] : vector<8x8xf32> to vector<8xf32>
      %409 = vector.shape_cast %408 : vector<8xf32> to vector<8x1xf32>
      %410 = arith.mulf %401, %29 : vector<8x8xf32>
      %cst_134 = arith.constant dense<0.000000e+00> : vector<8xf32>
      %411 = vector.multi_reduction <add>, %410, %cst_134 [1] : vector<8x8xf32> to vector<8xf32>
      %412 = vector.shape_cast %411 : vector<8xf32> to vector<8x1xf32>
      %413 = arith.mulf %401, %33 : vector<8x8xf32>
      %cst_135 = arith.constant dense<0.000000e+00> : vector<8xf32>
      %414 = vector.multi_reduction <add>, %413, %cst_135 [1] : vector<8x8xf32> to vector<8xf32>
      %415 = vector.shape_cast %414 : vector<8xf32> to vector<8x1xf32>
      %416 = arith.mulf %401, %37 : vector<8x8xf32>
      %cst_136 = arith.constant dense<0.000000e+00> : vector<8xf32>
      %417 = vector.multi_reduction <add>, %416, %cst_136 [1] : vector<8x8xf32> to vector<8xf32>
      %418 = vector.shape_cast %417 : vector<8xf32> to vector<8x1xf32>
      %419 = arith.mulf %401, %41 : vector<8x8xf32>
      %cst_137 = arith.constant dense<0.000000e+00> : vector<8xf32>
      %420 = vector.multi_reduction <add>, %419, %cst_137 [1] : vector<8x8xf32> to vector<8xf32>
      %421 = vector.shape_cast %420 : vector<8xf32> to vector<8x1xf32>
      %422 = arith.mulf %401, %45 : vector<8x8xf32>
      %cst_138 = arith.constant dense<0.000000e+00> : vector<8xf32>
      %423 = vector.multi_reduction <add>, %422, %cst_138 [1] : vector<8x8xf32> to vector<8xf32>
      %424 = vector.shape_cast %423 : vector<8xf32> to vector<8x1xf32>
      %425 = arith.mulf %401, %49 : vector<8x8xf32>
      %cst_139 = arith.constant dense<0.000000e+00> : vector<8xf32>
      %426 = vector.multi_reduction <add>, %425, %cst_139 [1] : vector<8x8xf32> to vector<8xf32>
      %427 = vector.shape_cast %426 : vector<8xf32> to vector<8x1xf32>
      %428 = arith.mulf %401, %53 : vector<8x8xf32>
      %cst_140 = arith.constant dense<0.000000e+00> : vector<8xf32>
      %429 = vector.multi_reduction <add>, %428, %cst_140 [1] : vector<8x8xf32> to vector<8xf32>
      %430 = vector.shape_cast %429 : vector<8xf32> to vector<8x1xf32>
      %431 = tpu.concatenate %406, %409, %412, %415, %418, %421, %424, %427, %430 in 1 : vector<8x1xf32>, vector<8x1xf32>, vector<8x1xf32>, vector<8x1xf32>, vector<8x1xf32>, vector<8x1xf32>, vector<8x1xf32>, vector<8x1xf32>, vector<8x1xf32> -> vector<8x9xf32>
      %432 = arith.truncf %431 : vector<8x9xf32> to vector<8x9xbf16>
      %cst_141 = arith.constant dense<0.000000e+00> : vector<8x8xf32>
      %433 = tpu.matmul %432, %95, %cst_141 {dimension_numbers = #tpu.dot_dimension_numbers<[1], [0], [0], [1], [0, 0, 1, 1], [], []>} : vector<8x9xbf16>, vector<9x8xbf16>, vector<8x8xf32> -> vector<8x8xf32>
      %434 = arith.addf %403, %433 : vector<8x8xf32>
      %435 = arith.index_cast %arg41 : i32 to index
      %c3 = arith.constant 3 : index
      %c0_142 = arith.constant 0 : index
      %c0_143 = arith.constant 0 : index
      %436 = vector.load %arg10[%435, %c3, %c0_142, %c0_143] : memref<2x4x32x8xbf16, #tpu.memory_space<vmem>>, vector<1x1x32x8xbf16>
      %437 = vector.shape_cast %436 : vector<1x1x32x8xbf16> to vector<32x8xbf16>
      %cst_144 = arith.constant dense<0.000000e+00> : vector<8x8xf32>
      %438 = tpu.matmul %89, %437, %cst_144 {dimension_numbers = #tpu.dot_dimension_numbers<[1], [0], [0], [1], [0, 0, 1, 1], [], []>} : vector<8x32xbf16>, vector<32x8xbf16>, vector<8x8xf32> -> vector<8x8xf32>
      %439 = arith.index_cast %arg41 : i32 to index
      %c3_145 = arith.constant 3 : index
      %c0_146 = arith.constant 0 : index
      %c0_147 = arith.constant 0 : index
      %440 = vector.load %arg11[%439, %c3_145, %c0_146, %c0_147] : memref<2x4x1x8xf32, #tpu.memory_space<vmem>>, vector<1x1x1x8xf32>
      %441 = vector.shape_cast %440 : vector<1x1x1x8xf32> to vector<1x8xf32>
      %442 = vector.broadcast %441 : vector<1x8xf32> to vector<8x8xf32>
      %443 = arith.addf %438, %442 : vector<8x8xf32>
      %444 = arith.truncf %443 : vector<8x8xf32> to vector<8x8xbf16>
      %445 = arith.index_cast %arg41 : i32 to index
      %c3_148 = arith.constant 3 : index
      %c0_149 = arith.constant 0 : index
      %c0_150 = arith.constant 0 : index
      %446 = vector.load %arg12[%445, %c3_148, %c0_149, %c0_150] : memref<2x4x32x8xbf16, #tpu.memory_space<vmem>>, vector<1x1x32x8xbf16>
      %447 = vector.shape_cast %446 : vector<1x1x32x8xbf16> to vector<32x8xbf16>
      %cst_151 = arith.constant dense<0.000000e+00> : vector<8x8xf32>
      %448 = tpu.matmul %89, %447, %cst_151 {dimension_numbers = #tpu.dot_dimension_numbers<[1], [0], [0], [1], [0, 0, 1, 1], [], []>} : vector<8x32xbf16>, vector<32x8xbf16>, vector<8x8xf32> -> vector<8x8xf32>
      %449 = arith.index_cast %arg41 : i32 to index
      %c3_152 = arith.constant 3 : index
      %c0_153 = arith.constant 0 : index
      %c0_154 = arith.constant 0 : index
      %450 = vector.load %arg13[%449, %c3_152, %c0_153, %c0_154] : memref<2x4x1x8xf32, #tpu.memory_space<vmem>>, vector<1x1x1x8xf32>
      %451 = vector.shape_cast %450 : vector<1x1x1x8xf32> to vector<1x8xf32>
      %452 = vector.broadcast %451 : vector<1x8xf32> to vector<8x8xf32>
      %453 = arith.addf %448, %452 : vector<8x8xf32>
      %454 = arith.truncf %453 : vector<8x8xf32> to vector<8x8xbf16>
      %455 = arith.index_cast %arg41 : i32 to index
      %c3_155 = arith.constant 3 : index
      %c0_156 = arith.constant 0 : index
      %c0_157 = arith.constant 0 : index
      %456 = vector.load %arg14[%455, %c3_155, %c0_156, %c0_157] : memref<2x4x32x8xbf16, #tpu.memory_space<vmem>>, vector<1x1x32x8xbf16>
      %457 = vector.shape_cast %456 : vector<1x1x32x8xbf16> to vector<32x8xbf16>
      %cst_158 = arith.constant dense<0.000000e+00> : vector<8x8xf32>
      %458 = tpu.matmul %89, %457, %cst_158 {dimension_numbers = #tpu.dot_dimension_numbers<[1], [0], [0], [1], [0, 0, 1, 1], [], []>} : vector<8x32xbf16>, vector<32x8xbf16>, vector<8x8xf32> -> vector<8x8xf32>
      %459 = arith.index_cast %arg41 : i32 to index
      %c3_159 = arith.constant 3 : index
      %c0_160 = arith.constant 0 : index
      %c0_161 = arith.constant 0 : index
      %460 = vector.load %arg15[%459, %c3_159, %c0_160, %c0_161] : memref<2x4x1x8xf32, #tpu.memory_space<vmem>>, vector<1x1x1x8xf32>
      %461 = vector.shape_cast %460 : vector<1x1x1x8xf32> to vector<1x8xf32>
      %462 = vector.broadcast %461 : vector<1x8xf32> to vector<8x8xf32>
      %463 = arith.addf %458, %462 : vector<8x8xf32>
      %464 = arith.truncf %463 : vector<8x8xf32> to vector<8x8xbf16>
      %cst_162 = arith.constant dense<0.000000e+00> : vector<8x8xf32>
      %465 = tpu.matmul %444, %454, %cst_162 {dimension_numbers = #tpu.dot_dimension_numbers<[1], [1], [0], [0], [0, 0, 1, 0], [], []>} : vector<8x8xbf16>, vector<8x8xbf16>, vector<8x8xf32> -> vector<8x8xf32>
      %cst_163 = arith.constant dense<0.000000e+00> : vector<8x9xf32>
      %466 = tpu.matmul %444, %92, %cst_163 {dimension_numbers = #tpu.dot_dimension_numbers<[1], [1], [0], [0], [0, 0, 1, 0], [], []>} : vector<8x8xbf16>, vector<9x8xbf16>, vector<8x9xf32> -> vector<8x9xf32>
      %467 = vector.extract_strided_slice %466 {offsets = [0, 0], sizes = [8, 1], strides = [1, 1]} : vector<8x9xf32> to vector<8x1xf32>
      %468 = vector.broadcast %467 : vector<8x1xf32> to vector<8x8xf32>
      %469 = arith.mulf %21, %468 : vector<8x8xf32>
      %470 = arith.addf %465, %469 : vector<8x8xf32>
      %471 = vector.extract_strided_slice %466 {offsets = [0, 1], sizes = [8, 1], strides = [1, 1]} : vector<8x9xf32> to vector<8x1xf32>
      %472 = vector.broadcast %471 : vector<8x1xf32> to vector<8x8xf32>
      %473 = arith.mulf %25, %472 : vector<8x8xf32>
      %474 = arith.addf %470, %473 : vector<8x8xf32>
      %475 = vector.extract_strided_slice %466 {offsets = [0, 2], sizes = [8, 1], strides = [1, 1]} : vector<8x9xf32> to vector<8x1xf32>
      %476 = vector.broadcast %475 : vector<8x1xf32> to vector<8x8xf32>
      %477 = arith.mulf %29, %476 : vector<8x8xf32>
      %478 = arith.addf %474, %477 : vector<8x8xf32>
      %479 = vector.extract_strided_slice %466 {offsets = [0, 3], sizes = [8, 1], strides = [1, 1]} : vector<8x9xf32> to vector<8x1xf32>
      %480 = vector.broadcast %479 : vector<8x1xf32> to vector<8x8xf32>
      %481 = arith.mulf %33, %480 : vector<8x8xf32>
      %482 = arith.addf %478, %481 : vector<8x8xf32>
      %483 = vector.extract_strided_slice %466 {offsets = [0, 4], sizes = [8, 1], strides = [1, 1]} : vector<8x9xf32> to vector<8x1xf32>
      %484 = vector.broadcast %483 : vector<8x1xf32> to vector<8x8xf32>
      %485 = arith.mulf %37, %484 : vector<8x8xf32>
      %486 = arith.addf %482, %485 : vector<8x8xf32>
      %487 = vector.extract_strided_slice %466 {offsets = [0, 5], sizes = [8, 1], strides = [1, 1]} : vector<8x9xf32> to vector<8x1xf32>
      %488 = vector.broadcast %487 : vector<8x1xf32> to vector<8x8xf32>
      %489 = arith.mulf %41, %488 : vector<8x8xf32>
      %490 = arith.addf %486, %489 : vector<8x8xf32>
      %491 = vector.extract_strided_slice %466 {offsets = [0, 6], sizes = [8, 1], strides = [1, 1]} : vector<8x9xf32> to vector<8x1xf32>
      %492 = vector.broadcast %491 : vector<8x1xf32> to vector<8x8xf32>
      %493 = arith.mulf %45, %492 : vector<8x8xf32>
      %494 = arith.addf %490, %493 : vector<8x8xf32>
      %495 = vector.extract_strided_slice %466 {offsets = [0, 7], sizes = [8, 1], strides = [1, 1]} : vector<8x9xf32> to vector<8x1xf32>
      %496 = vector.broadcast %495 : vector<8x1xf32> to vector<8x8xf32>
      %497 = arith.mulf %49, %496 : vector<8x8xf32>
      %498 = arith.addf %494, %497 : vector<8x8xf32>
      %499 = vector.extract_strided_slice %466 {offsets = [0, 8], sizes = [8, 1], strides = [1, 1]} : vector<8x9xf32> to vector<8x1xf32>
      %500 = vector.broadcast %499 : vector<8x1xf32> to vector<8x8xf32>
      %501 = arith.mulf %53, %500 : vector<8x8xf32>
      %502 = arith.addf %498, %501 : vector<8x8xf32>
      %cst_164 = arith.constant -1.000000e+04 : f32
      %503 = vector.broadcast %cst_164 : f32 to vector<8x8xf32>
      %504 = arith.select %11, %502, %503 : vector<8x8xi1>, vector<8x8xf32>
      %cst_165 = arith.constant dense<0xFF800000> : vector<8xf32>
      %505 = vector.multi_reduction <maximumf>, %504, %cst_165 [1] : vector<8x8xf32> to vector<8xf32>
      %506 = vector.shape_cast %505 : vector<8xf32> to vector<8x1xf32>
      %507 = vector.broadcast %506 : vector<8x1xf32> to vector<8x8xf32>
      %508 = arith.subf %504, %507 : vector<8x8xf32>
      %509 = math.exp %508 : vector<8x8xf32>
      %cst_166 = arith.constant dense<0.000000e+00> : vector<8xf32>
      %510 = vector.multi_reduction <add>, %509, %cst_166 [1] : vector<8x8xf32> to vector<8xf32>
      %511 = vector.shape_cast %510 : vector<8xf32> to vector<8x1xf32>
      %512 = tpu.reciprocal %511 {approx = true} : vector<8x1xf32> -> vector<8x1xf32>
      %513 = vector.broadcast %512 : vector<8x1xf32> to vector<8x8xf32>
      %514 = arith.mulf %509, %513 : vector<8x8xf32>
      %515 = arith.truncf %514 : vector<8x8xf32> to vector<8x8xbf16>
      %cst_167 = arith.constant dense<0.000000e+00> : vector<8x8xf32>
      %516 = tpu.matmul %515, %464, %cst_167 {dimension_numbers = #tpu.dot_dimension_numbers<[1], [0], [0], [1], [0, 0, 1, 1], [], []>} : vector<8x8xbf16>, vector<8x8xbf16>, vector<8x8xf32> -> vector<8x8xf32>
      %517 = arith.mulf %514, %21 : vector<8x8xf32>
      %cst_168 = arith.constant dense<0.000000e+00> : vector<8xf32>
      %518 = vector.multi_reduction <add>, %517, %cst_168 [1] : vector<8x8xf32> to vector<8xf32>
      %519 = vector.shape_cast %518 : vector<8xf32> to vector<8x1xf32>
      %520 = arith.mulf %514, %25 : vector<8x8xf32>
      %cst_169 = arith.constant dense<0.000000e+00> : vector<8xf32>
      %521 = vector.multi_reduction <add>, %520, %cst_169 [1] : vector<8x8xf32> to vector<8xf32>
      %522 = vector.shape_cast %521 : vector<8xf32> to vector<8x1xf32>
      %523 = arith.mulf %514, %29 : vector<8x8xf32>
      %cst_170 = arith.constant dense<0.000000e+00> : vector<8xf32>
      %524 = vector.multi_reduction <add>, %523, %cst_170 [1] : vector<8x8xf32> to vector<8xf32>
      %525 = vector.shape_cast %524 : vector<8xf32> to vector<8x1xf32>
      %526 = arith.mulf %514, %33 : vector<8x8xf32>
      %cst_171 = arith.constant dense<0.000000e+00> : vector<8xf32>
      %527 = vector.multi_reduction <add>, %526, %cst_171 [1] : vector<8x8xf32> to vector<8xf32>
      %528 = vector.shape_cast %527 : vector<8xf32> to vector<8x1xf32>
      %529 = arith.mulf %514, %37 : vector<8x8xf32>
      %cst_172 = arith.constant dense<0.000000e+00> : vector<8xf32>
      %530 = vector.multi_reduction <add>, %529, %cst_172 [1] : vector<8x8xf32> to vector<8xf32>
      %531 = vector.shape_cast %530 : vector<8xf32> to vector<8x1xf32>
      %532 = arith.mulf %514, %41 : vector<8x8xf32>
      %cst_173 = arith.constant dense<0.000000e+00> : vector<8xf32>
      %533 = vector.multi_reduction <add>, %532, %cst_173 [1] : vector<8x8xf32> to vector<8xf32>
      %534 = vector.shape_cast %533 : vector<8xf32> to vector<8x1xf32>
      %535 = arith.mulf %514, %45 : vector<8x8xf32>
      %cst_174 = arith.constant dense<0.000000e+00> : vector<8xf32>
      %536 = vector.multi_reduction <add>, %535, %cst_174 [1] : vector<8x8xf32> to vector<8xf32>
      %537 = vector.shape_cast %536 : vector<8xf32> to vector<8x1xf32>
      %538 = arith.mulf %514, %49 : vector<8x8xf32>
      %cst_175 = arith.constant dense<0.000000e+00> : vector<8xf32>
      %539 = vector.multi_reduction <add>, %538, %cst_175 [1] : vector<8x8xf32> to vector<8xf32>
      %540 = vector.shape_cast %539 : vector<8xf32> to vector<8x1xf32>
      %541 = arith.mulf %514, %53 : vector<8x8xf32>
      %cst_176 = arith.constant dense<0.000000e+00> : vector<8xf32>
      %542 = vector.multi_reduction <add>, %541, %cst_176 [1] : vector<8x8xf32> to vector<8xf32>
      %543 = vector.shape_cast %542 : vector<8xf32> to vector<8x1xf32>
      %544 = tpu.concatenate %519, %522, %525, %528, %531, %534, %537, %540, %543 in 1 : vector<8x1xf32>, vector<8x1xf32>, vector<8x1xf32>, vector<8x1xf32>, vector<8x1xf32>, vector<8x1xf32>, vector<8x1xf32>, vector<8x1xf32>, vector<8x1xf32> -> vector<8x9xf32>
      %545 = arith.truncf %544 : vector<8x9xf32> to vector<8x9xbf16>
      %cst_177 = arith.constant dense<0.000000e+00> : vector<8x8xf32>
      %546 = tpu.matmul %545, %95, %cst_177 {dimension_numbers = #tpu.dot_dimension_numbers<[1], [0], [0], [1], [0, 0, 1, 1], [], []>} : vector<8x9xbf16>, vector<9x8xbf16>, vector<8x8xf32> -> vector<8x8xf32>
      %547 = arith.addf %516, %546 : vector<8x8xf32>
      %548 = tpu.concatenate %208, %321, %434, %547 in 1 : vector<8x8xf32>, vector<8x8xf32>, vector<8x8xf32>, vector<8x8xf32> -> vector<8x32xf32>
      %549 = arith.truncf %548 : vector<8x32xf32> to vector<8x32xbf16>
      %550 = arith.index_cast %arg41 : i32 to index
      %c0_178 = arith.constant 0 : index
      %c0_179 = arith.constant 0 : index
      %551 = vector.load %arg16[%550, %c0_178, %c0_179] : memref<2x32x32xbf16, #tpu.memory_space<vmem>>, vector<1x32x32xbf16>
      %552 = vector.shape_cast %551 : vector<1x32x32xbf16> to vector<32x32xbf16>
      %cst_180 = arith.constant dense<0.000000e+00> : vector<8x32xf32>
      %553 = tpu.matmul %549, %552, %cst_180 {dimension_numbers = #tpu.dot_dimension_numbers<[1], [0], [0], [1], [0, 0, 1, 1], [], []>} : vector<8x32xbf16>, vector<32x32xbf16>, vector<8x32xf32> -> vector<8x32xf32>
      %554 = arith.index_cast %arg41 : i32 to index
      %c0_181 = arith.constant 0 : index
      %c0_182 = arith.constant 0 : index
      %555 = vector.load %arg17[%554, %c0_181, %c0_182] : memref<2x1x32xf32, #tpu.memory_space<vmem>>, vector<1x1x32xf32>
      %556 = vector.shape_cast %555 : vector<1x1x32xf32> to vector<1x32xf32>
      %557 = vector.broadcast %556 : vector<1x32xf32> to vector<8x32xf32>
      %558 = arith.addf %553, %557 : vector<8x32xf32>
      %559 = arith.addf %arg42, %558 : vector<8x32xf32>
      %560 = arith.index_cast %arg41 : i32 to index
      %c0_183 = arith.constant 0 : index
      %c0_184 = arith.constant 0 : index
      %561 = vector.load %arg20[%560, %c0_183, %c0_184] : memref<2x1x32xf32, #tpu.memory_space<vmem>>, vector<1x1x32xf32>
      %562 = vector.shape_cast %561 : vector<1x1x32xf32> to vector<1x32xf32>
      %563 = arith.index_cast %arg41 : i32 to index
      %c0_185 = arith.constant 0 : index
      %c0_186 = arith.constant 0 : index
      %564 = vector.load %arg21[%563, %c0_185, %c0_186] : memref<2x1x32xf32, #tpu.memory_space<vmem>>, vector<1x1x32xf32>
      %565 = vector.shape_cast %564 : vector<1x1x32xf32> to vector<1x32xf32>
      %cst_187 = arith.constant dense<0.000000e+00> : vector<8xf32>
      %566 = vector.multi_reduction <add>, %559, %cst_187 [1] : vector<8x32xf32> to vector<8xf32>
      %567 = vector.shape_cast %566 : vector<8xf32> to vector<8x1xf32>
      %cst_188 = arith.constant 3.200000e+01 : f32
      %568 = vector.broadcast %cst_188 : f32 to vector<8x1xf32>
      %569 = arith.divf %567, %568 : vector<8x1xf32>
      %570 = vector.broadcast %569 : vector<8x1xf32> to vector<8x32xf32>
      %571 = arith.subf %559, %570 : vector<8x32xf32>
      %572 = arith.mulf %571, %571 : vector<8x32xf32>
      %cst_189 = arith.constant dense<0.000000e+00> : vector<8xf32>
      %573 = vector.multi_reduction <add>, %572, %cst_189 [1] : vector<8x32xf32> to vector<8xf32>
      %574 = vector.shape_cast %573 : vector<8xf32> to vector<8x1xf32>
      %cst_190 = arith.constant 3.200000e+01 : f32
      %575 = vector.broadcast %cst_190 : f32 to vector<8x1xf32>
      %576 = arith.divf %574, %575 : vector<8x1xf32>
      %577 = vector.broadcast %569 : vector<8x1xf32> to vector<8x32xf32>
      %578 = arith.subf %559, %577 : vector<8x32xf32>
      %cst_191 = arith.constant 9.99999974E-6 : f32
      %579 = vector.broadcast %cst_191 : f32 to vector<8x1xf32>
      %580 = arith.addf %576, %579 : vector<8x1xf32>
      %581 = math.rsqrt %580 : vector<8x1xf32>
      %582 = vector.broadcast %581 : vector<8x1xf32> to vector<8x32xf32>
      %583 = arith.mulf %578, %582 : vector<8x32xf32>
      %584 = vector.broadcast %562 : vector<1x32xf32> to vector<8x32xf32>
      %585 = arith.mulf %583, %584 : vector<8x32xf32>
      %586 = vector.broadcast %565 : vector<1x32xf32> to vector<8x32xf32>
      %587 = arith.addf %585, %586 : vector<8x32xf32>
      %588 = arith.truncf %587 : vector<8x32xf32> to vector<8x32xbf16>
      %589 = arith.index_cast %arg41 : i32 to index
      %c0_192 = arith.constant 0 : index
      %c0_193 = arith.constant 0 : index
      %c0_194 = arith.constant 0 : index
      %590 = vector.load %arg22[%589, %c0_192, %c0_193, %c0_194] : memref<2x4x32x8xbf16, #tpu.memory_space<vmem>>, vector<1x1x32x8xbf16>
      %591 = vector.shape_cast %590 : vector<1x1x32x8xbf16> to vector<32x8xbf16>
      %cst_195 = arith.constant dense<0.000000e+00> : vector<8x8xf32>
      %592 = tpu.matmul %588, %591, %cst_195 {dimension_numbers = #tpu.dot_dimension_numbers<[1], [0], [0], [1], [0, 0, 1, 1], [], []>} : vector<8x32xbf16>, vector<32x8xbf16>, vector<8x8xf32> -> vector<8x8xf32>
      %593 = arith.index_cast %arg41 : i32 to index
      %c0_196 = arith.constant 0 : index
      %c0_197 = arith.constant 0 : index
      %c0_198 = arith.constant 0 : index
      %594 = vector.load %arg23[%593, %c0_196, %c0_197, %c0_198] : memref<2x4x1x8xf32, #tpu.memory_space<vmem>>, vector<1x1x1x8xf32>
      %595 = vector.shape_cast %594 : vector<1x1x1x8xf32> to vector<1x8xf32>
      %596 = vector.broadcast %595 : vector<1x8xf32> to vector<8x8xf32>
      %597 = arith.addf %592, %596 : vector<8x8xf32>
      %598 = arith.truncf %597 : vector<8x8xf32> to vector<8x8xbf16>
      %599 = arith.index_cast %arg41 : i32 to index
      %c0_199 = arith.constant 0 : index
      %c0_200 = arith.constant 0 : index
      %c0_201 = arith.constant 0 : index
      %600 = vector.load %arg24[%599, %c0_199, %c0_200, %c0_201] : memref<2x4x32x8xbf16, #tpu.memory_space<vmem>>, vector<1x1x32x8xbf16>
      %601 = vector.shape_cast %600 : vector<1x1x32x8xbf16> to vector<32x8xbf16>
      %cst_202 = arith.constant dense<0.000000e+00> : vector<12x8xf32>
      %602 = tpu.matmul %75, %601, %cst_202 {dimension_numbers = #tpu.dot_dimension_numbers<[1], [0], [0], [1], [0, 0, 1, 1], [], []>} : vector<12x32xbf16>, vector<32x8xbf16>, vector<12x8xf32> -> vector<12x8xf32>
      %603 = arith.index_cast %arg41 : i32 to index
      %c0_203 = arith.constant 0 : index
      %c0_204 = arith.constant 0 : index
      %c0_205 = arith.constant 0 : index
      %604 = vector.load %arg25[%603, %c0_203, %c0_204, %c0_205] : memref<2x4x1x8xf32, #tpu.memory_space<vmem>>, vector<1x1x1x8xf32>
      %605 = vector.shape_cast %604 : vector<1x1x1x8xf32> to vector<1x8xf32>
      %606 = vector.broadcast %605 : vector<1x8xf32> to vector<12x8xf32>
      %607 = arith.addf %602, %606 : vector<12x8xf32>
      %608 = arith.truncf %607 : vector<12x8xf32> to vector<12x8xbf16>
      %609 = arith.index_cast %arg41 : i32 to index
      %c0_206 = arith.constant 0 : index
      %c0_207 = arith.constant 0 : index
      %c0_208 = arith.constant 0 : index
      %610 = vector.load %arg26[%609, %c0_206, %c0_207, %c0_208] : memref<2x4x32x8xbf16, #tpu.memory_space<vmem>>, vector<1x1x32x8xbf16>
      %611 = vector.shape_cast %610 : vector<1x1x32x8xbf16> to vector<32x8xbf16>
      %cst_209 = arith.constant dense<0.000000e+00> : vector<12x8xf32>
      %612 = tpu.matmul %75, %611, %cst_209 {dimension_numbers = #tpu.dot_dimension_numbers<[1], [0], [0], [1], [0, 0, 1, 1], [], []>} : vector<12x32xbf16>, vector<32x8xbf16>, vector<12x8xf32> -> vector<12x8xf32>
      %613 = arith.index_cast %arg41 : i32 to index
      %c0_210 = arith.constant 0 : index
      %c0_211 = arith.constant 0 : index
      %c0_212 = arith.constant 0 : index
      %614 = vector.load %arg27[%613, %c0_210, %c0_211, %c0_212] : memref<2x4x1x8xf32, #tpu.memory_space<vmem>>, vector<1x1x1x8xf32>
      %615 = vector.shape_cast %614 : vector<1x1x1x8xf32> to vector<1x8xf32>
      %616 = vector.broadcast %615 : vector<1x8xf32> to vector<12x8xf32>
      %617 = arith.addf %612, %616 : vector<12x8xf32>
      %618 = arith.truncf %617 : vector<12x8xf32> to vector<12x8xbf16>
      %cst_213 = arith.constant dense<0.000000e+00> : vector<8x12xf32>
      %619 = tpu.matmul %598, %608, %cst_213 {dimension_numbers = #tpu.dot_dimension_numbers<[1], [1], [0], [0], [0, 0, 1, 0], [], []>} : vector<8x8xbf16>, vector<12x8xbf16>, vector<8x12xf32> -> vector<8x12xf32>
      %cst_214 = arith.constant -1.000000e+04 : f32
      %620 = vector.broadcast %cst_214 : f32 to vector<8x12xf32>
      %621 = arith.select %14, %619, %620 : vector<8x12xi1>, vector<8x12xf32>
      %cst_215 = arith.constant dense<0xFF800000> : vector<8xf32>
      %622 = vector.multi_reduction <maximumf>, %621, %cst_215 [1] : vector<8x12xf32> to vector<8xf32>
      %623 = vector.shape_cast %622 : vector<8xf32> to vector<8x1xf32>
      %624 = vector.broadcast %623 : vector<8x1xf32> to vector<8x12xf32>
      %625 = arith.subf %621, %624 : vector<8x12xf32>
      %626 = math.exp %625 : vector<8x12xf32>
      %cst_216 = arith.constant dense<0.000000e+00> : vector<8xf32>
      %627 = vector.multi_reduction <add>, %626, %cst_216 [1] : vector<8x12xf32> to vector<8xf32>
      %628 = vector.shape_cast %627 : vector<8xf32> to vector<8x1xf32>
      %629 = tpu.reciprocal %628 {approx = true} : vector<8x1xf32> -> vector<8x1xf32>
      %630 = vector.broadcast %629 : vector<8x1xf32> to vector<8x12xf32>
      %631 = arith.mulf %626, %630 : vector<8x12xf32>
      %632 = arith.truncf %631 : vector<8x12xf32> to vector<8x12xbf16>
      %cst_217 = arith.constant dense<0.000000e+00> : vector<8x8xf32>
      %633 = tpu.matmul %632, %618, %cst_217 {dimension_numbers = #tpu.dot_dimension_numbers<[1], [0], [0], [1], [0, 0, 1, 1], [], []>} : vector<8x12xbf16>, vector<12x8xbf16>, vector<8x8xf32> -> vector<8x8xf32>
      %634 = arith.index_cast %arg41 : i32 to index
      %c1_218 = arith.constant 1 : index
      %c0_219 = arith.constant 0 : index
      %c0_220 = arith.constant 0 : index
      %635 = vector.load %arg22[%634, %c1_218, %c0_219, %c0_220] : memref<2x4x32x8xbf16, #tpu.memory_space<vmem>>, vector<1x1x32x8xbf16>
      %636 = vector.shape_cast %635 : vector<1x1x32x8xbf16> to vector<32x8xbf16>
      %cst_221 = arith.constant dense<0.000000e+00> : vector<8x8xf32>
      %637 = tpu.matmul %588, %636, %cst_221 {dimension_numbers = #tpu.dot_dimension_numbers<[1], [0], [0], [1], [0, 0, 1, 1], [], []>} : vector<8x32xbf16>, vector<32x8xbf16>, vector<8x8xf32> -> vector<8x8xf32>
      %638 = arith.index_cast %arg41 : i32 to index
      %c1_222 = arith.constant 1 : index
      %c0_223 = arith.constant 0 : index
      %c0_224 = arith.constant 0 : index
      %639 = vector.load %arg23[%638, %c1_222, %c0_223, %c0_224] : memref<2x4x1x8xf32, #tpu.memory_space<vmem>>, vector<1x1x1x8xf32>
      %640 = vector.shape_cast %639 : vector<1x1x1x8xf32> to vector<1x8xf32>
      %641 = vector.broadcast %640 : vector<1x8xf32> to vector<8x8xf32>
      %642 = arith.addf %637, %641 : vector<8x8xf32>
      %643 = arith.truncf %642 : vector<8x8xf32> to vector<8x8xbf16>
      %644 = arith.index_cast %arg41 : i32 to index
      %c1_225 = arith.constant 1 : index
      %c0_226 = arith.constant 0 : index
      %c0_227 = arith.constant 0 : index
      %645 = vector.load %arg24[%644, %c1_225, %c0_226, %c0_227] : memref<2x4x32x8xbf16, #tpu.memory_space<vmem>>, vector<1x1x32x8xbf16>
      %646 = vector.shape_cast %645 : vector<1x1x32x8xbf16> to vector<32x8xbf16>
      %cst_228 = arith.constant dense<0.000000e+00> : vector<12x8xf32>
      %647 = tpu.matmul %75, %646, %cst_228 {dimension_numbers = #tpu.dot_dimension_numbers<[1], [0], [0], [1], [0, 0, 1, 1], [], []>} : vector<12x32xbf16>, vector<32x8xbf16>, vector<12x8xf32> -> vector<12x8xf32>
      %648 = arith.index_cast %arg41 : i32 to index
      %c1_229 = arith.constant 1 : index
      %c0_230 = arith.constant 0 : index
      %c0_231 = arith.constant 0 : index
      %649 = vector.load %arg25[%648, %c1_229, %c0_230, %c0_231] : memref<2x4x1x8xf32, #tpu.memory_space<vmem>>, vector<1x1x1x8xf32>
      %650 = vector.shape_cast %649 : vector<1x1x1x8xf32> to vector<1x8xf32>
      %651 = vector.broadcast %650 : vector<1x8xf32> to vector<12x8xf32>
      %652 = arith.addf %647, %651 : vector<12x8xf32>
      %653 = arith.truncf %652 : vector<12x8xf32> to vector<12x8xbf16>
      %654 = arith.index_cast %arg41 : i32 to index
      %c1_232 = arith.constant 1 : index
      %c0_233 = arith.constant 0 : index
      %c0_234 = arith.constant 0 : index
      %655 = vector.load %arg26[%654, %c1_232, %c0_233, %c0_234] : memref<2x4x32x8xbf16, #tpu.memory_space<vmem>>, vector<1x1x32x8xbf16>
      %656 = vector.shape_cast %655 : vector<1x1x32x8xbf16> to vector<32x8xbf16>
      %cst_235 = arith.constant dense<0.000000e+00> : vector<12x8xf32>
      %657 = tpu.matmul %75, %656, %cst_235 {dimension_numbers = #tpu.dot_dimension_numbers<[1], [0], [0], [1], [0, 0, 1, 1], [], []>} : vector<12x32xbf16>, vector<32x8xbf16>, vector<12x8xf32> -> vector<12x8xf32>
      %658 = arith.index_cast %arg41 : i32 to index
      %c1_236 = arith.constant 1 : index
      %c0_237 = arith.constant 0 : index
      %c0_238 = arith.constant 0 : index
      %659 = vector.load %arg27[%658, %c1_236, %c0_237, %c0_238] : memref<2x4x1x8xf32, #tpu.memory_space<vmem>>, vector<1x1x1x8xf32>
      %660 = vector.shape_cast %659 : vector<1x1x1x8xf32> to vector<1x8xf32>
      %661 = vector.broadcast %660 : vector<1x8xf32> to vector<12x8xf32>
      %662 = arith.addf %657, %661 : vector<12x8xf32>
      %663 = arith.truncf %662 : vector<12x8xf32> to vector<12x8xbf16>
      %cst_239 = arith.constant dense<0.000000e+00> : vector<8x12xf32>
      %664 = tpu.matmul %643, %653, %cst_239 {dimension_numbers = #tpu.dot_dimension_numbers<[1], [1], [0], [0], [0, 0, 1, 0], [], []>} : vector<8x8xbf16>, vector<12x8xbf16>, vector<8x12xf32> -> vector<8x12xf32>
      %cst_240 = arith.constant -1.000000e+04 : f32
      %665 = vector.broadcast %cst_240 : f32 to vector<8x12xf32>
      %666 = arith.select %14, %664, %665 : vector<8x12xi1>, vector<8x12xf32>
      %cst_241 = arith.constant dense<0xFF800000> : vector<8xf32>
      %667 = vector.multi_reduction <maximumf>, %666, %cst_241 [1] : vector<8x12xf32> to vector<8xf32>
      %668 = vector.shape_cast %667 : vector<8xf32> to vector<8x1xf32>
      %669 = vector.broadcast %668 : vector<8x1xf32> to vector<8x12xf32>
      %670 = arith.subf %666, %669 : vector<8x12xf32>
      %671 = math.exp %670 : vector<8x12xf32>
      %cst_242 = arith.constant dense<0.000000e+00> : vector<8xf32>
      %672 = vector.multi_reduction <add>, %671, %cst_242 [1] : vector<8x12xf32> to vector<8xf32>
      %673 = vector.shape_cast %672 : vector<8xf32> to vector<8x1xf32>
      %674 = tpu.reciprocal %673 {approx = true} : vector<8x1xf32> -> vector<8x1xf32>
      %675 = vector.broadcast %674 : vector<8x1xf32> to vector<8x12xf32>
      %676 = arith.mulf %671, %675 : vector<8x12xf32>
      %677 = arith.truncf %676 : vector<8x12xf32> to vector<8x12xbf16>
      %cst_243 = arith.constant dense<0.000000e+00> : vector<8x8xf32>
      %678 = tpu.matmul %677, %663, %cst_243 {dimension_numbers = #tpu.dot_dimension_numbers<[1], [0], [0], [1], [0, 0, 1, 1], [], []>} : vector<8x12xbf16>, vector<12x8xbf16>, vector<8x8xf32> -> vector<8x8xf32>
      %679 = arith.index_cast %arg41 : i32 to index
      %c2_244 = arith.constant 2 : index
      %c0_245 = arith.constant 0 : index
      %c0_246 = arith.constant 0 : index
      %680 = vector.load %arg22[%679, %c2_244, %c0_245, %c0_246] : memref<2x4x32x8xbf16, #tpu.memory_space<vmem>>, vector<1x1x32x8xbf16>
      %681 = vector.shape_cast %680 : vector<1x1x32x8xbf16> to vector<32x8xbf16>
      %cst_247 = arith.constant dense<0.000000e+00> : vector<8x8xf32>
      %682 = tpu.matmul %588, %681, %cst_247 {dimension_numbers = #tpu.dot_dimension_numbers<[1], [0], [0], [1], [0, 0, 1, 1], [], []>} : vector<8x32xbf16>, vector<32x8xbf16>, vector<8x8xf32> -> vector<8x8xf32>
      %683 = arith.index_cast %arg41 : i32 to index
      %c2_248 = arith.constant 2 : index
      %c0_249 = arith.constant 0 : index
      %c0_250 = arith.constant 0 : index
      %684 = vector.load %arg23[%683, %c2_248, %c0_249, %c0_250] : memref<2x4x1x8xf32, #tpu.memory_space<vmem>>, vector<1x1x1x8xf32>
      %685 = vector.shape_cast %684 : vector<1x1x1x8xf32> to vector<1x8xf32>
      %686 = vector.broadcast %685 : vector<1x8xf32> to vector<8x8xf32>
      %687 = arith.addf %682, %686 : vector<8x8xf32>
      %688 = arith.truncf %687 : vector<8x8xf32> to vector<8x8xbf16>
      %689 = arith.index_cast %arg41 : i32 to index
      %c2_251 = arith.constant 2 : index
      %c0_252 = arith.constant 0 : index
      %c0_253 = arith.constant 0 : index
      %690 = vector.load %arg24[%689, %c2_251, %c0_252, %c0_253] : memref<2x4x32x8xbf16, #tpu.memory_space<vmem>>, vector<1x1x32x8xbf16>
      %691 = vector.shape_cast %690 : vector<1x1x32x8xbf16> to vector<32x8xbf16>
      %cst_254 = arith.constant dense<0.000000e+00> : vector<12x8xf32>
      %692 = tpu.matmul %75, %691, %cst_254 {dimension_numbers = #tpu.dot_dimension_numbers<[1], [0], [0], [1], [0, 0, 1, 1], [], []>} : vector<12x32xbf16>, vector<32x8xbf16>, vector<12x8xf32> -> vector<12x8xf32>
      %693 = arith.index_cast %arg41 : i32 to index
      %c2_255 = arith.constant 2 : index
      %c0_256 = arith.constant 0 : index
      %c0_257 = arith.constant 0 : index
      %694 = vector.load %arg25[%693, %c2_255, %c0_256, %c0_257] : memref<2x4x1x8xf32, #tpu.memory_space<vmem>>, vector<1x1x1x8xf32>
      %695 = vector.shape_cast %694 : vector<1x1x1x8xf32> to vector<1x8xf32>
      %696 = vector.broadcast %695 : vector<1x8xf32> to vector<12x8xf32>
      %697 = arith.addf %692, %696 : vector<12x8xf32>
      %698 = arith.truncf %697 : vector<12x8xf32> to vector<12x8xbf16>
      %699 = arith.index_cast %arg41 : i32 to index
      %c2_258 = arith.constant 2 : index
      %c0_259 = arith.constant 0 : index
      %c0_260 = arith.constant 0 : index
      %700 = vector.load %arg26[%699, %c2_258, %c0_259, %c0_260] : memref<2x4x32x8xbf16, #tpu.memory_space<vmem>>, vector<1x1x32x8xbf16>
      %701 = vector.shape_cast %700 : vector<1x1x32x8xbf16> to vector<32x8xbf16>
      %cst_261 = arith.constant dense<0.000000e+00> : vector<12x8xf32>
      %702 = tpu.matmul %75, %701, %cst_261 {dimension_numbers = #tpu.dot_dimension_numbers<[1], [0], [0], [1], [0, 0, 1, 1], [], []>} : vector<12x32xbf16>, vector<32x8xbf16>, vector<12x8xf32> -> vector<12x8xf32>
      %703 = arith.index_cast %arg41 : i32 to index
      %c2_262 = arith.constant 2 : index
      %c0_263 = arith.constant 0 : index
      %c0_264 = arith.constant 0 : index
      %704 = vector.load %arg27[%703, %c2_262, %c0_263, %c0_264] : memref<2x4x1x8xf32, #tpu.memory_space<vmem>>, vector<1x1x1x8xf32>
      %705 = vector.shape_cast %704 : vector<1x1x1x8xf32> to vector<1x8xf32>
      %706 = vector.broadcast %705 : vector<1x8xf32> to vector<12x8xf32>
      %707 = arith.addf %702, %706 : vector<12x8xf32>
      %708 = arith.truncf %707 : vector<12x8xf32> to vector<12x8xbf16>
      %cst_265 = arith.constant dense<0.000000e+00> : vector<8x12xf32>
      %709 = tpu.matmul %688, %698, %cst_265 {dimension_numbers = #tpu.dot_dimension_numbers<[1], [1], [0], [0], [0, 0, 1, 0], [], []>} : vector<8x8xbf16>, vector<12x8xbf16>, vector<8x12xf32> -> vector<8x12xf32>
      %cst_266 = arith.constant -1.000000e+04 : f32
      %710 = vector.broadcast %cst_266 : f32 to vector<8x12xf32>
      %711 = arith.select %14, %709, %710 : vector<8x12xi1>, vector<8x12xf32>
      %cst_267 = arith.constant dense<0xFF800000> : vector<8xf32>
      %712 = vector.multi_reduction <maximumf>, %711, %cst_267 [1] : vector<8x12xf32> to vector<8xf32>
      %713 = vector.shape_cast %712 : vector<8xf32> to vector<8x1xf32>
      %714 = vector.broadcast %713 : vector<8x1xf32> to vector<8x12xf32>
      %715 = arith.subf %711, %714 : vector<8x12xf32>
      %716 = math.exp %715 : vector<8x12xf32>
      %cst_268 = arith.constant dense<0.000000e+00> : vector<8xf32>
      %717 = vector.multi_reduction <add>, %716, %cst_268 [1] : vector<8x12xf32> to vector<8xf32>
      %718 = vector.shape_cast %717 : vector<8xf32> to vector<8x1xf32>
      %719 = tpu.reciprocal %718 {approx = true} : vector<8x1xf32> -> vector<8x1xf32>
      %720 = vector.broadcast %719 : vector<8x1xf32> to vector<8x12xf32>
      %721 = arith.mulf %716, %720 : vector<8x12xf32>
      %722 = arith.truncf %721 : vector<8x12xf32> to vector<8x12xbf16>
      %cst_269 = arith.constant dense<0.000000e+00> : vector<8x8xf32>
      %723 = tpu.matmul %722, %708, %cst_269 {dimension_numbers = #tpu.dot_dimension_numbers<[1], [0], [0], [1], [0, 0, 1, 1], [], []>} : vector<8x12xbf16>, vector<12x8xbf16>, vector<8x8xf32> -> vector<8x8xf32>
      %724 = arith.index_cast %arg41 : i32 to index
      %c3_270 = arith.constant 3 : index
      %c0_271 = arith.constant 0 : index
      %c0_272 = arith.constant 0 : index
      %725 = vector.load %arg22[%724, %c3_270, %c0_271, %c0_272] : memref<2x4x32x8xbf16, #tpu.memory_space<vmem>>, vector<1x1x32x8xbf16>
      %726 = vector.shape_cast %725 : vector<1x1x32x8xbf16> to vector<32x8xbf16>
      %cst_273 = arith.constant dense<0.000000e+00> : vector<8x8xf32>
      %727 = tpu.matmul %588, %726, %cst_273 {dimension_numbers = #tpu.dot_dimension_numbers<[1], [0], [0], [1], [0, 0, 1, 1], [], []>} : vector<8x32xbf16>, vector<32x8xbf16>, vector<8x8xf32> -> vector<8x8xf32>
      %728 = arith.index_cast %arg41 : i32 to index
      %c3_274 = arith.constant 3 : index
      %c0_275 = arith.constant 0 : index
      %c0_276 = arith.constant 0 : index
      %729 = vector.load %arg23[%728, %c3_274, %c0_275, %c0_276] : memref<2x4x1x8xf32, #tpu.memory_space<vmem>>, vector<1x1x1x8xf32>
      %730 = vector.shape_cast %729 : vector<1x1x1x8xf32> to vector<1x8xf32>
      %731 = vector.broadcast %730 : vector<1x8xf32> to vector<8x8xf32>
      %732 = arith.addf %727, %731 : vector<8x8xf32>
      %733 = arith.truncf %732 : vector<8x8xf32> to vector<8x8xbf16>
      %734 = arith.index_cast %arg41 : i32 to index
      %c3_277 = arith.constant 3 : index
      %c0_278 = arith.constant 0 : index
      %c0_279 = arith.constant 0 : index
      %735 = vector.load %arg24[%734, %c3_277, %c0_278, %c0_279] : memref<2x4x32x8xbf16, #tpu.memory_space<vmem>>, vector<1x1x32x8xbf16>
      %736 = vector.shape_cast %735 : vector<1x1x32x8xbf16> to vector<32x8xbf16>
      %cst_280 = arith.constant dense<0.000000e+00> : vector<12x8xf32>
      %737 = tpu.matmul %75, %736, %cst_280 {dimension_numbers = #tpu.dot_dimension_numbers<[1], [0], [0], [1], [0, 0, 1, 1], [], []>} : vector<12x32xbf16>, vector<32x8xbf16>, vector<12x8xf32> -> vector<12x8xf32>
      %738 = arith.index_cast %arg41 : i32 to index
      %c3_281 = arith.constant 3 : index
      %c0_282 = arith.constant 0 : index
      %c0_283 = arith.constant 0 : index
      %739 = vector.load %arg25[%738, %c3_281, %c0_282, %c0_283] : memref<2x4x1x8xf32, #tpu.memory_space<vmem>>, vector<1x1x1x8xf32>
      %740 = vector.shape_cast %739 : vector<1x1x1x8xf32> to vector<1x8xf32>
      %741 = vector.broadcast %740 : vector<1x8xf32> to vector<12x8xf32>
      %742 = arith.addf %737, %741 : vector<12x8xf32>
      %743 = arith.truncf %742 : vector<12x8xf32> to vector<12x8xbf16>
      %744 = arith.index_cast %arg41 : i32 to index
      %c3_284 = arith.constant 3 : index
      %c0_285 = arith.constant 0 : index
      %c0_286 = arith.constant 0 : index
      %745 = vector.load %arg26[%744, %c3_284, %c0_285, %c0_286] : memref<2x4x32x8xbf16, #tpu.memory_space<vmem>>, vector<1x1x32x8xbf16>
      %746 = vector.shape_cast %745 : vector<1x1x32x8xbf16> to vector<32x8xbf16>
      %cst_287 = arith.constant dense<0.000000e+00> : vector<12x8xf32>
      %747 = tpu.matmul %75, %746, %cst_287 {dimension_numbers = #tpu.dot_dimension_numbers<[1], [0], [0], [1], [0, 0, 1, 1], [], []>} : vector<12x32xbf16>, vector<32x8xbf16>, vector<12x8xf32> -> vector<12x8xf32>
      %748 = arith.index_cast %arg41 : i32 to index
      %c3_288 = arith.constant 3 : index
      %c0_289 = arith.constant 0 : index
      %c0_290 = arith.constant 0 : index
      %749 = vector.load %arg27[%748, %c3_288, %c0_289, %c0_290] : memref<2x4x1x8xf32, #tpu.memory_space<vmem>>, vector<1x1x1x8xf32>
      %750 = vector.shape_cast %749 : vector<1x1x1x8xf32> to vector<1x8xf32>
      %751 = vector.broadcast %750 : vector<1x8xf32> to vector<12x8xf32>
      %752 = arith.addf %747, %751 : vector<12x8xf32>
      %753 = arith.truncf %752 : vector<12x8xf32> to vector<12x8xbf16>
      %cst_291 = arith.constant dense<0.000000e+00> : vector<8x12xf32>
      %754 = tpu.matmul %733, %743, %cst_291 {dimension_numbers = #tpu.dot_dimension_numbers<[1], [1], [0], [0], [0, 0, 1, 0], [], []>} : vector<8x8xbf16>, vector<12x8xbf16>, vector<8x12xf32> -> vector<8x12xf32>
      %cst_292 = arith.constant -1.000000e+04 : f32
      %755 = vector.broadcast %cst_292 : f32 to vector<8x12xf32>
      %756 = arith.select %14, %754, %755 : vector<8x12xi1>, vector<8x12xf32>
      %cst_293 = arith.constant dense<0xFF800000> : vector<8xf32>
      %757 = vector.multi_reduction <maximumf>, %756, %cst_293 [1] : vector<8x12xf32> to vector<8xf32>
      %758 = vector.shape_cast %757 : vector<8xf32> to vector<8x1xf32>
      %759 = vector.broadcast %758 : vector<8x1xf32> to vector<8x12xf32>
      %760 = arith.subf %756, %759 : vector<8x12xf32>
      %761 = math.exp %760 : vector<8x12xf32>
      %cst_294 = arith.constant dense<0.000000e+00> : vector<8xf32>
      %762 = vector.multi_reduction <add>, %761, %cst_294 [1] : vector<8x12xf32> to vector<8xf32>
      %763 = vector.shape_cast %762 : vector<8xf32> to vector<8x1xf32>
      %764 = tpu.reciprocal %763 {approx = true} : vector<8x1xf32> -> vector<8x1xf32>
      %765 = vector.broadcast %764 : vector<8x1xf32> to vector<8x12xf32>
      %766 = arith.mulf %761, %765 : vector<8x12xf32>
      %767 = arith.truncf %766 : vector<8x12xf32> to vector<8x12xbf16>
      %cst_295 = arith.constant dense<0.000000e+00> : vector<8x8xf32>
      %768 = tpu.matmul %767, %753, %cst_295 {dimension_numbers = #tpu.dot_dimension_numbers<[1], [0], [0], [1], [0, 0, 1, 1], [], []>} : vector<8x12xbf16>, vector<12x8xbf16>, vector<8x8xf32> -> vector<8x8xf32>
      %769 = tpu.concatenate %633, %678, %723, %768 in 1 : vector<8x8xf32>, vector<8x8xf32>, vector<8x8xf32>, vector<8x8xf32> -> vector<8x32xf32>
      %770 = arith.truncf %769 : vector<8x32xf32> to vector<8x32xbf16>
      %771 = arith.index_cast %arg41 : i32 to index
      %c0_296 = arith.constant 0 : index
      %c0_297 = arith.constant 0 : index
      %772 = vector.load %arg28[%771, %c0_296, %c0_297] : memref<2x32x32xbf16, #tpu.memory_space<vmem>>, vector<1x32x32xbf16>
      %773 = vector.shape_cast %772 : vector<1x32x32xbf16> to vector<32x32xbf16>
      %cst_298 = arith.constant dense<0.000000e+00> : vector<8x32xf32>
      %774 = tpu.matmul %770, %773, %cst_298 {dimension_numbers = #tpu.dot_dimension_numbers<[1], [0], [0], [1], [0, 0, 1, 1], [], []>} : vector<8x32xbf16>, vector<32x32xbf16>, vector<8x32xf32> -> vector<8x32xf32>
      %775 = arith.index_cast %arg41 : i32 to index
      %c0_299 = arith.constant 0 : index
      %c0_300 = arith.constant 0 : index
      %776 = vector.load %arg29[%775, %c0_299, %c0_300] : memref<2x1x32xf32, #tpu.memory_space<vmem>>, vector<1x1x32xf32>
      %777 = vector.shape_cast %776 : vector<1x1x32xf32> to vector<1x32xf32>
      %778 = vector.broadcast %777 : vector<1x32xf32> to vector<8x32xf32>
      %779 = arith.addf %774, %778 : vector<8x32xf32>
      %780 = arith.addf %587, %779 : vector<8x32xf32>
      %781 = arith.index_cast %arg41 : i32 to index
      %c0_301 = arith.constant 0 : index
      %c0_302 = arith.constant 0 : index
      %782 = vector.load %arg30[%781, %c0_301, %c0_302] : memref<2x1x32xf32, #tpu.memory_space<vmem>>, vector<1x1x32xf32>
      %783 = vector.shape_cast %782 : vector<1x1x32xf32> to vector<1x32xf32>
      %784 = arith.index_cast %arg41 : i32 to index
      %c0_303 = arith.constant 0 : index
      %c0_304 = arith.constant 0 : index
      %785 = vector.load %arg31[%784, %c0_303, %c0_304] : memref<2x1x32xf32, #tpu.memory_space<vmem>>, vector<1x1x32xf32>
      %786 = vector.shape_cast %785 : vector<1x1x32xf32> to vector<1x32xf32>
      %cst_305 = arith.constant dense<0.000000e+00> : vector<8xf32>
      %787 = vector.multi_reduction <add>, %780, %cst_305 [1] : vector<8x32xf32> to vector<8xf32>
      %788 = vector.shape_cast %787 : vector<8xf32> to vector<8x1xf32>
      %cst_306 = arith.constant 3.200000e+01 : f32
      %789 = vector.broadcast %cst_306 : f32 to vector<8x1xf32>
      %790 = arith.divf %788, %789 : vector<8x1xf32>
      %791 = vector.broadcast %790 : vector<8x1xf32> to vector<8x32xf32>
      %792 = arith.subf %780, %791 : vector<8x32xf32>
      %793 = arith.mulf %792, %792 : vector<8x32xf32>
      %cst_307 = arith.constant dense<0.000000e+00> : vector<8xf32>
      %794 = vector.multi_reduction <add>, %793, %cst_307 [1] : vector<8x32xf32> to vector<8xf32>
      %795 = vector.shape_cast %794 : vector<8xf32> to vector<8x1xf32>
      %cst_308 = arith.constant 3.200000e+01 : f32
      %796 = vector.broadcast %cst_308 : f32 to vector<8x1xf32>
      %797 = arith.divf %795, %796 : vector<8x1xf32>
      %798 = vector.broadcast %790 : vector<8x1xf32> to vector<8x32xf32>
      %799 = arith.subf %780, %798 : vector<8x32xf32>
      %cst_309 = arith.constant 9.99999974E-6 : f32
      %800 = vector.broadcast %cst_309 : f32 to vector<8x1xf32>
      %801 = arith.addf %797, %800 : vector<8x1xf32>
      %802 = math.rsqrt %801 : vector<8x1xf32>
      %803 = vector.broadcast %802 : vector<8x1xf32> to vector<8x32xf32>
      %804 = arith.mulf %799, %803 : vector<8x32xf32>
      %805 = vector.broadcast %783 : vector<1x32xf32> to vector<8x32xf32>
      %806 = arith.mulf %804, %805 : vector<8x32xf32>
      %807 = vector.broadcast %786 : vector<1x32xf32> to vector<8x32xf32>
      %808 = arith.addf %806, %807 : vector<8x32xf32>
      %809 = vector.broadcast %8 : vector<8x1xf32> to vector<8x32xf32>
      %810 = arith.mulf %808, %809 : vector<8x32xf32>
      %811 = arith.truncf %810 : vector<8x32xf32> to vector<8x32xbf16>
      %812 = arith.index_cast %arg41 : i32 to index
      %c0_310 = arith.constant 0 : index
      %c0_311 = arith.constant 0 : index
      %813 = vector.load %arg32[%812, %c0_310, %c0_311] : memref<2x32x128xbf16, #tpu.memory_space<vmem>>, vector<1x32x128xbf16>
      %814 = vector.shape_cast %813 : vector<1x32x128xbf16> to vector<32x128xbf16>
      %cst_312 = arith.constant dense<0.000000e+00> : vector<8x128xf32>
      %815 = tpu.matmul %811, %814, %cst_312 {dimension_numbers = #tpu.dot_dimension_numbers<[1], [0], [0], [1], [0, 0, 1, 1], [], []>} : vector<8x32xbf16>, vector<32x128xbf16>, vector<8x128xf32> -> vector<8x128xf32>
      %816 = arith.index_cast %arg41 : i32 to index
      %c0_313 = arith.constant 0 : index
      %c0_314 = arith.constant 0 : index
      %817 = vector.load %arg33[%816, %c0_313, %c0_314] : memref<2x1x128xf32, #tpu.memory_space<vmem>>, vector<1x1x128xf32>
      %818 = vector.shape_cast %817 : vector<1x1x128xf32> to vector<1x128xf32>
      %819 = vector.broadcast %818 : vector<1x128xf32> to vector<8x128xf32>
      %820 = arith.addf %815, %819 : vector<8x128xf32>
      %cst_315 = arith.constant 0.000000e+00 : f32
      %821 = vector.broadcast %cst_315 : f32 to vector<8x128xf32>
      %822 = arith.maximumf %820, %821 : vector<8x128xf32>
      %823 = vector.broadcast %8 : vector<8x1xf32> to vector<8x128xf32>
      %824 = arith.mulf %822, %823 : vector<8x128xf32>
      %825 = arith.truncf %824 : vector<8x128xf32> to vector<8x128xbf16>
      %826 = arith.index_cast %arg41 : i32 to index
      %c0_316 = arith.constant 0 : index
      %c0_317 = arith.constant 0 : index
      %827 = vector.load %arg34[%826, %c0_316, %c0_317] : memref<2x128x32xbf16, #tpu.memory_space<vmem>>, vector<1x128x32xbf16>
      %828 = vector.shape_cast %827 : vector<1x128x32xbf16> to vector<128x32xbf16>
      %cst_318 = arith.constant dense<0.000000e+00> : vector<8x32xf32>
      %829 = tpu.matmul %825, %828, %cst_318 {dimension_numbers = #tpu.dot_dimension_numbers<[1], [0], [0], [1], [0, 0, 1, 1], [], []>} : vector<8x128xbf16>, vector<128x32xbf16>, vector<8x32xf32> -> vector<8x32xf32>
      %830 = arith.index_cast %arg41 : i32 to index
      %c0_319 = arith.constant 0 : index
      %c0_320 = arith.constant 0 : index
      %831 = vector.load %arg35[%830, %c0_319, %c0_320] : memref<2x1x32xf32, #tpu.memory_space<vmem>>, vector<1x1x32xf32>
      %832 = vector.shape_cast %831 : vector<1x1x32xf32> to vector<1x32xf32>
      %833 = vector.broadcast %832 : vector<1x32xf32> to vector<8x32xf32>
      %834 = arith.addf %829, %833 : vector<8x32xf32>
      %835 = vector.broadcast %8 : vector<8x1xf32> to vector<8x32xf32>
      %836 = arith.mulf %834, %835 : vector<8x32xf32>
      %837 = arith.addf %808, %836 : vector<8x32xf32>
      %838 = arith.index_cast %arg41 : i32 to index
      %c0_321 = arith.constant 0 : index
      %c0_322 = arith.constant 0 : index
      %839 = vector.load %arg36[%838, %c0_321, %c0_322] : memref<2x1x32xf32, #tpu.memory_space<vmem>>, vector<1x1x32xf32>
      %840 = vector.shape_cast %839 : vector<1x1x32xf32> to vector<1x32xf32>
      %841 = arith.index_cast %arg41 : i32 to index
      %c0_323 = arith.constant 0 : index
      %c0_324 = arith.constant 0 : index
      %842 = vector.load %arg37[%841, %c0_323, %c0_324] : memref<2x1x32xf32, #tpu.memory_space<vmem>>, vector<1x1x32xf32>
      %843 = vector.shape_cast %842 : vector<1x1x32xf32> to vector<1x32xf32>
      %cst_325 = arith.constant dense<0.000000e+00> : vector<8xf32>
      %844 = vector.multi_reduction <add>, %837, %cst_325 [1] : vector<8x32xf32> to vector<8xf32>
      %845 = vector.shape_cast %844 : vector<8xf32> to vector<8x1xf32>
      %cst_326 = arith.constant 3.200000e+01 : f32
      %846 = vector.broadcast %cst_326 : f32 to vector<8x1xf32>
      %847 = arith.divf %845, %846 : vector<8x1xf32>
      %848 = vector.broadcast %847 : vector<8x1xf32> to vector<8x32xf32>
      %849 = arith.subf %837, %848 : vector<8x32xf32>
      %850 = arith.mulf %849, %849 : vector<8x32xf32>
      %cst_327 = arith.constant dense<0.000000e+00> : vector<8xf32>
      %851 = vector.multi_reduction <add>, %850, %cst_327 [1] : vector<8x32xf32> to vector<8xf32>
      %852 = vector.shape_cast %851 : vector<8xf32> to vector<8x1xf32>
      %cst_328 = arith.constant 3.200000e+01 : f32
      %853 = vector.broadcast %cst_328 : f32 to vector<8x1xf32>
      %854 = arith.divf %852, %853 : vector<8x1xf32>
      %855 = vector.broadcast %847 : vector<8x1xf32> to vector<8x32xf32>
      %856 = arith.subf %837, %855 : vector<8x32xf32>
      %cst_329 = arith.constant 9.99999974E-6 : f32
      %857 = vector.broadcast %cst_329 : f32 to vector<8x1xf32>
      %858 = arith.addf %854, %857 : vector<8x1xf32>
      %859 = math.rsqrt %858 : vector<8x1xf32>
      %860 = vector.broadcast %859 : vector<8x1xf32> to vector<8x32xf32>
      %861 = arith.mulf %856, %860 : vector<8x32xf32>
      %862 = vector.broadcast %840 : vector<1x32xf32> to vector<8x32xf32>
      %863 = arith.mulf %861, %862 : vector<8x32xf32>
      %864 = vector.broadcast %843 : vector<1x32xf32> to vector<8x32xf32>
      %865 = arith.addf %863, %864 : vector<8x32xf32>
      scf.yield %865 : vector<8x32xf32>
    }
    %c2_i32_20 = arith.constant 2 : i32
    %78 = arith.truncf %77 : vector<8x32xf32> to vector<8x32xbf16>
    %c0_21 = arith.constant 0 : index
    %c0_22 = arith.constant 0 : index
    %79 = vector.load %arg38[%c0_21, %c0_22] : memref<32x128xbf16, #tpu.memory_space<vmem>>, vector<32x128xbf16>
    %cst_23 = arith.constant dense<0.000000e+00> : vector<8x128xf32>
    %80 = tpu.matmul %78, %79, %cst_23 {dimension_numbers = #tpu.dot_dimension_numbers<[1], [0], [0], [1], [0, 0, 1, 1], [], []>} : vector<8x32xbf16>, vector<32x128xbf16>, vector<8x128xf32> -> vector<8x128xf32>
    %c0_24 = arith.constant 0 : index
    %c0_25 = arith.constant 0 : index
    %81 = vector.load %arg39[%c0_24, %c0_25] : memref<1x128xf32, #tpu.memory_space<vmem>>, vector<1x128xf32>
    %82 = vector.broadcast %81 : vector<1x128xf32> to vector<8x128xf32>
    %83 = arith.addf %80, %82 : vector<8x128xf32>
    %84 = vector.broadcast %8 : vector<8x1xf32> to vector<8x128xf32>
    %85 = arith.mulf %83, %84 : vector<8x128xf32>
    %c0_26 = arith.constant 0 : index
    %c0_27 = arith.constant 0 : index
    %c0_28 = arith.constant 0 : index
    %86 = vector.load %arg40[%c0_26, %c0_27, %c0_28] : memref<1x8x128xf32, #tpu.memory_space<vmem>>, vector<1x8x128xf32>
    %87 = vector.shape_cast %86 : vector<1x8x128xf32> to vector<8x128xf32>
    %88 = vector.shape_cast %85 : vector<8x128xf32> to vector<1x8x128xf32>
    tpu.vector_store %arg40[%c0_26, %c0_27, %c0_28], %88 {strides = array<i32>} : memref<1x8x128xf32, #tpu.memory_space<vmem>>, vector<1x8x128xf32>,
    return
  }
  func.func @transform_0(%arg0: i32, %arg1: memref<2xi32, #tpu.memory_space<smem>>, %arg2: memref<2xi32, #tpu.memory_space<smem>>) -> (i32, i32, i32) {
    %c0_i32 = arith.constant 0 : i32
    %c0_i32_0 = arith.constant 0 : i32
    %c0_i32_1 = arith.constant 0 : i32
    return %arg0, %c0_i32, %c0_i32_0 : i32, i32, i32
  }
  func.func @transform_1(%arg0: i32, %arg1: memref<2xi32, #tpu.memory_space<smem>>, %arg2: memref<2xi32, #tpu.memory_space<smem>>) -> (i32, i32, i32) {
    %c0_i32 = arith.constant 0 : i32
    %c0_i32_0 = arith.constant 0 : i32
    %c0_i32_1 = arith.constant 0 : i32
    return %arg0, %c0_i32, %c0_i32_0 : i32, i32, i32
  }
  func.func @transform_2(%arg0: i32, %arg1: memref<2xi32, #tpu.memory_space<smem>>, %arg2: memref<2xi32, #tpu.memory_space<smem>>) -> (i32, i32, i32) {
    %c0_i32 = arith.constant 0 : i32
    %c0_i32_0 = arith.constant 0 : i32
    %c0_i32_1 = arith.constant 0 : i32
    return %arg0, %c0_i32, %c0_i32_0 : i32, i32, i32
  }
  func.func @transform_3(%arg0: i32, %arg1: memref<2xi32, #tpu.memory_space<smem>>, %arg2: memref<2xi32, #tpu.memory_space<smem>>) -> (i32, i32) {
    %c0_i32 = arith.constant 0 : i32
    %c0_i32_0 = arith.constant 0 : i32
    %c0_i32_1 = arith.constant 0 : i32
    return %c0_i32, %c0_i32_0 : i32, i32
  }
  func.func @transform_4(%arg0: i32, %arg1: memref<2xi32, #tpu.memory_space<smem>>, %arg2: memref<2xi32, #tpu.memory_space<smem>>) -> (i32, i32) {
    %c0_i32 = arith.constant 0 : i32
    %c0_i32_0 = arith.constant 0 : i32
    %c0_i32_1 = arith.constant 0 : i32
    return %c0_i32, %c0_i32_0 : i32, i32
  }
  func.func @transform_5(%arg0: i32, %arg1: memref<2xi32, #tpu.memory_space<smem>>, %arg2: memref<2xi32, #tpu.memory_space<smem>>) -> (i32, i32) {
    %c0_i32 = arith.constant 0 : i32
    %c0_i32_0 = arith.constant 0 : i32
    %c0_i32_1 = arith.constant 0 : i32
    return %c0_i32, %c0_i32_0 : i32, i32
  }
  func.func @transform_6(%arg0: i32, %arg1: memref<2xi32, #tpu.memory_space<smem>>, %arg2: memref<2xi32, #tpu.memory_space<smem>>) -> (i32, i32) {
    %c0_i32 = arith.constant 0 : i32
    %c0_i32_0 = arith.constant 0 : i32
    %c0_i32_1 = arith.constant 0 : i32
    return %c0_i32, %c0_i32_0 : i32, i32
  }
  func.func @transform_7(%arg0: i32, %arg1: memref<2xi32, #tpu.memory_space<smem>>, %arg2: memref<2xi32, #tpu.memory_space<smem>>) -> (i32, i32, i32, i32) {
    %c0_i32 = arith.constant 0 : i32
    %c0_i32_0 = arith.constant 0 : i32
    %c0_i32_1 = arith.constant 0 : i32
    %c0_i32_2 = arith.constant 0 : i32
    %c0_i32_3 = arith.constant 0 : i32
    return %c0_i32, %c0_i32_0, %c0_i32_1, %c0_i32_2 : i32, i32, i32, i32
  }
  func.func @transform_8(%arg0: i32, %arg1: memref<2xi32, #tpu.memory_space<smem>>, %arg2: memref<2xi32, #tpu.memory_space<smem>>) -> (i32, i32, i32, i32) {
    %c0_i32 = arith.constant 0 : i32
    %c0_i32_0 = arith.constant 0 : i32
    %c0_i32_1 = arith.constant 0 : i32
    %c0_i32_2 = arith.constant 0 : i32
    %c0_i32_3 = arith.constant 0 : i32
    return %c0_i32, %c0_i32_0, %c0_i32_1, %c0_i32_2 : i32, i32, i32, i32
  }
  func.func @transform_9(%arg0: i32, %arg1: memref<2xi32, #tpu.memory_space<smem>>, %arg2: memref<2xi32, #tpu.memory_space<smem>>) -> (i32, i32, i32, i32) {
    %c0_i32 = arith.constant 0 : i32
    %c0_i32_0 = arith.constant 0 : i32
    %c0_i32_1 = arith.constant 0 : i32
    %c0_i32_2 = arith.constant 0 : i32
    %c0_i32_3 = arith.constant 0 : i32
    return %c0_i32, %c0_i32_0, %c0_i32_1, %c0_i32_2 : i32, i32, i32, i32
  }
  func.func @transform_10(%arg0: i32, %arg1: memref<2xi32, #tpu.memory_space<smem>>, %arg2: memref<2xi32, #tpu.memory_space<smem>>) -> (i32, i32, i32, i32) {
    %c0_i32 = arith.constant 0 : i32
    %c0_i32_0 = arith.constant 0 : i32
    %c0_i32_1 = arith.constant 0 : i32
    %c0_i32_2 = arith.constant 0 : i32
    %c0_i32_3 = arith.constant 0 : i32
    return %c0_i32, %c0_i32_0, %c0_i32_1, %c0_i32_2 : i32, i32, i32, i32
  }
  func.func @transform_11(%arg0: i32, %arg1: memref<2xi32, #tpu.memory_space<smem>>, %arg2: memref<2xi32, #tpu.memory_space<smem>>) -> (i32, i32, i32, i32) {
    %c0_i32 = arith.constant 0 : i32
    %c0_i32_0 = arith.constant 0 : i32
    %c0_i32_1 = arith.constant 0 : i32
    %c0_i32_2 = arith.constant 0 : i32
    %c0_i32_3 = arith.constant 0 : i32
    return %c0_i32, %c0_i32_0, %c0_i32_1, %c0_i32_2 : i32, i32, i32, i32
  }
  func.func @transform_12(%arg0: i32, %arg1: memref<2xi32, #tpu.memory_space<smem>>, %arg2: memref<2xi32, #tpu.memory_space<smem>>) -> (i32, i32, i32, i32) {
    %c0_i32 = arith.constant 0 : i32
    %c0_i32_0 = arith.constant 0 : i32
    %c0_i32_1 = arith.constant 0 : i32
    %c0_i32_2 = arith.constant 0 : i32
    %c0_i32_3 = arith.constant 0 : i32
    return %c0_i32, %c0_i32_0, %c0_i32_1, %c0_i32_2 : i32, i32, i32, i32
  }
  func.func @transform_13(%arg0: i32, %arg1: memref<2xi32, #tpu.memory_space<smem>>, %arg2: memref<2xi32, #tpu.memory_space<smem>>) -> (i32, i32, i32) {
    %c0_i32 = arith.constant 0 : i32
    %c0_i32_0 = arith.constant 0 : i32
    %c0_i32_1 = arith.constant 0 : i32
    %c0_i32_2 = arith.constant 0 : i32
    return %c0_i32, %c0_i32_0, %c0_i32_1 : i32, i32, i32
  }
  func.func @transform_14(%arg0: i32, %arg1: memref<2xi32, #tpu.memory_space<smem>>, %arg2: memref<2xi32, #tpu.memory_space<smem>>) -> (i32, i32, i32) {
    %c0_i32 = arith.constant 0 : i32
    %c0_i32_0 = arith.constant 0 : i32
    %c0_i32_1 = arith.constant 0 : i32
    %c0_i32_2 = arith.constant 0 : i32
    return %c0_i32, %c0_i32_0, %c0_i32_1 : i32, i32, i32
  }
  func.func @transform_15(%arg0: i32, %arg1: memref<2xi32, #tpu.memory_space<smem>>, %arg2: memref<2xi32, #tpu.memory_space<smem>>) -> (i32, i32, i32) {
    %c0_i32 = arith.constant 0 : i32
    %c0_i32_0 = arith.constant 0 : i32
    %c0_i32_1 = arith.constant 0 : i32
    %c0_i32_2 = arith.constant 0 : i32
    return %c0_i32, %c0_i32_0, %c0_i32_1 : i32, i32, i32
  }
  func.func @transform_16(%arg0: i32, %arg1: memref<2xi32, #tpu.memory_space<smem>>, %arg2: memref<2xi32, #tpu.memory_space<smem>>) -> (i32, i32, i32) {
    %c0_i32 = arith.constant 0 : i32
    %c0_i32_0 = arith.constant 0 : i32
    %c0_i32_1 = arith.constant 0 : i32
    %c0_i32_2 = arith.constant 0 : i32
    return %c0_i32, %c0_i32_0, %c0_i32_1 : i32, i32, i32
  }
  func.func @transform_17(%arg0: i32, %arg1: memref<2xi32, #tpu.memory_space<smem>>, %arg2: memref<2xi32, #tpu.memory_space<smem>>) -> (i32, i32, i32) {
    %c0_i32 = arith.constant 0 : i32
    %c0_i32_0 = arith.constant 0 : i32
    %c0_i32_1 = arith.constant 0 : i32
    %c0_i32_2 = arith.constant 0 : i32
    return %c0_i32, %c0_i32_0, %c0_i32_1 : i32, i32, i32
  }
  func.func @transform_18(%arg0: i32, %arg1: memref<2xi32, #tpu.memory_space<smem>>, %arg2: memref<2xi32, #tpu.memory_space<smem>>) -> (i32, i32, i32) {
    %c0_i32 = arith.constant 0 : i32
    %c0_i32_0 = arith.constant 0 : i32
    %c0_i32_1 = arith.constant 0 : i32
    %c0_i32_2 = arith.constant 0 : i32
    return %c0_i32, %c0_i32_0, %c0_i32_1 : i32, i32, i32
  }
  func.func @transform_19(%arg0: i32, %arg1: memref<2xi32, #tpu.memory_space<smem>>, %arg2: memref<2xi32, #tpu.memory_space<smem>>) -> (i32, i32, i32, i32) {
    %c0_i32 = arith.constant 0 : i32
    %c0_i32_0 = arith.constant 0 : i32
    %c0_i32_1 = arith.constant 0 : i32
    %c0_i32_2 = arith.constant 0 : i32
    %c0_i32_3 = arith.constant 0 : i32
    return %c0_i32, %c0_i32_0, %c0_i32_1, %c0_i32_2 : i32, i32, i32, i32
  }
  func.func @transform_20(%arg0: i32, %arg1: memref<2xi32, #tpu.memory_space<smem>>, %arg2: memref<2xi32, #tpu.memory_space<smem>>) -> (i32, i32, i32, i32) {
    %c0_i32 = arith.constant 0 : i32
    %c0_i32_0 = arith.constant 0 : i32
    %c0_i32_1 = arith.constant 0 : i32
    %c0_i32_2 = arith.constant 0 : i32
    %c0_i32_3 = arith.constant 0 : i32
    return %c0_i32, %c0_i32_0, %c0_i32_1, %c0_i32_2 : i32, i32, i32, i32
  }
  func.func @transform_21(%arg0: i32, %arg1: memref<2xi32, #tpu.memory_space<smem>>, %arg2: memref<2xi32, #tpu.memory_space<smem>>) -> (i32, i32, i32, i32) {
    %c0_i32 = arith.constant 0 : i32
    %c0_i32_0 = arith.constant 0 : i32
    %c0_i32_1 = arith.constant 0 : i32
    %c0_i32_2 = arith.constant 0 : i32
    %c0_i32_3 = arith.constant 0 : i32
    return %c0_i32, %c0_i32_0, %c0_i32_1, %c0_i32_2 : i32, i32, i32, i32
  }
  func.func @transform_22(%arg0: i32, %arg1: memref<2xi32, #tpu.memory_space<smem>>, %arg2: memref<2xi32, #tpu.memory_space<smem>>) -> (i32, i32, i32, i32) {
    %c0_i32 = arith.constant 0 : i32
    %c0_i32_0 = arith.constant 0 : i32
    %c0_i32_1 = arith.constant 0 : i32
    %c0_i32_2 = arith.constant 0 : i32
    %c0_i32_3 = arith.constant 0 : i32
    return %c0_i32, %c0_i32_0, %c0_i32_1, %c0_i32_2 : i32, i32, i32, i32
  }
  func.func @transform_23(%arg0: i32, %arg1: memref<2xi32, #tpu.memory_space<smem>>, %arg2: memref<2xi32, #tpu.memory_space<smem>>) -> (i32, i32, i32, i32) {
    %c0_i32 = arith.constant 0 : i32
    %c0_i32_0 = arith.constant 0 : i32
    %c0_i32_1 = arith.constant 0 : i32
    %c0_i32_2 = arith.constant 0 : i32
    %c0_i32_3 = arith.constant 0 : i32
    return %c0_i32, %c0_i32_0, %c0_i32_1, %c0_i32_2 : i32, i32, i32, i32
  }
  func.func @transform_24(%arg0: i32, %arg1: memref<2xi32, #tpu.memory_space<smem>>, %arg2: memref<2xi32, #tpu.memory_space<smem>>) -> (i32, i32, i32, i32) {
    %c0_i32 = arith.constant 0 : i32
    %c0_i32_0 = arith.constant 0 : i32
    %c0_i32_1 = arith.constant 0 : i32
    %c0_i32_2 = arith.constant 0 : i32
    %c0_i32_3 = arith.constant 0 : i32
    return %c0_i32, %c0_i32_0, %c0_i32_1, %c0_i32_2 : i32, i32, i32, i32
  }
  func.func @transform_25(%arg0: i32, %arg1: memref<2xi32, #tpu.memory_space<smem>>, %arg2: memref<2xi32, #tpu.memory_space<smem>>) -> (i32, i32, i32) {
    %c0_i32 = arith.constant 0 : i32
    %c0_i32_0 = arith.constant 0 : i32
    %c0_i32_1 = arith.constant 0 : i32
    %c0_i32_2 = arith.constant 0 : i32
    return %c0_i32, %c0_i32_0, %c0_i32_1 : i32, i32, i32
  }
  func.func @transform_26(%arg0: i32, %arg1: memref<2xi32, #tpu.memory_space<smem>>, %arg2: memref<2xi32, #tpu.memory_space<smem>>) -> (i32, i32, i32) {
    %c0_i32 = arith.constant 0 : i32
    %c0_i32_0 = arith.constant 0 : i32
    %c0_i32_1 = arith.constant 0 : i32
    %c0_i32_2 = arith.constant 0 : i32
    return %c0_i32, %c0_i32_0, %c0_i32_1 : i32, i32, i32
  }
  func.func @transform_27(%arg0: i32, %arg1: memref<2xi32, #tpu.memory_space<smem>>, %arg2: memref<2xi32, #tpu.memory_space<smem>>) -> (i32, i32, i32) {
    %c0_i32 = arith.constant 0 : i32
    %c0_i32_0 = arith.constant 0 : i32
    %c0_i32_1 = arith.constant 0 : i32
    %c0_i32_2 = arith.constant 0 : i32
    return %c0_i32, %c0_i32_0, %c0_i32_1 : i32, i32, i32
  }
  func.func @transform_28(%arg0: i32, %arg1: memref<2xi32, #tpu.memory_space<smem>>, %arg2: memref<2xi32, #tpu.memory_space<smem>>) -> (i32, i32, i32) {
    %c0_i32 = arith.constant 0 : i32
    %c0_i32_0 = arith.constant 0 : i32
    %c0_i32_1 = arith.constant 0 : i32
    %c0_i32_2 = arith.constant 0 : i32
    return %c0_i32, %c0_i32_0, %c0_i32_1 : i32, i32, i32
  }
  func.func @transform_29(%arg0: i32, %arg1: memref<2xi32, #tpu.memory_space<smem>>, %arg2: memref<2xi32, #tpu.memory_space<smem>>) -> (i32, i32, i32) {
    %c0_i32 = arith.constant 0 : i32
    %c0_i32_0 = arith.constant 0 : i32
    %c0_i32_1 = arith.constant 0 : i32
    %c0_i32_2 = arith.constant 0 : i32
    return %c0_i32, %c0_i32_0, %c0_i32_1 : i32, i32, i32
  }
  func.func @transform_30(%arg0: i32, %arg1: memref<2xi32, #tpu.memory_space<smem>>, %arg2: memref<2xi32, #tpu.memory_space<smem>>) -> (i32, i32, i32) {
    %c0_i32 = arith.constant 0 : i32
    %c0_i32_0 = arith.constant 0 : i32
    %c0_i32_1 = arith.constant 0 : i32
    %c0_i32_2 = arith.constant 0 : i32
    return %c0_i32, %c0_i32_0, %c0_i32_1 : i32, i32, i32
  }
  func.func @transform_31(%arg0: i32, %arg1: memref<2xi32, #tpu.memory_space<smem>>, %arg2: memref<2xi32, #tpu.memory_space<smem>>) -> (i32, i32, i32) {
    %c0_i32 = arith.constant 0 : i32
    %c0_i32_0 = arith.constant 0 : i32
    %c0_i32_1 = arith.constant 0 : i32
    %c0_i32_2 = arith.constant 0 : i32
    return %c0_i32, %c0_i32_0, %c0_i32_1 : i32, i32, i32
  }
  func.func @transform_32(%arg0: i32, %arg1: memref<2xi32, #tpu.memory_space<smem>>, %arg2: memref<2xi32, #tpu.memory_space<smem>>) -> (i32, i32, i32) {
    %c0_i32 = arith.constant 0 : i32
    %c0_i32_0 = arith.constant 0 : i32
    %c0_i32_1 = arith.constant 0 : i32
    %c0_i32_2 = arith.constant 0 : i32
    return %c0_i32, %c0_i32_0, %c0_i32_1 : i32, i32, i32
  }
  func.func @transform_33(%arg0: i32, %arg1: memref<2xi32, #tpu.memory_space<smem>>, %arg2: memref<2xi32, #tpu.memory_space<smem>>) -> (i32, i32, i32) {
    %c0_i32 = arith.constant 0 : i32
    %c0_i32_0 = arith.constant 0 : i32
    %c0_i32_1 = arith.constant 0 : i32
    %c0_i32_2 = arith.constant 0 : i32
    return %c0_i32, %c0_i32_0, %c0_i32_1 : i32, i32, i32
  }
  func.func @transform_34(%arg0: i32, %arg1: memref<2xi32, #tpu.memory_space<smem>>, %arg2: memref<2xi32, #tpu.memory_space<smem>>) -> (i32, i32, i32) {
    %c0_i32 = arith.constant 0 : i32
    %c0_i32_0 = arith.constant 0 : i32
    %c0_i32_1 = arith.constant 0 : i32
    %c0_i32_2 = arith.constant 0 : i32
    return %c0_i32, %c0_i32_0, %c0_i32_1 : i32, i32, i32
  }
  func.func @transform_35(%arg0: i32, %arg1: memref<2xi32, #tpu.memory_space<smem>>, %arg2: memref<2xi32, #tpu.memory_space<smem>>) -> (i32, i32) {
    %c0_i32 = arith.constant 0 : i32
    %c0_i32_0 = arith.constant 0 : i32
    %c0_i32_1 = arith.constant 0 : i32
    return %c0_i32, %c0_i32_0 : i32, i32
  }
  func.func @transform_36(%arg0: i32, %arg1: memref<2xi32, #tpu.memory_space<smem>>, %arg2: memref<2xi32, #tpu.memory_space<smem>>) -> (i32, i32) {
    %c0_i32 = arith.constant 0 : i32
    %c0_i32_0 = arith.constant 0 : i32
    %c0_i32_1 = arith.constant 0 : i32
    return %c0_i32, %c0_i32_0 : i32, i32
  }
  func.func @transform_37(%arg0: i32, %arg1: memref<2xi32, #tpu.memory_space<smem>>, %arg2: memref<2xi32, #tpu.memory_space<smem>>) -> (i32, i32, i32) {
    %c0_i32 = arith.constant 0 : i32
    %c0_i32_0 = arith.constant 0 : i32
    %c0_i32_1 = arith.constant 0 : i32
    return %arg0, %c0_i32, %c0_i32_0 : i32, i32, i32
  }
}

</mosaic_0001>

<bundles_post_ra>
// kernel: tpu_custom_call.1
= control target key start
LH: loop header
LB: loop body
LE: loop exit
PB: predicated region body
PF: predicated region fallthrough
CT: control target
= control target key end

     0   :  { %s6746_s6 = smov 2   ;;  %s6747_s10 = smov 3   ;;  %s7997_s0 = inlined_call_operand.smem [shape: u32[40], index: -1, kind: input, shape index: {}] }
   0x1   :  { %s6813_s5 = sld [smem:[%s7997_s0]]   ;;  %s6748_s14 = smov 4  }
   0x2   :  { %s6818_s9 = sld [smem:[%s7997_s0 + %s6746_s6]]   ;;  %s6749_s18 = smov 5  }
   0x3   :  { %s6823_s13 = sld [smem:[%s7997_s0 + %s6747_s10]]   ;;  %s6750_s22 = smov 6  }
   0x4   :  { %s6828_s17 = sld [smem:[%s7997_s0 + %s6748_s14]]   ;;  %s6751_s26 = smov 7  }
   0x5   :  { %s6833_s21 = sld [smem:[%s7997_s0 + %s6749_s18]]   ;;  %s6752_s30 = smov 8  }
   0x6   :  { %s6838_s25 = sld [smem:[%s7997_s0 + %s6750_s22]]   ;;  %s6753_s4 = smov 9  }
   0x7   :  { %s6843_s29 = sld [smem:[%s7997_s0 + %s6751_s26]]   ;;  %s6754_s10 = smov 10  }
   0x8   :  { %8002 = sst [smem:[#allocation9_spill]] %s6818_s9  ;;  %s6755_s15 = smov 11  }
   0x9   :  { %8003 = sst [smem:[#allocation10_spill]] %s6823_s13  ;;  %s6756_s20 = smov 12  }
   0xa   :  { %s6848_s3 = sld [smem:[%s7997_s0 + %s6752_s30]]   ;;  %s6757_s26 = smov 13  }
   0xb   :  { %s6853_s8 = sld [smem:[%s7997_s0 + %s6753_s4]]   ;;  %s6758_s1 = smov 14  }
   0xc   :  { %s6858_s14 = sld [smem:[%s7997_s0 + %s6754_s10]]   ;;  %s6759_s7 = smov 15  }
   0xd   :  { %8004 = sst [smem:[#allocation11_spill]] %s6843_s29  ;;  %s6761_s22 = smov 17  }
   0xe   :  { %s6863_s19 = sld [smem:[%s7997_s0 + %s6755_s15]]   ;;  %s6760_s15 = smov 16  }
   0xf   :  { %s6868_s24 = sld [smem:[%s7997_s0 + %s6756_s20]]   ;;  %s6762_s28 = smov 18  }
  0x10   :  { %8005 = sst [smem:[#allocation12_spill]] %s6848_s3 }
  0x11   :  { %8006 = sst [smem:[#allocation13_spill]] %s6853_s8 }
  0x12   :  { %8007 = sst [smem:[#allocation14_spill]] %s6858_s14 }
  0x13   :  { %s6873_s30 = sld [smem:[%s7997_s0 + %s6757_s26]]  }
  0x14   :  { %s6878_s6 = sld [smem:[%s7997_s0 + %s6758_s1]]  }
  0x15   :  { %8008 = sst [smem:[#allocation15_spill]] %s6868_s24 }
  0x16   :  { %s6883_s12 = sld [smem:[%s7997_s0 + %s6759_s7]]   ;;  %s6763_s7 = smov 19  }
  0x17   :  { %s6888_s20 = sld [smem:[%s7997_s0 + %s6760_s15]]   ;;  %s6764_s15 = smov 20  }
  0x18   :  { %s6893_s27 = sld [smem:[%s7997_s0 + %s6761_s22]]   ;;  %s6765_s22 = smov 21  }
  0x19   :  { %s6898_s4 = sld [smem:[%s7997_s0 + %s6762_s28]]   ;;  %s6766_s28 = smov 22  }
  0x1a   :  { %8009 = sst [smem:[#allocation16_spill]] %s6878_s6 }
  0x1b   :  { %s6913_s6 = sld [smem:[%s7997_s0 + %s6765_s22]]   ;;  %s6769_s22 = smov 25  }
  0x1c   :  { %8010 = sst [smem:[#allocation17_spill]] %s6883_s12 }
  0x1d   :  { %8011 = sst [smem:[#allocation18_spill]] %s6888_s20 }
  0x1e   :  { %s6903_s12 = sld [smem:[%s7997_s0 + %s6763_s7]]   ;;  %s6767_s7 = smov 23  }
  0x1f   :  { %8012 = sst [smem:[#allocation19_spill]] %s6898_s4 }
  0x20   :  { %s6908_s20 = sld [smem:[%s7997_s0 + %s6764_s15]]   ;;  %s6768_s15 = smov 24  }
  0x21   :  { %8015 = sst [smem:[#allocation22_spill]] %s6913_s6 }
  0x22   :  { %s6918_s24 = sld [smem:[%s7997_s0 + %s6766_s28]]   ;;  %s6770_s28 = smov 26  }
  0x23   :  { %s6933_s6 = sld [smem:[%s7997_s0 + %s6769_s22]]   ;;  %s6773_s22 = smov 29  }
  0x24   :  { %8013 = sst [smem:[#allocation20_spill]] %s6903_s12 }
  0x25   :  { %s6923_s12 = sld [smem:[%s7997_s0 + %s6767_s7]]   ;;  %s6771_s7 = smov 27  }
  0x26   :  { %8014 = sst [smem:[#allocation21_spill]] %s6908_s20 }
  0x27   :  { %s6928_s20 = sld [smem:[%s7997_s0 + %s6768_s15]]   ;;  %s6772_s15 = smov 28  }
  0x28   :  { %8016 = sst [smem:[#allocation23_spill]] %s6918_s24 }
  0x29   :  { %8019 = sst [smem:[#allocation26_spill]] %s6933_s6 }
  0x2a   :  { %s6938_s24 = sld [smem:[%s7997_s0 + %s6770_s28]]   ;;  %s6774_s28 = smov 30  }
  0x2b   :  { %8017 = sst [smem:[#allocation24_spill]] %s6923_s12 }
  0x2c   :  { %s6943_s12 = sld [smem:[%s7997_s0 + %s6771_s7]]   ;;  %s6775_s7 = smov 31  }
  0x2d   :  { %8018 = sst [smem:[#allocation25_spill]] %s6928_s20 }
  0x2e   :  { %s6948_s20 = sld [smem:[%s7997_s0 + %s6772_s15]]   ;;  %s6776_s15 = smov 32  }
  0x2f   :  { %s6953_s6 = sld [smem:[%s7997_s0 + %s6773_s22]]   ;;  %s6777_s22 = smov 33  }
  0x30   :  { %8020 = sst [smem:[#allocation27_spill]] %s6938_s24 }
  0x31   :  { %s6958_s24 = sld [smem:[%s7997_s0 + %s6774_s28]]   ;;  %s6778_s28 = smov 34  }
  0x32   :  { %8021 = sst [smem:[#allocation28_spill]] %s6943_s12 }
  0x33   :  { %s6963_s12 = sld [smem:[%s7997_s0 + %s6775_s7]]   ;;  %s6779_s7 = smov 35  }
  0x34   :  { %8022 = sst [smem:[#allocation29_spill]] %s6948_s20 }
  0x35   :  { %8023 = sst [smem:[#allocation30_spill]] %s6953_s6  ;;  %s6781_s6 = smov 37  }
  0x36   :  { %s6968_s23 = sld [smem:[%s7997_s0 + %s6776_s15]]   ;;  %s6780_s15 = smov 36  }
  0x37   :  { %8024 = sst [smem:[#allocation31_spill]] %s6958_s24  ;;  %s6782_s24 = smov 38  }
  0x38   :  { %s6973_s1 = sld [smem:[%s7997_s0 + %s6777_s22]]  }
  0x39   :  { %8025 = sst [smem:[#allocation32_spill]] %s6963_s12  ;;  %s6783_s12 = smov 39  }
  0x3a   :  { %s6978_s10 = sld [smem:[%s7997_s0 + %s6778_s28]]  }
  0x3b   :  { %s6983_s16 = sld [smem:[%s7997_s0 + %s6779_s7]]  }
  0x3c   :  { %8026 = sst [smem:[#allocation33_spill]] %s6968_s23  ;;  %s84_s23 = sshll.u32 %s6813_s5, 4  ;;  %s85_s23 = int_to_ptr.vmem [resolvable:$true] %s84_s23 }
  0x3d   :  { %s6988_s20 = sld [smem:[%s7997_s0 + %s6780_s15]]   ;;  %s6640_s15 = scalar_lea.vmem %s85_s23, 16 }
  0x3e   :  { %8027 = sst [smem:[#allocation34_spill]] %s6973_s1  ;;  %p6641_p0 = scmp.ne.s32.totalorder %s85_s23, %s6640_s15 }
  0x3f   :  { %s6993_s1 = sld [smem:[%s7997_s0 + %s6781_s6]]   ;;  %p6645_p1 = scmp.lt.s32.totalorder %s85_s23, %s85_s23 }
  0x40   :  { %8028 = sst [smem:[#allocation35_spill]] %s6978_s10  ;;  %p6646_p2 = scmp.lt.s32.totalorder %s6640_s15, %s6640_s15 }
  0x41   :  { %8029 = sst [smem:[#allocation36_spill]] %s6983_s16 }
  0x42   :  { %s6998_s10 = sld [smem:[%s7997_s0 + %s6782_s24]]   ;;  %p6647_p3 = por %p6646_p2, %p6645_p1 }
  0x43   :  { %s7003_s16 = sld [smem:[%s7997_s0 + %s6783_s12]]  }
  0x44   :  { %p6648_p4 = pnand %p6647_p3, %p6641_p0 }
  0x46   :  { %6651 = shalt.err (!%p6648_p4)  }
  0x47   :  { %s6784_s18 = smov [#allocation3]   ;;  %s6785_s6 = smov 1  }
  0x48   :  { %87 = dma.vmem_to_smem %s85_s23, 16, %s6784_s18, [#allocation2] }
  0x49   :  { %s5405_s24 = sld [smem:[%s7997_s0 + %s6785_s6]]  }
  0x4f   :  { %s88_s28 = sshll.u32 %s5405_s24, 4  ;;  %s89_s28 = int_to_ptr.vmem [resolvable:$true] %s88_s28 }
  0x50   :  { %s6652_s2 = scalar_lea.vmem %s89_s28, 16  ;;  %p6657_p6 = scmp.lt.s32.totalorder %s89_s28, %s89_s28 }
  0x51   :  { %p6653_p5 = scmp.ne.s32.totalorder %s89_s28, %s6652_s2  ;;  %p6658_p7 = scmp.lt.s32.totalorder %s6652_s2, %s6652_s2 }
  0x53   :  { %p6659_p8 = por %p6658_p7, %p6657_p6 }
  0x55   :  { %p6660_p9 = pnand %p6659_p8, %p6653_p5 }
  0x57   :  { %6663 = shalt.err (!%p6660_p9)  }
  0x58   :  { %s6786_s5 = smov [#allocation4]  }
  0x59   :  { %91 = dma.vmem_to_smem %s89_s28, 16, %s6786_s5, [#allocation2] }
  0x5a   :  { %6716 = dma.done.wait [#allocation2], 32 }
  0x5b   :  { %6717 = vsyncadd [#allocation2], 4294967264 }
  0x5c   :  { %93 = sfence }
  0x5d   :  { %94 = vsyncpa [#allocation6], 0 }
  0x5e   :  { %96 = vsyncpa [#allocation6 + $0x1], 0  ;;  %s7009_s12 = smov 0   ;;  %s7011_s7 = smov 0  }
  0x5f   :  { %s7013_s0 = smov 0   ;;  %s7015_s11 = smov 0  }
  0x60 LB: > { %s7030_s23 = sadd.s32 4294967295, %s6736_s11   ;;  %s5445_s15 = sadd.s32 4294967294, %s6736_s11   ;;  %s6736_s11 = sphi %s7015_s11, %s8076_s11   ;;  %s6732_s0 = sphi %s7013_s0, %s8075_s0   ;;  %s6728_s7 = sphi %s7011_s7, %s8074_s7   ;;  %s6724_s12 = sphi %s7009_s12, %s8073_s12  }
  0x61   : > { %s7034_s18 = sadd.s32 1, %s6736_s11   ;;  %s901_s6 = sadd.s32 1, %s6732_s0 }
  0x62   : > { %s898_s22 = ssub.s32 %s6736_s11, %s7034_s18  ;;  %p911_p10 = scmp.ne.s32.totalorder %s6732_s0, %s6728_s7 }
  0x63   : > { %p899_p11 = scmp.eq.s32.totalorder %s898_s22, 0  ;;  %p912_p12 = scmp.eq.s32.totalorder %s7030_s23, 1 }
  0x64   : > { %p917_p13 = scmp.ne.s32.totalorder %s6728_s7, %s6724_s12  ;;  %p918_p0 = scmp.eq.s32.totalorder %s5445_s15, 1 }
  0x65   : > { %s7045_s26 = scalar_select %p899_p11, %s6732_s0, %s901_s6  }
  0x66   : > { %p7047_p1 = por %p912_p12, %p911_p10  ;;  %p7051_p2 = por %p918_p0, %p917_p13 }
  0x67   : > { %8030 = sst [smem:[#allocation37_spill]] %s7045_s26  ;;  %p5448_p3 = scmp.ge.s32.totalorder %s6736_s11, 1 }
  0x68   : > { %p1059_p4 = scmp.lt.s32.totalorder %s6736_s11, 3 }
  0x6a   : > { %p1060_p5 = pnand %p5448_p3, %p1059_p4 }
  0x6b   : > { %s8033_s29 = sld [smem:[#allocation11_spill]] (!%p1060_p5)  ;;  %v6497_v0 = vld [vmem:[%s6833_s21] sm:$0xff] (!%p1060_p5)   ;;  %v6787_v1 = vmov (!%p1060_p5), 0.0   ;;  %s7998_s2 = sand.u32 (!%p1060_p5), 1, %s6728_s7   ;;  %v1173_v3 = vlaneseq (!%p1060_p5)  ;;  %v6499_v4 = vld [vmem:[%s6833_s21 + $0x8] sm:$0xff] (!%p1060_p5)   ;;  %vm6788_vm0 = vmmov (!%p1060_p5), 0  }
  0x6c   : > { %1063 = sbr.rel (%p1060_p5) target bundleno = 9397 (0x24b5), region = 168  ;;  %5970 = vmatprep.subr.bf16.mxu1 (!%p1060_p5), %v6787_v1  ;;  %5964 = vmatprep.subr.bf16.mxu0 (!%p1060_p5), %v6787_v1  ;;  %s8034_s13 = sld [smem:[#allocation10_spill]] (!%p1060_p5)  ;;  %v6500_v7 = vld [vmem:[%s6833_s21 + $0x10] sm:$0xff] (!%p1060_p5)   ;;  %vm1223_vm1 = vcmask (!%p1060_p5), 130048   ;;  %vm1308_vm2 = vcmask (!%p1060_p5), 392192  }
  0x6d   : > { %5971 = vmatpush3.bf16.msra.mxu1 (!%p1060_p5), %v6497_v0  ;;  %s7064_s5 = sshll.u32 (!%p1060_p5), %s7998_s2, 3  ;;  %p1158_p6 = scmp.lt.s32.totalorder (!%p1060_p5), %s7030_s23, 1  ;;  %5966 = vmatprep.mubr.msk.bf16.mxu0 (!%p1060_p5), %vm6788_vm0, %v6787_v1  ;;  %v1174_v5 = vshrl.u32 (!%p1060_p5), %v1173_v3, 7  ;;  %v1180_v6 = vand.u32 (!%p1060_p5), 127, %v1173_v3  ;;  %v5465_v34 = vld [vmem:[%s6838_s25] ss:$0 sm:$0xff] (!%p1060_p5) }
  0x6e   : > { %5972 = vmatprep.subr.bf16.mxu1 (!%p1060_p5), %v6787_v1  ;;  %5976 = vmatprep.mubr.msk.bf16.mxu1 (!%p1060_p5), %vm6788_vm0, %v6787_v1  ;;  %s7074_s15 = sld [smem:[#allocation3 + %s7030_s23]] (!%p1060_p5) }
  0x6f   : > { %s1172_s6 = sld [smem:[#allocation4 + %s7030_s23]] (!%p1060_p5)  ;;  %v1184_v8 = vsub.s32 (!%p1060_p5), %v1180_v6, %v1174_v5  ;;  %v1270_v28 = vsub.s32 (!%p1060_p5), 0, %v1174_v5 }
  0x70   : > { %s8039_s3 = sld [smem:[#allocation12_spill]] (!%p1060_p5)  ;;  %s8040_s9 = sld [smem:[#allocation9_spill]] (!%p1060_p5) }
  0x71   : > { %v6498_v2 = vld [vmem:[%s8033_s29] sm:$0xff] (!%p1060_p5)   ;;  %5973 = vmatpush3.bf16.msra.mxu1 (!%p1060_p5), %v6499_v4  ;;  %vm1185_vm3 = vcmp.eq.s32.totalorder (!%p1060_p5), %v1184_v8, 4294967292  ;;  %vm1188_vm4 = vcmp.eq.s32.totalorder (!%p1060_p5), %v1184_v8, 4294967293  ;;  %vm1191_vm5 = vcmp.eq.s32.totalorder (!%p1060_p5), %v1184_v8, 4294967294  ;;  %vm1194_vm8 = vcmp.eq.s32.totalorder (!%p1060_p5), %v1184_v8, 4294967295 }
  0x72   : > { %5965 = vmatpush3.bf16.msra.mxu0 (!%p1060_p5), %v6498_v2  ;;  %5974 = vmatprep.subr.bf16.mxu1 (!%p1060_p5), %v6787_v1  ;;  %v7088_v16 = vsel (!%p1060_p5), %vm1185_vm3, 1.0, %v6787_v1  ;;  %v7100_v19 = vsel (!%p1060_p5), %vm1188_vm4, 1.0, %v6787_v1  ;;  %v7103_v20 = vsel (!%p1060_p5), %vm1191_vm5, 1.0, %v6787_v1  ;;  %vm1197_vm9 = vcmp.eq.s32.totalorder (!%p1060_p5), %v1184_v8, 0 }
  0x73   : > { %s7078_s22 = scalar_select %p1158_p6, %s7030_s23, 1  ;;  %v7107_v21 = vsel %vm1194_vm8, 1.0, %v6787_v1  ;;  %v7110_v22 = vsel %vm1197_vm9, 1.0, %v6787_v1  ;;  %vm1200_vm10 = vcmp.eq.s32.totalorder %v1184_v8, 1  ;;  %vm1203_vm11 = vcmp.eq.s32.totalorder %v1184_v8, 2 }
  0x74   : > { %v1175_v14 = vstv %s7074_s15  ;;  %v7113_v23 = vsel %vm1200_vm10, 1.0, %v6787_v1  ;;  %v7116_v24 = vsel %vm1203_vm11, 1.0, %v6787_v1  ;;  %vm1206_vm12 = vcmp.eq.s32.totalorder %v1184_v8, 3  ;;  %s7137_s15 = smov 0  }
  0x75   : > { %s1164_s2 = scalar_lea.vmem %s8034_s13, %s7078_s22  ;;  %s5786_s29 = sshll.u32 %s7078_s22, 4  ;;  %5975 = vmatpush3.bf16.msra.mxu1 %v6500_v7  ;;  %v1182_v15 = vstv %s1172_s6  ;;  %vm7091_vm6 = vcmp.lt.s32.totalorder %v1180_v6, %v1175_v14  ;;  %vm1209_vm13 = vcmp.eq.s32.totalorder %v1184_v8, 4  ;;  %v7119_v25 = vsel %vm1206_vm12, 1.0, %v6787_v1 }
  0x76   : > { %v1212_v9 = vld [vmem:[%s1164_s2] sm:$0x1]  ;;  %s1169_s26 = scalar_lea.vmem %s6828_s17, %s5786_s29  ;;  %vm7095_vm7 = vcmp.lt.s32.totalorder %v1180_v6, %v1182_v15  ;;  %v7122_v26 = vsel %vm1209_vm13, 1.0, %v6787_v1  ;;  %s5450_s29 = sshll.u32 %s7078_s22, 3  ;;  %vm1176_vm14 = vcmp.lt.s32.totalorder %v1174_v5, %v1175_v14 }
  0x77   : > { %v1213_v10 = vpack.c.bf16 %v1212_v9, %v1212_v9  ;;  %v1274_v11 = vld [vmem:[%s1169_s26] sm:$0xff]  ;;  %v1275_v12 = vld [vmem:[%s1169_s26 + $0x8] sm:$0xf]  ;;  %s1161_s26 = scalar_lea.vmem %s8040_s9, %s5450_s29  ;;  %v7129_v39 = vsel %vm1176_vm14, 1.0, %v6787_v1 }
  0x78   : > { %v1276_v13 = vpack.c.bf16 %v1275_v12, %v1274_v11  ;;  %v1216_v27 = vld [vmem:[%s8039_s3] sm:$0x1] }
  0x79   : > { %5967 = vmatmul.mubr.msk.bf16.vlgmr.msra.gmra.mrb[0].mxu0 %vm1223_vm1, %v1213_v10  ;;  %v1267_v32 = vld [vmem:[%s1161_s26] sm:$0xff] }
  0x7a   : > { %5977 = vmatmul.mubr.msk.bf16.vlgmr.msra.gmra.mrb[0].mxu1 %vm1308_vm2, %v1276_v13 }
 0x14c   : > { %v1261_v29 = vpop.f32.mrb[0].mxu0 }
 0x14d   : > { %v1262_v30 = vadd.f32 %v1261_v29, %v1216_v27  ;;  %v5968_v31 = vpop.f32.mrb[1].mxu0  ;;  %v1346_v35 = vpop.f32.mrb[0].mxu1 }
 0x14e   : > { %v1264_v33 = vpop.f32.mrb[2].mxu0  ;;  %v5978_v38 = vpop.f32.mrb[1].mxu1  ;;  %v1347_v42 = vadd.f32 %v5465_v34, %v1346_v35 }
 0x14f   : > { %v1271_v36 = vrot.slane %v1262_v30, %v1270_v28  ;;  %v5969_v37 = vpop.f32.mrb[3].mxu0  ;;  %v1349_v40 = vpop.f32.mrb[2].mxu1 }
 0x150   : > { %v1350_v43 = vadd.f32 %v5465_v34, %v1349_v40  ;;  %v5979_v44 = vpop.f32.mrb[3].mxu1 }
 0x151   : > { %v1272_v41 = vadd.f32 %v1271_v36, %v1267_v32 }
 0x152   : > { %v7132_v46 = vpack.c.bf16 %v1350_v43, %v1347_v42 }
 0x153   : > { %v1273_v45 = vmul.f32 %v7129_v39, %v1272_v41  }
 0x154 LB: >> { %s8041_s8 = sld [smem:[#allocation13_spill]]  ;;  %v6789_v47 = vmov 0.0   ;;  %vm6790_vm15 = vmmov 0   ;;  %s7149_s6 = sshll.u32 %s6744_s15, 6  ;;  %vm1583_vm2 = vcmask 64512   ;;  %v7169_v51 = vpack.c.bf16 %v6740_v45, %v6740_v45  ;;  %s6744_s15 = sphi %s7137_s15, %s1359_s15   ;;  %v6740_v45 = vphi %v1273_v45, %v8068_v45  }
 0x155   : >> { %5980 = vmatprep.subr.bf16.mxu0 %v6789_v47  ;;  %5984 = vmatprep.mubr.msk.bf16.mxu0 %vm6790_vm15, %v6789_v47  ;;  %s5787_s22 = sshll.u32 %s6744_s15, 3  ;;  %s8042_s4 = sld [smem:[#allocation19_spill]]  ;;  %vm1399_vm3 = vcmask 261120   ;;  %v6791_v57 = vmov 2   ;;  %v6792_v58 = vmov 0   ;;  %v6793_v30 = vmov 3  }
 0x156   : >> { %6004 = vmatprep.subr.bf16.mxu1 %v6789_v47  ;;  %6006 = vmatprep.mubr.msk.bf16.mxu1 %vm6790_vm15, %v6789_v47  ;;  %s7162_s26 = scalar_lea.vmem %s6863_s19, %s7149_s6  ;;  %s1364_s2 = scalar_lea.vmem %s6893_s27, %s5787_s22  ;;  %v6794_v31 = vmov 1   ;;  %v6795_v32 = vmov 4   ;;  %v6796_v33 = vmov 5   ;;  %v6797_v34 = vmov 6  }
 0x157   : >> { %v6540_v50 = vld [vmem:[%s1364_s2] sm:$0x1f]   ;;  %v6539_v54 = vld [vmem:[%s7162_s26 + $0x8] sm:$0xff]   ;;  %s8043_s14 = sld [smem:[#allocation14_spill]]  ;;  %s7194_s2 = scalar_lea.vmem %s6873_s30, %s7149_s6  ;;  %6503 = vset.pattern.permute.xlu1 %v6791_v57  ;;  %6501 = vset.pattern.permute.xlu0 %v6792_v58  ;;  %v6798_v35 = vmov 8   ;;  %v6799_v41 = vmov 7  }
 0x158   : >> { %v6538_v52 = vld [vmem:[%s7162_s26] sm:$0xff]   ;;  %v7173_v53 = vsel %vm1583_vm2, %v6540_v50, 0  ;;  %v6542_v56 = vld [vmem:[%s7194_s2 + $0x8] sm:$0xff]   ;;  %vm1801_vm4 = vcmask 1043456   ;;  %vm1802_vm5 = vcmask 1044480   ;;  %vm1776_vm8 = vcmask 7168  }
 0x159   : >> { %6005 = vmatpush3.bf16.xpose.msra.mxu1 %v7173_v53  ;;  %v6541_v55 = vld [vmem:[%s7194_s2] sm:$0xff]   ;;  %vm1778_vm9 = vcmask 15360   ;;  %vm1780_vm10 = vcmask 23552   ;;  %vm1782_vm11 = vcmask 31744   ;;  %vm1784_vm12 = vcmask 39936  }
 0x15a   : >> { %s7157_s29 = scalar_lea.vmem %s8041_s8, %s7149_s6  ;;  %6016 = vmatprep.subr.bf16.mxu1 %v6789_v47  ;;  %vm1786_vm13 = vcmask 48128   ;;  %vm1788_vm14 = vcmask 56320  }
 0x15b   : >> { %v6536_v48 = vld [vmem:[%s7157_s29] sm:$0xff]   ;;  %v6537_v49 = vld [vmem:[%s7157_s29 + $0x8] sm:$0xff]   ;;  %s7177_s3 = scalar_lea.vmem %s8042_s4, %s5787_s22  ;;  %s8044_s22 = sld [smem:[#allocation15_spill]]  ;;  %v6543_v42 = vld [vmem:[%s7157_s29 + $0x10] sm:$0xff]  }
 0x15c   : >> { %5981 = vmatpush3.bf16.msra.mxu0 %v6536_v48  ;;  %s7207_s4 = sshll.u32 %s6744_s15, 2  ;;  %v6544_v43 = vld [vmem:[%s7157_s29 + $0x18] sm:$0xff]  }
 0x15d   : >> { %5982 = vmatprep.subr.bf16.mxu0 %v6789_v47  ;;  %s7211_s8 = scalar_lea.vmem %s8043_s14, %s7207_s4 }
 0x15e   : >> { %v5476_v59 = vld [vmem:[%s7211_s8] ss:$0 sm:$0xff] }
 0x160   : >> { %5983 = vmatpush3.bf16.msra.mxu0 %v6537_v49 }
 0x161   : >> { %5988 = vmatprep.subr.bf16.mxu0 %v6789_v47  ;;  %s7216_s9 = scalar_lea.vmem %s8044_s22, %s7207_s4 }
 0x162   : >> { %v5481_v3 = vld [vmem:[%s7216_s9] ss:$0 sm:$0xff] }
 0x163   : >> { %5985 = vmatmul.mubr.msk.bf16.vlgmr.msra.gmra.mrb[0].mxu0 %vm1399_vm3, %v7169_v51 }
 0x164   : >> { %5989 = vmatpush3.bf16.msra.mxu0 %v6538_v52  ;;  %5992 = vmatprep.mubr.msk.bf16.mxu0 %vm6790_vm15, %v6789_v47 }
 0x165   : >> { %5990 = vmatprep.subr.bf16.mxu0 %v6789_v47 }
 0x168   : >> { %5991 = vmatpush3.bf16.msra.mxu0 %v6539_v54 }
 0x169   : >> { %5996 = vmatprep.subr.bf16.mxu0 %v6789_v47 }
 0x16b   : >> { %5993 = vmatmul.mubr.msk.bf16.vlgmr.msra.gmra.mrb[4].mxu0 %vm1399_vm3, %v7169_v51 }
 0x16c   : >> { %6000 = vmatprep.mubr.msk.bf16.mxu0 %vm6790_vm15, %v6789_v47  ;;  %5997 = vmatpush3.bf16.msra.mxu0 %v6541_v55 }
 0x16d   : >> { %5998 = vmatprep.subr.bf16.mxu0 %v6789_v47 }
 0x170   : >> { %5999 = vmatpush3.bf16.msra.mxu0 %v6542_v56 }
 0x171   : >> { %6010 = vmatprep.subr.bf16.mxu0 %v6789_v47 }
 0x173   : >> { %6001 = vmatmul.mubr.msk.bf16.vlgmr.msra.gmra.mrb[8].mxu0 %vm1399_vm3, %v7169_v51 }
 0x174   : >> { %6012 = vmatprep.mubr.msk.bf16.mxu0 %vm6790_vm15, %v6789_v47 }
 0x236   : >> { %v1437_v60 = vpop.f32.mrb[0].mxu0 }
 0x237   : >> { %v1438_v61 = vadd.f32 %v5476_v59, %v1437_v60  ;;  %v5986_v62 = vpop.f32.mrb[1].mxu0 }
 0x238   : >> { %v1440_v63 = vpop.f32.mrb[2].mxu0 }
 0x239   : >> { %v1443_v0 = vpack.c.bf16 %v1438_v61, %v1438_v61  ;;  %v5987_v2 = vpop.f32.mrb[3].mxu0 }
 0x23b   : >> { %6007 = vmatmul.mubr.msk.bf16.vlgmr.msra.gmra.mrb[0].mxu1 %vm1583_vm2, %v1443_v0 }
 0x23c   : >> { %6018 = vmatprep.mubr.msk.bf16.mxu1 %vm6790_vm15, %v6789_v47 }
 0x23e   : >> { %v1504_v4 = vpop.f32.mrb[4].mxu0 }
 0x23f   : >> { %v1505_v5 = vadd.f32 %v5481_v3, %v1504_v4  ;;  %v5994_v6 = vpop.f32.mrb[5].mxu0 }
 0x240   : >> { %v1507_v7 = vpop.f32.mrb[6].mxu0 }
 0x241   : >> { %v1510_v8 = vpack.c.bf16 %v1505_v5, %v1505_v5  ;;  %v5995_v9 = vpop.f32.mrb[7].mxu0 }
 0x243   : >> { %v1637_v10 = vsel %vm1583_vm2, %v1510_v8, 0 }
 0x244   : >> { %6011 = vmatpush3.bf16.xpose.msra.mxu0 %v1637_v10 }
 0x245   : >> { %6028 = vmatprep.subr.bf16.mxu0 %v6789_v47 }
 0x246   : >> { %v7227_v11 = vpop.f32.mrb[8].mxu0 }
 0x247   : >> { %v6002_v12 = vpop.f32.mrb[9].mxu0 }
 0x248   : >> { %v1574_v13 = vpop.f32.mrb[10].mxu0 }
 0x249   : >> { %v6003_v14 = vpop.f32.mrb[11].mxu0 }
 0x24b   : >> { %6013 = vmatmul.mubr.msk.bf16.vlgmr.msra.gmra.mrb[12].mxu0 %vm1583_vm2, %v1443_v0 }
 0x24c   : >> { %6032 = vmatprep.mubr.msk.bf16.mxu0 %vm6790_vm15, %v6789_v47  ;;  %6029 = vmatpush3.bf16.msra.mxu0 %v6543_v42 }
 0x24d   : >> { %6030 = vmatprep.subr.bf16.mxu0 %v6789_v47 }
 0x250   : >> { %6031 = vmatpush3.bf16.msra.mxu0 %v6544_v43 }
 0x251   : >> { %6036 = vmatprep.subr.bf16.mxu0 %v6789_v47 }
 0x253   : >> { %6033 = vmatmul.mubr.msk.bf16.vlgmr.msra.gmra.mrb[16].mxu0 %vm1399_vm3, %v7169_v51 }
 0x254   : >> { %6040 = vmatprep.mubr.msk.bf16.mxu0 %vm6790_vm15, %v6789_v47 }
 0x30e   : >> { %v1624_v15 = vpop.f32.mrb[0].mxu1 }
 0x30f   : >> { %1686 = vperm.xlu1 %6503, %v1624_v15   ;;  %1632 = vperm.xlu0 %6501, %v1624_v15   ;;  %v6008_v27 = vpop.f32.mrb[1].mxu1 }
 0x310   : >> { %v1627_v28 = vpop.f32.mrb[2].mxu1 }
 0x311   : >> { %v6009_v29 = vpop.f32.mrb[3].mxu1 }
 0x312   : >> { %v6545_v29 = vld [vmem:[%s7162_s26 + $0x10] sm:$0xff]  }
 0x313   : >> { %6504 = vset.pattern.permute.xlu1 %v6793_v30  ;;  %6502 = vset.pattern.permute.xlu0 %v6794_v31 }
 0x314   : >> { %1692 = vperm.xlu1 %6504, %v1624_v15   ;;  %1680 = vperm.xlu0 %6502, %v1624_v15  }
 0x315   : >> { %6037 = vmatpush3.bf16.msra.mxu0 %v6545_v29  ;;  %v6800_v29 = vmov 65535  }
 0x316   : >> { %6038 = vmatprep.subr.bf16.mxu0 %v6789_v47 }
 0x318   : >> { %6505 = vset.pattern.permute.xlu1 %v6795_v32  ;;  %6506 = vset.pattern.permute.xlu0 %v6796_v33 }
 0x319   : >> { %1698 = vperm.xlu1 %6505, %v1624_v15   ;;  %1704 = vperm.xlu0 %6506, %v1624_v15  }
 0x31d   : >> { %6507 = vset.pattern.permute.xlu1 %v6797_v34  ;;  %6509 = vset.pattern.permute.xlu0 %v6798_v35 }
 0x31e   : >> { %1710 = vperm.xlu1 %6507, %v1624_v15   ;;  %1722 = vperm.xlu0 %6509, %v1624_v15   ;;  %v1673_v36 = vpop.f32.mrb[12].mxu0 }
 0x31f   : >> { %v6014_v37 = vpop.f32.mrb[13].mxu0 }
 0x320   : >> { %v1676_v38 = vpop.f32.mrb[14].mxu0 }
 0x321   : >> { %v6015_v40 = vpop.f32.mrb[15].mxu0 }
 0x322   : >> { %6508 = vset.pattern.permute.xlu1 %v6799_v41  ;;  %6510 = vset.pattern.permute.xlu0 %v6792_v58 }
 0x323   : >> { %1716 = vperm.xlu1 %6508, %v1624_v15  }
 0x327   : >> { %6511 = vset.pattern.permute.xlu1 %v6794_v31 }
 0x38e   : >> { %v1687_v44 = vpop.permute.xlu1 %1686  ;;  %v1633_v48 = vpop.permute.xlu0 %1632 }
 0x38f   : >> { %v1635_v49 = vmul.f32 %v7088_v16, %v1633_v48  ;;  %v1689_v56 = vmul.f32 %v7103_v20, %v1687_v44  ;;  %v5504_v44 = vld [vmem:[%s7211_s8 + $0x1] ss:$0 sm:$0xff]  ;;  %v1956_v48 = vpop.f32.mrb[16].mxu0 }
 0x391   : >> { %v1674_v54 = vadd.f32 %v1673_v36, %v1635_v49  ;;  %v6546_v36 = vld [vmem:[%s7162_s26 + $0x18] sm:$0xff]   ;;  %v1957_v49 = vadd.f32 %v5504_v44, %v1956_v48 }
 0x392   : >> { %6039 = vmatpush3.bf16.msra.mxu0 %v6546_v36  ;;  %v1803_v36 = vsel %vm1801_vm4, 4294967295, %v6800_v29 }
 0x393   : >> { %v1693_v50 = vpop.permute.xlu1 %1692  ;;  %v1681_v52 = vpop.permute.xlu0 %1680  ;;  %6052 = vmatprep.subr.bf16.mxu0 %v6789_v47 }
 0x394   : >> { %v1683_v55 = vmul.f32 %v7100_v19, %v1681_v52  ;;  %v1695_v60 = vmul.f32 %v7107_v21, %v1693_v50  ;;  %v6034_v50 = vpop.f32.mrb[17].mxu0 }
 0x395   : >> { %6041 = vmatmul.mubr.msk.bf16.vlgmr.msra.gmra.mrb[20].mxu0 %vm1399_vm3, %v7169_v51  ;;  %v1959_v52 = vpop.f32.mrb[18].mxu0 }
 0x396   : >> { %v1684_v59 = vadd.f32 %v1683_v55, %v1674_v54  ;;  %6054 = vmatprep.mubr.msk.bf16.mxu0 %vm6790_vm15, %v6789_v47  ;;  %v7270_v54 = vpack.c.bf16 %v1957_v49, %v1957_v49  ;;  %v6035_v55 = vpop.f32.mrb[19].mxu0 }
 0x398   : >> { %v1690_v61 = vadd.f32 %v1689_v56, %v1684_v59  ;;  %v1699_v62 = vpop.permute.xlu1 %1698  ;;  %v1705_v2 = vpop.permute.xlu0 %1704 }
 0x399   : >> { %v1701_v63 = vmul.f32 %v7110_v22, %v1699_v62  ;;  %v1707_v4 = vmul.f32 %v7113_v23, %v1705_v2 }
 0x39a   : >> { %v1696_v0 = vadd.f32 %v1695_v60, %v1690_v61 }
 0x39b   : >> { %6053 = vmatpush3.bf16.xpose.msra.mxu0 %v7173_v53 }
 0x39c   : >> { %v1702_v3 = vadd.f32 %v1701_v63, %v1696_v0  ;;  %6064 = vmatprep.subr.bf16.mxu0 %v6789_v47 }
 0x39d   : >> { %v1711_v5 = vpop.permute.xlu1 %1710  ;;  %v1723_v8 = vpop.permute.xlu0 %1722 }
 0x39e   : >> { %v1708_v6 = vadd.f32 %v1707_v4, %v1702_v3  ;;  %v1713_v7 = vmul.f32 %v7116_v24, %v1711_v5  ;;  %v1725_v13 = vmul.f32 %v7122_v26, %v1723_v8 }
 0x3a0   : >> { %v1714_v10 = vadd.f32 %v1713_v7, %v1708_v6 }
 0x3a2   : >> { %v1717_v9 = vpop.permute.xlu1 %1716  ;;  %6055 = vmatmul.mubr.msk.bf16.vlgmr.msra.gmra.mrb[24].mxu0 %vm1583_vm2, %v7270_v54 }
 0x3a3   : >> { %v1719_v12 = vmul.f32 %v7119_v25, %v1717_v9  ;;  %6066 = vmatprep.mubr.msk.bf16.mxu0 %vm6790_vm15, %v6789_v47 }
 0x3a5   : >> { %v1720_v14 = vadd.f32 %v1719_v12, %v1714_v10 }
 0x3a7   : >> { %v1726_v15 = vadd.f32 %v1725_v13, %v1720_v14 }
 0x3a9   : >> { %v1727_v27 = vsel %vm7091_vm6, %v1726_v15, -10000.0 }
 0x3aa   : >> { %v1728_v28 = vsel %vm1583_vm2, %v1727_v27, -inf }
 0x3ab   : >> { %1729 = vmax.xlane.f32.xlu1 %v1728_v28  ;;  %v6547_v28 = vld [vmem:[%s7177_s3] sm:$0x1f]   ;;  %s8045_s3 = sld [smem:[#allocation16_spill]] }
 0x3b1   : >> { %s7327_s22 = scalar_lea.vmem %s8045_s3, %s7207_s4  ;;  %s8047_s3 = sld [smem:[#allocation18_spill]] }
 0x438   : >> { %v1730_v37 = vpop.xlane.xlu1 %1729 }
 0x439   : >> { %v1731_v38 = vsub.f32 %v1727_v27, %v1730_v37  ;;  %v1804_v37 = vsel %vm1802_vm5, %v1803_v36, 0  ;;  %vm1797_vm5 = vcmask 72704   ;;  %v5516_v36 = vld [vmem:[%s7216_s9 + $0x1] ss:$0 sm:$0xff] }
 0x43b   : >> { %v1732_v40 = vmul.f32 1.442695, %v1731_v38  ;;  %v7307_v38 = vand.u32 %v6547_v28, %v1804_v37  ;;  %v6548_v28 = vld [vmem:[%s7194_s2 + $0x10] sm:$0xff]   ;;  %v6549_v37 = vld [vmem:[%s7194_s2 + $0x18] sm:$0xff]  }
 0x43d   : >> { %6600 = vpow2.f32 %v1732_v40  ;;  %6017 = vmatpush3.bf16.msra.mxu1 %v7307_v38  ;;  %6065 = vmatpush3.bf16.msra.mxu0 %v7307_v38 }
 0x43e   : >> { %6022 = vmatprep.subr.bf16.mxu1 %v6789_v47  ;;  %6070 = vmatprep.subr.bf16.mxu0 %v6789_v47 }
 0x447   : >> { %v6601_v42 = vpop.eup %6600 }
 0x448   : >> { %v1734_v43 = vsel %vm1583_vm2, %v6601_v42, 0.0 }
 0x449   : >> { %1735 = vadd.xlane.f32.xlu0 %v1734_v43 }
 0x468   : >> { %v7313_v40 = vpop.f32.mrb[20].mxu0 }
 0x4d6   : >> { %v1736_v56 = vpop.xlane.xlu0 %1735 }
 0x4d7   : >> { %6602 = vrcp.f32 %v1736_v56 }
 0x4e1   : >> { %v6603_v59 = vpop.eup %6602 }
 0x4e2   : >> { %v7276_v60 = vmul.f32 %v6603_v59, %v6601_v42  ;;  %v6042_v42 = vpop.f32.mrb[21].mxu0 }
 0x4e3   : >> { %v2026_v43 = vpop.f32.mrb[22].mxu0  ;;  %v2024_v42 = vadd.f32 %v5516_v36, %v7313_v40  ;;  %v6551_v40 = vld [vmem:[%s7157_s29 + $0x28] sm:$0xff]   ;;  %v5544_v36 = vld [vmem:[%s7211_s8 + $0x2] ss:$0 sm:$0xff] }
 0x4e4   : >> { %v1744_v61 = vmul.f32 %v7100_v19, %v7276_v60  ;;  %v1740_v62 = vmul.f32 %v7088_v16, %v7276_v60  ;;  %v1752_v2 = vmul.f32 %v7107_v21, %v7276_v60  ;;  %v1748_v3 = vmul.f32 %v7103_v20, %v7276_v60  ;;  %v6043_v44 = vpop.f32.mrb[23].mxu0 }
 0x4e5   : >> { %v1760_v6 = vmul.f32 %v7113_v23, %v7276_v60  ;;  %v1756_v7 = vmul.f32 %v7110_v22, %v7276_v60  ;;  %v1768_v10 = vmul.f32 %v7119_v25, %v7276_v60  ;;  %v1764_v12 = vmul.f32 %v7116_v24, %v7276_v60  ;;  %v2134_v48 = vpop.f32.mrb[24].mxu0  ;;  %v6550_v44 = vld [vmem:[%s7157_s29 + $0x20] sm:$0xff]  }
 0x4e6   : >> { %v1745_v63 = vsel %vm1583_vm2, %v1744_v61, 0.0  ;;  %v1741_v0 = vsel %vm1583_vm2, %v1740_v62, 0.0  ;;  %v1753_v4 = vsel %vm1583_vm2, %v1752_v2, 0.0  ;;  %v1749_v5 = vsel %vm1583_vm2, %v1748_v3, 0.0  ;;  %v6056_v49 = vpop.f32.mrb[25].mxu0 }
 0x4e7   : >> { %1746 = vadd.xlane.f32.xlu0 %v1745_v63  ;;  %1742 = vadd.xlane.f32.xlu1 %v1741_v0  ;;  %v1761_v8 = vsel %vm1583_vm2, %v1760_v6, 0.0  ;;  %v1757_v9 = vsel %vm1583_vm2, %v1756_v7, 0.0  ;;  %v1769_v13 = vsel %vm1583_vm2, %v1768_v10, 0.0  ;;  %v1765_v14 = vsel %vm1583_vm2, %v1764_v12, 0.0  ;;  %v2137_v50 = vpop.f32.mrb[26].mxu0  ;;  %v6553_v49 = vld [vmem:[%s7162_s26 + $0x28] sm:$0xff]  }
 0x4e8   : >> { %v1772_v15 = vmul.f32 %v7122_v26, %v7276_v60  ;;  %v6057_v52 = vpop.f32.mrb[27].mxu0  ;;  %v1739_v29 = vpack.c.bf16 %v7276_v60, %v7276_v60  ;;  %v2029_v43 = vpack.c.bf16 %v2024_v42, %v2024_v42 }
 0x4ea   : >> { %v1773_v27 = vsel %vm1583_vm2, %v1772_v15, 0.0  ;;  %v2147_v60 = vsel %vm1583_vm2, %v2029_v43, 0 }
 0x4eb   : >> { %1754 = vadd.xlane.f32.xlu0 %v1753_v4  ;;  %1750 = vadd.xlane.f32.xlu1 %v1749_v5  ;;  %v5486_v4 = vld [vmem:[%s7327_s22] ss:$0 sm:$0xff] }
 0x4ec   : >> { %v1572_v6 = vadd.f32 %v5486_v4, %v7227_v11 }
 0x4ee   : >> { %v1577_v12 = vpack.c.bf16 %v1572_v6, %v1572_v6 }
 0x4ef   : >> { %1762 = vadd.xlane.f32.xlu0 %v1761_v8  ;;  %1758 = vadd.xlane.f32.xlu1 %v1757_v9 }
 0x4f0   : >> { %v1852_v11 = vsel %vm1801_vm4, %v1577_v12, 0 }
 0x4f3   : >> { %1770 = vadd.xlane.f32.xlu0 %v1769_v13  ;;  %1766 = vadd.xlane.f32.xlu1 %v1765_v14 }
 0x4f7   : >> { %1774 = vadd.xlane.f32.xlu1 %v1773_v27 }
 0x508   : >> { %2190 = vperm.xlu1 %6511, %v2134_v48  }
 0x509   : >> { %2142 = vperm.xlu0 %6510, %v2134_v48  }
 0x50c   : >> { %6512 = vset.pattern.permute.xlu1 %v6791_v57 }
 0x50d   : >> { %2196 = vperm.xlu1 %6512, %v2134_v48  }
 0x511   : >> { %6513 = vset.pattern.permute.xlu1 %v6793_v30 }
 0x512   : >> { %2202 = vperm.xlu1 %6513, %v2134_v48  }
 0x516   : >> { %6514 = vset.pattern.permute.xlu1 %v6795_v32 }
 0x517   : >> { %2208 = vperm.xlu1 %6514, %v2134_v48  }
 0x51b   : >> { %6515 = vset.pattern.permute.xlu1 %v6796_v33 }
 0x51c   : >> { %2214 = vperm.xlu1 %6515, %v2134_v48  }
 0x520   : >> { %6516 = vset.pattern.permute.xlu1 %v6797_v34 }
 0x521   : >> { %2220 = vperm.xlu1 %6516, %v2134_v48  }
 0x525   : >> { %6517 = vset.pattern.permute.xlu1 %v6799_v41 }
 0x526   : >> { %2226 = vperm.xlu1 %6517, %v2134_v48  }
 0x52a   : >> { %6518 = vset.pattern.permute.xlu1 %v6798_v35 }
 0x52b   : >> { %2232 = vperm.xlu1 %6518, %v2134_v48   ;;  %v6552_v48 = vld [vmem:[%s7162_s26 + $0x20] sm:$0xff]  }
 0x52f   : >> { %6519 = vset.pattern.permute.xlu1 %v6794_v31 }
 0x574   : >> { %v1747_v55 = vpop.xlane.xlu0 %1746  ;;  %v1743_v56 = vpop.xlane.xlu1 %1742 }
 0x575   : >> { %v1777_v59 = vsel %vm1776_vm8, %v1743_v56, %v1747_v55 }
 0x578   : >> { %v1755_v61 = vpop.xlane.xlu0 %1754  ;;  %v1751_v62 = vpop.xlane.xlu1 %1750 }
 0x579   : >> { %v1779_v63 = vsel %vm1778_vm9, %v1777_v59, %v1751_v62 }
 0x57a   : >> { %v1781_v2 = vsel %vm1780_vm10, %v1779_v63, %v1755_v61 }
 0x57c   : >> { %v1763_v0 = vpop.xlane.xlu0 %1762  ;;  %v1759_v3 = vpop.xlane.xlu1 %1758 }
 0x57d   : >> { %v1783_v5 = vsel %vm1782_vm11, %v1781_v2, %v1759_v3 }
 0x57e   : >> { %v1785_v7 = vsel %vm1784_vm12, %v1783_v5, %v1763_v0 }
 0x580   : >> { %v1767_v8 = vpop.xlane.xlu1 %1766  ;;  %v1771_v9 = vpop.xlane.xlu0 %1770 }
 0x581   : >> { %v1787_v10 = vsel %vm1786_vm13, %v1785_v7, %v1767_v8 }
 0x582   : >> { %v1789_v13 = vsel %vm1788_vm14, %v1787_v10, %v1771_v9 }
 0x584   : >> { %v1775_v14 = vpop.xlane.xlu1 %1774 }
 0x585   : >> { %v1790_v15 = vsel %vm1583_vm2, %v1789_v13, %v1775_v14 }
 0x586   : >> { %v1791_v27 = vpack.c.bf16 %v1790_v15, %v1790_v15 }
 0x588   : >> { %6019 = vmatmul.mubr.msk.bf16.vlgmr.msra.gmra.mrb[4].mxu1 %vm1797_vm5, %v1791_v27  ;;  %v2143_v5 = vpop.permute.xlu0 %2142 }
 0x589   : >> { %6023 = vmatpush3.bf16.msra.mxu1 %v1852_v11  ;;  %6024 = vmatprep.mubr.msk.bf16.mxu1 %vm6790_vm15, %v6789_v47  ;;  %v2145_v6 = vmul.f32 %v7088_v16, %v2143_v5 }
 0x58a   : >> { %6044 = vmatprep.subr.bf16.mxu1 %v6789_v47 }
 0x594   : >> { %6025 = vmatmul.mubr.msk.bf16.vlgmr.msra.gmra.mrb[4].mxu1 %vm1583_vm2, %v1739_v29 }
 0x595   : >> { %6045 = vmatpush3.bf16.msra.mxu1 %v6548_v28  ;;  %6048 = vmatprep.mubr.msk.bf16.mxu1 %vm6790_vm15, %v6789_v47 }
 0x596   : >> { %6046 = vmatprep.subr.bf16.mxu1 %v6789_v47 }
 0x599   : >> { %6047 = vmatpush3.bf16.msra.mxu1 %v6549_v37 }
 0x59a   : >> { %6058 = vmatprep.subr.bf16.mxu1 %v6789_v47 }
 0x59c   : >> { %6049 = vmatmul.mubr.msk.bf16.vlgmr.msra.gmra.mrb[8].mxu1 %vm1399_vm3, %v7169_v51 }
 0x59d   : >> { %6060 = vmatprep.mubr.msk.bf16.mxu1 %vm6790_vm15, %v6789_v47 }
 0x5a2   : >> { %6059 = vmatpush3.bf16.xpose.msra.mxu1 %v2147_v60 }
 0x5a3   : >> { %6076 = vmatprep.subr.bf16.mxu1 %v6789_v47 }
 0x5a9   : >> { %6061 = vmatmul.mubr.msk.bf16.vlgmr.msra.gmra.mrb[12].mxu1 %vm1583_vm2, %v7270_v54  ;;  %v2191_v54 = vpop.permute.xlu1 %2190 }
 0x5aa   : >> { %6077 = vmatpush3.bf16.msra.mxu1 %v6550_v44  ;;  %6080 = vmatprep.mubr.msk.bf16.mxu1 %vm6790_vm15, %v6789_v47  ;;  %v2193_v9 = vmul.f32 %v7100_v19, %v2191_v54 }
 0x5ab   : >> { %6078 = vmatprep.subr.bf16.mxu1 %v6789_v47 }
 0x5ad   : >> { %v2197_v50 = vpop.permute.xlu1 %2196 }
 0x5ae   : >> { %6079 = vmatpush3.bf16.msra.mxu1 %v6551_v40  ;;  %v2199_v14 = vmul.f32 %v7103_v20, %v2197_v50 }
 0x5af   : >> { %6084 = vmatprep.subr.bf16.mxu1 %v6789_v47 }
 0x5b1   : >> { %6081 = vmatmul.mubr.msk.bf16.vlgmr.msra.gmra.mrb[16].mxu1 %vm1399_vm3, %v7169_v51  ;;  %v2203_v59 = vpop.permute.xlu1 %2202 }
 0x5b2   : >> { %6088 = vmatprep.mubr.msk.bf16.mxu1 %vm6790_vm15, %v6789_v47  ;;  %6085 = vmatpush3.bf16.msra.mxu1 %v6552_v48  ;;  %v2205_v11 = vmul.f32 %v7107_v21, %v2203_v59 }
 0x5b3   : >> { %6086 = vmatprep.subr.bf16.mxu1 %v6789_v47 }
 0x5b5   : >> { %v2209_v63 = vpop.permute.xlu1 %2208 }
 0x5b6   : >> { %6087 = vmatpush3.bf16.msra.mxu1 %v6553_v49  ;;  %v2211_v37 = vmul.f32 %v7110_v22, %v2209_v63 }
 0x5b7   : >> { %6100 = vmatprep.subr.bf16.mxu1 %v6789_v47 }
 0x5b9   : >> { %6089 = vmatmul.mubr.msk.bf16.vlgmr.msra.gmra.mrb[20].mxu1 %vm1399_vm3, %v7169_v51  ;;  %v2215_v4 = vpop.permute.xlu1 %2214 }
 0x5ba   : >> { %6102 = vmatprep.mubr.msk.bf16.mxu1 %vm6790_vm15, %v6789_v47  ;;  %v2217_v60 = vmul.f32 %v7113_v23, %v2215_v4 }
 0x5bd   : >> { %v2221_v7 = vpop.permute.xlu1 %2220 }
 0x5be   : >> { %v2223_v54 = vmul.f32 %v7116_v24, %v2221_v7 }
 0x5bf   : >> { %6101 = vmatpush3.bf16.xpose.msra.mxu1 %v7173_v53 }
 0x5c0   : >> { %6112 = vmatprep.subr.bf16.mxu1 %v6789_v47 }
 0x5c1   : >> { %v2227_v29 = vpop.permute.xlu1 %2226 }
 0x5c5   : >> { %v2233_v59 = vpop.permute.xlu1 %2232 }
 0x5c6   : >> { %v2235_v63 = vmul.f32 %v7122_v26, %v2233_v59 }
 0x667   : >> { %v7381_v52 = vpop.f32.mrb[4].mxu1 }
 0x668   : >> { %v6026_v55 = vpop.f32.mrb[5].mxu1 }
 0x669   : >> { %v1891_v56 = vpop.f32.mrb[6].mxu1 }
 0x66a   : >> { %v6027_v61 = vpop.f32.mrb[7].mxu1 }
 0x66b   : >> { %v2229_v61 = vmul.f32 %v7119_v25, %v2227_v29 }
 0x66f   : >> { %v7383_v62 = vpop.f32.mrb[8].mxu1 }
 0x670   : >> { %v6050_v0 = vpop.f32.mrb[9].mxu1 }
 0x671   : >> { %v2093_v2 = vpop.f32.mrb[10].mxu1 }
 0x672   : >> { %v6051_v3 = vpop.f32.mrb[11].mxu1 }
 0x67c   : >> { %v2183_v8 = vpop.f32.mrb[12].mxu1 }
 0x67d   : >> { %v2184_v10 = vadd.f32 %v2183_v8, %v2145_v6  ;;  %v6062_v12 = vpop.f32.mrb[13].mxu1 }
 0x67e   : >> { %v2186_v13 = vpop.f32.mrb[14].mxu1 }
 0x67f   : >> { %v2194_v15 = vadd.f32 %v2193_v9, %v2184_v10  ;;  %v6063_v27 = vpop.f32.mrb[15].mxu1 }
 0x681   : >> { %v2200_v28 = vadd.f32 %v2199_v14, %v2194_v15 }
 0x683   : >> { %v2206_v42 = vadd.f32 %v2205_v11, %v2200_v28 }
 0x684   : >> { %v2446_v43 = vpop.f32.mrb[16].mxu1 }
 0x685   : >> { %v2212_v44 = vadd.f32 %v2211_v37, %v2206_v42  ;;  %v2447_v40 = vadd.f32 %v5544_v36, %v2446_v43  ;;  %v6082_v48 = vpop.f32.mrb[17].mxu1 }
 0x686   : >> { %v2449_v49 = vpop.f32.mrb[18].mxu1 }
 0x687   : >> { %v2218_v50 = vadd.f32 %v2217_v60, %v2212_v44  ;;  %v7393_v55 = vpack.c.bf16 %v2447_v40, %v2447_v40  ;;  %v6083_v56 = vpop.f32.mrb[19].mxu1 }
 0x689   : >> { %v2224_v0 = vadd.f32 %v2223_v54, %v2218_v50  ;;  %6103 = vmatmul.mubr.msk.bf16.vlgmr.msra.gmra.mrb[24].mxu1 %vm1583_vm2, %v7393_v55 }
 0x68a   : >> { %6113 = vmatpush3.bf16.msra.mxu1 %v7307_v38  ;;  %6114 = vmatprep.mubr.msk.bf16.mxu1 %vm6790_vm15, %v6789_v47 }
 0x68b   : >> { %v2230_v2 = vadd.f32 %v2229_v61, %v2224_v0  ;;  %6118 = vmatprep.subr.bf16.mxu1 %v6789_v47 }
 0x68c   : >> { %v7407_v12 = vpop.f32.mrb[20].mxu1 }
 0x68d   : >> { %v2236_v3 = vadd.f32 %v2235_v63, %v2230_v2  ;;  %v6090_v13 = vpop.f32.mrb[21].mxu1 }
 0x68e   : >> { %v2516_v14 = vpop.f32.mrb[22].mxu1 }
 0x68f   : >> { %v2237_v4 = vsel %vm7091_vm6, %v2236_v3, -10000.0  ;;  %v6091_v15 = vpop.f32.mrb[23].mxu1 }
 0x690   : >> { %v2238_v5 = vsel %vm1583_vm2, %v2237_v4, -inf }
 0x691   : >> { %2239 = vmax.xlane.f32.xlu0 %v2238_v5 }
 0x71e   : >> { %v2240_v6 = vpop.xlane.xlu0 %2239 }
 0x71f   : >> { %v2241_v7 = vsub.f32 %v2237_v4, %v2240_v6 }
 0x721   : >> { %v2242_v8 = vmul.f32 1.442695, %v2241_v7 }
 0x723   : >> { %6604 = vpow2.f32 %v2242_v8 }
 0x72d   : >> { %v6605_v9 = vpop.eup %6604 }
 0x72e   : >> { %v2244_v10 = vsel %vm1583_vm2, %v6605_v9, 0.0 }
 0x72f   : >> { %2245 = vadd.xlane.f32.xlu1 %v2244_v10 }
 0x75c   : >> { %v2624_v27 = vpop.f32.mrb[24].mxu1 }
 0x75d   : >> { %v6104_v11 = vpop.f32.mrb[25].mxu1 }
 0x75e   : >> { %v2627_v28 = vpop.f32.mrb[26].mxu1 }
 0x75f   : >> { %v6105_v29 = vpop.f32.mrb[27].mxu1  ;;  %v5528_v28 = vld [vmem:[%s7327_s22 + $0x1] ss:$0 sm:$0xff] }
 0x7bc   : >> { %v2246_v36 = vpop.xlane.xlu1 %2245 }
 0x7bd   : >> { %6606 = vrcp.f32 %v2246_v36 }
 0x7c7   : >> { %v6607_v37 = vpop.eup %6606 }
 0x7c8   : >> { %v7409_v42 = vmul.f32 %v6607_v37, %v6605_v9 }
 0x7ca   : >> { %v2258_v43 = vmul.f32 %v7103_v20, %v7409_v42  ;;  %v2250_v60 = vmul.f32 %v7088_v16, %v7409_v42  ;;  %v2266_v48 = vmul.f32 %v7110_v22, %v7409_v42  ;;  %v2254_v49 = vmul.f32 %v7100_v19, %v7409_v42 }
 0x7cb   : >> { %v2274_v56 = vmul.f32 %v7116_v24, %v7409_v42  ;;  %v2262_v59 = vmul.f32 %v7107_v21, %v7409_v42  ;;  %v2282_v63 = vmul.f32 %v7122_v26, %v7409_v42  ;;  %v2270_v2 = vmul.f32 %v7113_v23, %v7409_v42 }
 0x7cc   : >> { %v2259_v44 = vsel %vm1583_vm2, %v2258_v43, 0.0  ;;  %v2251_v40 = vsel %vm1583_vm2, %v2250_v60, 0.0  ;;  %v2267_v54 = vsel %vm1583_vm2, %v2266_v48, 0.0  ;;  %v2255_v50 = vsel %vm1583_vm2, %v2254_v49, 0.0 }
 0x7cd   : >> { %2260 = vadd.xlane.f32.xlu1 %v2259_v44  ;;  %2252 = vadd.xlane.f32.xlu0 %v2251_v40  ;;  %v2275_v61 = vsel %vm1583_vm2, %v2274_v56, 0.0  ;;  %v2263_v0 = vsel %vm1583_vm2, %v2262_v59, 0.0  ;;  %v2283_v3 = vsel %vm1583_vm2, %v2282_v63, 0.0  ;;  %v2271_v4 = vsel %vm1583_vm2, %v2270_v2, 0.0  ;;  %v5556_v56 = vld [vmem:[%s7216_s9 + $0x2] ss:$0 sm:$0xff] }
 0x7ce   : >> { %v2278_v5 = vmul.f32 %v7119_v25, %v7409_v42  ;;  %v6555_v59 = vld [vmem:[%s7194_s2 + $0x28] sm:$0xff]   ;;  %v6557_v63 = vld [vmem:[%s7157_s29 + $0x38] sm:$0xff]  }
 0x7d0   : >> { %v2279_v6 = vsel %vm1583_vm2, %v2278_v5, 0.0 }
 0x7d1   : >> { %2268 = vadd.xlane.f32.xlu1 %v2267_v54  ;;  %2256 = vadd.xlane.f32.xlu0 %v2255_v50  ;;  %v2249_v50 = vpack.c.bf16 %v7409_v42, %v7409_v42 }
 0x7d5   : >> { %2276 = vadd.xlane.f32.xlu1 %v2275_v61  ;;  %2264 = vadd.xlane.f32.xlu0 %v2263_v0  ;;  %v2514_v61 = vadd.f32 %v5556_v56, %v7407_v12  ;;  %v6556_v12 = vld [vmem:[%s7157_s29 + $0x30] sm:$0xff]   ;;  %s8046_s29 = sld [smem:[#allocation17_spill]] }
 0x7d7   : >> { %v2519_v0 = vpack.c.bf16 %v2514_v61, %v2514_v61 }
 0x7d9   : >> { %2284 = vadd.xlane.f32.xlu1 %v2283_v3  ;;  %2272 = vadd.xlane.f32.xlu0 %v2271_v4  ;;  %v2637_v42 = vsel %vm1583_vm2, %v2519_v0, 0 }
 0x7dd   : >> { %2280 = vadd.xlane.f32.xlu0 %v2279_v6 }
 0x7ea   : >> { %2680 = vperm.xlu1 %6519, %v2624_v27  }
 0x7ee   : >> { %6520 = vset.pattern.permute.xlu1 %v6791_v57 }
 0x7ef   : >> { %2686 = vperm.xlu1 %6520, %v2624_v27  }
 0x7f3   : >> { %2632 = vperm.xlu0 %6510, %v2624_v27   ;;  %6522 = vset.pattern.permute.xlu1 %v6795_v32 }
 0x7f4   : >> { %2698 = vperm.xlu1 %6522, %v2624_v27  }
 0x7f7   : >> { %6521 = vset.pattern.permute.xlu0 %v6793_v30 }
 0x7f8   : >> { %6523 = vset.pattern.permute.xlu1 %v6796_v33  ;;  %2692 = vperm.xlu0 %6521, %v2624_v27  }
 0x7f9   : >> { %2704 = vperm.xlu1 %6523, %v2624_v27  }
 0x7fc   : >> { %6524 = vset.pattern.permute.xlu0 %v6797_v34 }
 0x7fd   : >> { %6525 = vset.pattern.permute.xlu1 %v6799_v41  ;;  %2710 = vperm.xlu0 %6524, %v2624_v27  }
 0x7fe   : >> { %2716 = vperm.xlu1 %6525, %v2624_v27  }
 0x801   : >> { %6527 = vset.pattern.permute.xlu0 %v6792_v58 }
 0x802   : >> { %6526 = vset.pattern.permute.xlu1 %v6798_v35 }
 0x803   : >> { %2722 = vperm.xlu1 %6526, %v2624_v27   ;;  %v2091_v27 = vadd.f32 %v5528_v28, %v7383_v62  ;;  %v6554_v62 = vld [vmem:[%s7194_s2 + $0x20] sm:$0xff]  }
 0x805   : >> { %v2096_v60 = vpack.c.bf16 %v2091_v27, %v2091_v27 }
 0x807   : >> { %6528 = vset.pattern.permute.xlu1 %v6794_v31  ;;  %v2342_v54 = vsel %vm1801_vm4, %v2096_v60, 0 }
 0x85a   : >> { %v2261_v7 = vpop.xlane.xlu1 %2260  ;;  %v2253_v8 = vpop.xlane.xlu0 %2252 }
 0x85e   : >> { %v2257_v9 = vpop.xlane.xlu0 %2256  ;;  %v2269_v10 = vpop.xlane.xlu1 %2268 }
 0x85f   : >> { %v2286_v13 = vsel %vm1776_vm8, %v2253_v8, %v2257_v9 }
 0x860   : >> { %v2287_v14 = vsel %vm1778_vm9, %v2286_v13, %v2261_v7 }
 0x862   : >> { %v2265_v15 = vpop.xlane.xlu0 %2264  ;;  %v2277_v29 = vpop.xlane.xlu1 %2276 }
 0x863   : >> { %v2288_v11 = vsel %vm1780_vm10, %v2287_v14, %v2265_v15 }
 0x864   : >> { %v2289_v58 = vsel %vm1782_vm11, %v2288_v11, %v2269_v10 }
 0x866   : >> { %v2273_v36 = vpop.xlane.xlu0 %2272  ;;  %v2285_v44 = vpop.xlane.xlu1 %2284 }
 0x867   : >> { %v2290_v31 = vsel %vm1784_vm12, %v2289_v58, %v2273_v36 }
 0x868   : >> { %v2291_v37 = vsel %vm1786_vm13, %v2290_v31, %v2277_v29 }
 0x86a   : >> { %v2281_v43 = vpop.xlane.xlu0 %2280  ;;  %v2681_v4 = vpop.permute.xlu1 %2680 }
 0x86b   : >> { %v2292_v40 = vsel %vm1788_vm14, %v2291_v37, %v2281_v43  ;;  %v2683_v29 = vmul.f32 %v7100_v19, %v2681_v4 }
 0x86c   : >> { %v2293_v48 = vsel %vm1583_vm2, %v2292_v40, %v2285_v44 }
 0x86d   : >> { %v2294_v49 = vpack.c.bf16 %v2293_v48, %v2293_v48 }
 0x86e   : >> { %v2687_v7 = vpop.permute.xlu1 %2686 }
 0x86f   : >> { %6067 = vmatmul.mubr.msk.bf16.vlgmr.msra.gmra.mrb[28].mxu0 %vm1797_vm5, %v2294_v49  ;;  %v2689_v37 = vmul.f32 %v7103_v20, %v2687_v7  ;;  %v6558_v7 = vld [vmem:[%s7162_s26 + $0x30] sm:$0xff]  }
 0x870   : >> { %6071 = vmatpush3.bf16.msra.mxu0 %v2342_v54  ;;  %6072 = vmatprep.mubr.msk.bf16.mxu0 %vm6790_vm15, %v6789_v47 }
 0x871   : >> { %6092 = vmatprep.subr.bf16.mxu0 %v6789_v47 }
 0x872   : >> { %v2633_v14 = vpop.permute.xlu0 %2632 }
 0x873   : >> { %v2699_v13 = vpop.permute.xlu1 %2698  ;;  %v2635_v15 = vmul.f32 %v7088_v16, %v2633_v14 }
 0x874   : >> { %v2701_v49 = vmul.f32 %v7110_v22, %v2699_v13 }
 0x877   : >> { %v2693_v27 = vpop.permute.xlu0 %2692 }
 0x878   : >> { %v2705_v11 = vpop.permute.xlu1 %2704  ;;  %v2695_v44 = vmul.f32 %v7107_v21, %v2693_v27 }
 0x87b   : >> { %6073 = vmatmul.mubr.msk.bf16.vlgmr.msra.gmra.mrb[28].mxu0 %vm1583_vm2, %v2249_v50  ;;  %v2707_v50 = vmul.f32 %v7113_v23, %v2705_v11  ;;  %v5584_v11 = vld [vmem:[%s7211_s8 + $0x3] ss:$0 sm:$0xff]  ;;  %s8001_s8 = smov 8  }
 0x87c   : >> { %6093 = vmatpush3.bf16.msra.mxu0 %v6554_v62  ;;  %6096 = vmatprep.mubr.msk.bf16.mxu0 %vm6790_vm15, %v6789_v47  ;;  %v2711_v62 = vpop.permute.xlu0 %2710 }
 0x87d   : >> { %6094 = vmatprep.subr.bf16.mxu0 %v6789_v47  ;;  %v2717_v48 = vpop.permute.xlu1 %2716 }
 0x880   : >> { %6095 = vmatpush3.bf16.msra.mxu0 %v6555_v59  ;;  %v2713_v59 = vmul.f32 %v7116_v24, %v2711_v62 }
 0x881   : >> { %6106 = vmatprep.subr.bf16.mxu0 %v6789_v47 }
 0x882   : >> { %v2723_v0 = vpop.permute.xlu1 %2722 }
 0x883   : >> { %6097 = vmatmul.mubr.msk.bf16.vlgmr.msra.gmra.mrb[32].mxu0 %vm1399_vm3, %v7169_v51 }
 0x884   : >> { %6108 = vmatprep.mubr.msk.bf16.mxu0 %vm6790_vm15, %v6789_v47 }
 0x889   : >> { %6107 = vmatpush3.bf16.xpose.msra.mxu0 %v2637_v42  ;;  %v2719_v42 = vmul.f32 %v7119_v25, %v2717_v48 }
 0x88a   : >> { %6124 = vmatprep.subr.bf16.mxu0 %v6789_v47 }
 0x890   : >> { %6109 = vmatmul.mubr.msk.bf16.vlgmr.msra.gmra.mrb[36].mxu0 %vm1583_vm2, %v7393_v55 }
 0x891   : >> { %6128 = vmatprep.mubr.msk.bf16.mxu0 %vm6790_vm15, %v6789_v47  ;;  %6125 = vmatpush3.bf16.msra.mxu0 %v6556_v12 }
 0x892   : >> { %6126 = vmatprep.subr.bf16.mxu0 %v6789_v47 }
 0x895   : >> { %6127 = vmatpush3.bf16.msra.mxu0 %v6557_v63  ;;  %v2725_v63 = vmul.f32 %v7122_v26, %v2723_v0 }
 0x896   : >> { %6132 = vmatprep.subr.bf16.mxu0 %v6789_v47 }
 0x898   : >> { %6129 = vmatmul.mubr.msk.bf16.vlgmr.msra.gmra.mrb[40].mxu0 %vm1399_vm3, %v7169_v51 }
 0x899   : >> { %6136 = vmatprep.mubr.msk.bf16.mxu0 %vm6790_vm15, %v6789_v47  ;;  %6133 = vmatpush3.bf16.msra.mxu0 %v6558_v7 }
 0x89a   : >> { %6134 = vmatprep.subr.bf16.mxu0 %v6789_v47 }
 0x94e   : >> { %v7491_v2 = vpop.f32.mrb[28].mxu0 }
 0x94f   : >> { %v6074_v55 = vpop.f32.mrb[29].mxu0 }
 0x950   : >> { %v2381_v3 = vpop.f32.mrb[30].mxu0 }
 0x951   : >> { %v6075_v5 = vpop.f32.mrb[31].mxu0 }
 0x956   : >> { %v7493_v6 = vpop.f32.mrb[32].mxu0 }
 0x957   : >> { %v6098_v8 = vpop.f32.mrb[33].mxu0 }
 0x958   : >> { %v2583_v9 = vpop.f32.mrb[34].mxu0  ;;  %v6559_v8 = vld [vmem:[%s7162_s26 + $0x38] sm:$0xff]   ;;  %s7656_s26 = sshll.u32 %s6744_s15, 4 }
 0x959   : >> { %v6099_v10 = vpop.f32.mrb[35].mxu0  ;;  %6135 = vmatpush3.bf16.msra.mxu0 %v6559_v8 }
 0x95a   : >> { %6148 = vmatprep.subr.bf16.mxu0 %v6789_v47 }
 0x95c   : >> { %6137 = vmatmul.mubr.msk.bf16.vlgmr.msra.gmra.mrb[44].mxu0 %vm1399_vm3, %v7169_v51 }
 0x95d   : >> { %6150 = vmatprep.mubr.msk.bf16.mxu0 %vm6790_vm15, %v6789_v47 }
 0x962   : >> { %6149 = vmatpush3.bf16.xpose.msra.mxu0 %v7173_v53 }
 0x963   : >> { %v2673_v28 = vpop.f32.mrb[36].mxu0  ;;  %6160 = vmatprep.subr.bf16.mxu0 %v6789_v47 }
 0x964   : >> { %v2674_v58 = vadd.f32 %v2673_v28, %v2635_v15  ;;  %v6110_v36 = vpop.f32.mrb[37].mxu0 }
 0x965   : >> { %v2676_v31 = vpop.f32.mrb[38].mxu0 }
 0x966   : >> { %v2684_v43 = vadd.f32 %v2683_v29, %v2674_v58  ;;  %v6111_v60 = vpop.f32.mrb[39].mxu0 }
 0x968   : >> { %v2690_v40 = vadd.f32 %v2689_v37, %v2684_v43 }
 0x96a   : >> { %v2696_v54 = vadd.f32 %v2695_v44, %v2690_v40 }
 0x96b   : >> { %v2936_v28 = vpop.f32.mrb[40].mxu0 }
 0x96c   : >> { %v2702_v56 = vadd.f32 %v2701_v49, %v2696_v54  ;;  %v2937_v29 = vadd.f32 %v5584_v11, %v2936_v28  ;;  %v6130_v58 = vpop.f32.mrb[41].mxu0 }
 0x96d   : >> { %v2939_v36 = vpop.f32.mrb[42].mxu0  ;;  %v5568_v58 = vld [vmem:[%s7327_s22 + $0x2] ss:$0 sm:$0xff] }
 0x96e   : >> { %v2708_v61 = vadd.f32 %v2707_v50, %v2702_v56  ;;  %v7519_v27 = vpack.c.bf16 %v2937_v29, %v2937_v29  ;;  %v6131_v31 = vpop.f32.mrb[43].mxu0 }
 0x970   : >> { %v2714_v12 = vadd.f32 %v2713_v59, %v2708_v61  ;;  %6151 = vmatmul.mubr.msk.bf16.vlgmr.msra.gmra.mrb[48].mxu0 %vm1583_vm2, %v7519_v27 }
 0x971   : >> { %6161 = vmatpush3.bf16.msra.mxu0 %v7307_v38  ;;  %6162 = vmatprep.mubr.msk.bf16.mxu0 %vm6790_vm15, %v6789_v47 }
 0x972   : >> { %v2720_v55 = vadd.f32 %v2719_v42, %v2714_v12  ;;  %6166 = vmatprep.subr.bf16.mxu0 %v6789_v47 }
 0x974   : >> { %v2726_v3 = vadd.f32 %v2725_v63, %v2720_v55 }
 0x976   : >> { %v2727_v4 = vsel %vm7091_vm6, %v2726_v3, -10000.0 }
 0x977   : >> { %v2728_v5 = vsel %vm1583_vm2, %v2727_v4, -inf }
 0x978   : >> { %2729 = vmax.xlane.f32.xlu0 %v2728_v5 }
 0xa05   : >> { %v2730_v9 = vpop.xlane.xlu0 %2729 }
 0xa06   : >> { %v2731_v10 = vsub.f32 %v2727_v4, %v2730_v9 }
 0xa08   : >> { %v2732_v13 = vmul.f32 1.442695, %v2731_v10 }
 0xa0a   : >> { %6608 = vpow2.f32 %v2732_v13 }
 0xa14   : >> { %v6609_v14 = vpop.eup %6608 }
 0xa15   : >> { %v2734_v15 = vsel %vm1583_vm2, %v6609_v14, 0.0 }
 0xa16   : >> { %2735 = vadd.xlane.f32.xlu1 %v2734_v15 }
 0xa2f   : >> { %v3003_v4 = vpop.f32.mrb[44].mxu0 }
 0xa30   : >> { %v6138_v5 = vpop.f32.mrb[45].mxu0 }
 0xa31   : >> { %v3006_v7 = vpop.f32.mrb[46].mxu0 }
 0xa32   : >> { %v6139_v8 = vpop.f32.mrb[47].mxu0 }
 0xa43   : >> { %v3114_v9 = vpop.f32.mrb[48].mxu0 }
 0xa44   : >> { %v6152_v10 = vpop.f32.mrb[49].mxu0 }
 0xa45   : >> { %v3117_v13 = vpop.f32.mrb[50].mxu0 }
 0xaa3   : >> { %v2736_v53 = vpop.xlane.xlu1 %2735 }
 0xaa4   : >> { %6610 = vrcp.f32 %v2736_v53 }
 0xaae   : >> { %v6611_v37 = vpop.eup %6610 }
 0xaaf   : >> { %v7527_v43 = vmul.f32 %v6611_v37, %v6609_v14  ;;  %v6153_v14 = vpop.f32.mrb[51].mxu0 }
 0xab1   : >> { %v2748_v60 = vmul.f32 %v7103_v20, %v7527_v43  ;;  %v2740_v44 = vmul.f32 %v7088_v16, %v7527_v43  ;;  %v2756_v48 = vmul.f32 %v7110_v22, %v7527_v43  ;;  %v2744_v49 = vmul.f32 %v7100_v19, %v7527_v43 }
 0xab2   : >> { %v2764_v50 = vmul.f32 %v7116_v24, %v7527_v43  ;;  %v2752_v56 = vmul.f32 %v7107_v21, %v7527_v43  ;;  %v2772_v0 = vmul.f32 %v7122_v26, %v7527_v43  ;;  %v2760_v42 = vmul.f32 %v7113_v23, %v7527_v43 }
 0xab3   : >> { %v2749_v40 = vsel %vm1583_vm2, %v2748_v60, 0.0  ;;  %v2741_v38 = vsel %vm1583_vm2, %v2740_v44, 0.0  ;;  %v2757_v54 = vsel %vm1583_vm2, %v2756_v48, 0.0  ;;  %v2745_v62 = vsel %vm1583_vm2, %v2744_v49, 0.0 }
 0xab4   : >> { %2750 = vadd.xlane.f32.xlu1 %v2749_v40  ;;  %2742 = vadd.xlane.f32.xlu0 %v2741_v38  ;;  %v2765_v59 = vsel %vm1583_vm2, %v2764_v50, 0.0  ;;  %v2753_v61 = vsel %vm1583_vm2, %v2752_v56, 0.0  ;;  %v2773_v12 = vsel %vm1583_vm2, %v2772_v0, 0.0  ;;  %v2761_v63 = vsel %vm1583_vm2, %v2760_v42, 0.0  ;;  %v6561_v50 = vld [vmem:[%s7194_s2 + $0x38] sm:$0xff]  }
 0xab5   : >> { %v2768_v55 = vmul.f32 %v7119_v25, %v7527_v43 }
 0xab7   : >> { %v2769_v3 = vsel %vm1583_vm2, %v2768_v55, 0.0 }
 0xab8   : >> { %2758 = vadd.xlane.f32.xlu1 %v2757_v54  ;;  %2746 = vadd.xlane.f32.xlu0 %v2745_v62  ;;  %v2739_v54 = vpack.c.bf16 %v7527_v43, %v7527_v43  ;;  %v5596_v62 = vld [vmem:[%s7216_s9 + $0x3] ss:$0 sm:$0xff]  ;;  %s8000_s9 = smov 16  }
 0xab9   : >> { %v3004_v56 = vadd.f32 %v5596_v62, %v3003_v4 }
 0xabc   : >> { %2766 = vadd.xlane.f32.xlu1 %v2765_v59  ;;  %2754 = vadd.xlane.f32.xlu0 %v2753_v61  ;;  %v3009_v59 = vpack.c.bf16 %v3004_v56, %v3004_v56 }
 0xabe   : >> { %v3127_v43 = vsel %vm1583_vm2, %v3009_v59, 0 }
 0xac0   : >> { %2774 = vadd.xlane.f32.xlu1 %v2773_v12  ;;  %2762 = vadd.xlane.f32.xlu0 %v2761_v63 }
 0xac4   : >> { %2770 = vadd.xlane.f32.xlu0 %v2769_v3 }
 0xad1   : >> { %3170 = vperm.xlu1 %6528, %v3114_v9  }
 0xad5   : >> { %6529 = vset.pattern.permute.xlu1 %v6791_v57 }
 0xad6   : >> { %3176 = vperm.xlu1 %6529, %v3114_v9  }
 0xada   : >> { %3122 = vperm.xlu0 %6527, %v3114_v9   ;;  %6530 = vset.pattern.permute.xlu1 %v6793_v30 }
 0xadb   : >> { %3182 = vperm.xlu1 %6530, %v3114_v9  }
 0xade   : >> { %6535 = vset.pattern.permute.xlu0 %v6798_v35 }
 0xadf   : >> { %3212 = vperm.xlu0 %6535, %v3114_v9   ;;  %6531 = vset.pattern.permute.xlu1 %v6795_v32 }
 0xae0   : >> { %3188 = vperm.xlu1 %6531, %v3114_v9  }
 0xae4   : >> { %6532 = vset.pattern.permute.xlu1 %v6796_v33 }
 0xae5   : >> { %3194 = vperm.xlu1 %6532, %v3114_v9  }
 0xae9   : >> { %6533 = vset.pattern.permute.xlu1 %v6797_v34 }
 0xaea   : >> { %3200 = vperm.xlu1 %6533, %v3114_v9  }
 0xaee   : >> { %6534 = vset.pattern.permute.xlu1 %v6799_v41  ;;  %v2581_v41 = vadd.f32 %v5568_v58, %v7493_v6  ;;  %v6560_v6 = vld [vmem:[%s7194_s2 + $0x30] sm:$0xff]   ;;  %s3382_s2 = scalar_lea.vmem %s8046_s29, %s7656_s26  ;;  %s3387_s29 = scalar_lea.vmem %s8047_s3, %s6744_s15 }
 0xaef   : >> { %3206 = vperm.xlu1 %6534, %v3114_v9  }
 0xaf0   : >> { %v2586_v60 = vpack.c.bf16 %v2581_v41, %v2581_v41 }
 0xaf2   : >> { %v2832_v49 = vsel %vm1801_vm4, %v2586_v60, 0 }
 0xb41   : >> { %v2751_v57 = vpop.xlane.xlu1 %2750  ;;  %v2743_v35 = vpop.xlane.xlu0 %2742 }
 0xb45   : >> { %v2747_v15 = vpop.xlane.xlu0 %2746  ;;  %v2759_v11 = vpop.xlane.xlu1 %2758 }
 0xb46   : >> { %v2776_v30 = vsel %vm1776_vm8, %v2743_v35, %v2747_v15 }
 0xb47   : >> { %v2777_v28 = vsel %vm1778_vm9, %v2776_v30, %v2751_v57 }
 0xb49   : >> { %v2755_v32 = vpop.xlane.xlu0 %2754  ;;  %v2767_v33 = vpop.xlane.xlu1 %2766 }
 0xb4a   : >> { %v2778_v29 = vsel %vm1780_vm10, %v2777_v28, %v2755_v32 }
 0xb4b   : >> { %v2779_v36 = vsel %vm1782_vm11, %v2778_v29, %v2759_v11 }
 0xb4d   : >> { %v2763_v34 = vpop.xlane.xlu0 %2762  ;;  %v2775_v44 = vpop.xlane.xlu1 %2774 }
 0xb4e   : >> { %v2780_v31 = vsel %vm1784_vm12, %v2779_v36, %v2763_v34 }
 0xb4f   : >> { %v2781_v53 = vsel %vm1786_vm13, %v2780_v31, %v2767_v33 }
 0xb51   : >> { %v2771_v37 = vpop.xlane.xlu0 %2770  ;;  %v3171_v61 = vpop.permute.xlu1 %3170 }
 0xb52   : >> { %v2782_v40 = vsel %vm1788_vm14, %v2781_v53, %v2771_v37  ;;  %v3173_v14 = vmul.f32 %v7100_v19, %v3171_v61 }
 0xb53   : >> { %v2783_v38 = vsel %vm1583_vm2, %v2782_v40, %v2775_v44 }
 0xb54   : >> { %v2784_v48 = vpack.c.bf16 %v2783_v38, %v2783_v38 }
 0xb55   : >> { %v3177_v42 = vpop.permute.xlu1 %3176 }
 0xb56   : >> { %6115 = vmatmul.mubr.msk.bf16.vlgmr.msra.gmra.mrb[28].mxu1 %vm1797_vm5, %v2784_v48  ;;  %v3179_v11 = vmul.f32 %v7103_v20, %v3177_v42 }
 0xb57   : >> { %6119 = vmatpush3.bf16.msra.mxu1 %v2832_v49  ;;  %6120 = vmatprep.mubr.msk.bf16.mxu1 %vm6790_vm15, %v6789_v47 }
 0xb58   : >> { %6140 = vmatprep.subr.bf16.mxu1 %v6789_v47 }
 0xb59   : >> { %v3123_v10 = vpop.permute.xlu0 %3122 }
 0xb5a   : >> { %v3183_v55 = vpop.permute.xlu1 %3182 }
 0xb5b   : >> { %v3185_v29 = vmul.f32 %v7107_v21, %v3183_v55 }
 0xb5e   : >> { %v3213_v60 = vpop.permute.xlu0 %3212 }
 0xb5f   : >> { %v3189_v8 = vpop.permute.xlu1 %3188  ;;  %v3215_v38 = vmul.f32 %v7122_v26, %v3213_v60 }
 0xb60   : >> { %v3191_v33 = vmul.f32 %v7110_v22, %v3189_v8 }
 0xb62   : >> { %6121 = vmatmul.mubr.msk.bf16.vlgmr.msra.gmra.mrb[28].mxu1 %vm1583_vm2, %v2739_v54 }
 0xb63   : >> { %6141 = vmatpush3.bf16.msra.mxu1 %v6560_v6  ;;  %6144 = vmatprep.mubr.msk.bf16.mxu1 %vm6790_vm15, %v6789_v47 }
 0xb64   : >> { %6142 = vmatprep.subr.bf16.mxu1 %v6789_v47  ;;  %v3195_v9 = vpop.permute.xlu1 %3194 }
 0xb65   : >> { %v3197_v34 = vmul.f32 %v7113_v23, %v3195_v9 }
 0xb67   : >> { %6143 = vmatpush3.bf16.msra.mxu1 %v6561_v50 }
 0xb68   : >> { %6154 = vmatprep.subr.bf16.mxu1 %v6789_v47 }
 0xb69   : >> { %v3201_v32 = vpop.permute.xlu1 %3200 }
 0xb6a   : >> { %6145 = vmatmul.mubr.msk.bf16.vlgmr.msra.gmra.mrb[32].mxu1 %vm1399_vm3, %v7169_v51  ;;  %v3203_v53 = vmul.f32 %v7116_v24, %v3201_v32 }
 0xb6b   : >> { %6156 = vmatprep.mubr.msk.bf16.mxu1 %vm6790_vm15, %v6789_v47 }
 0xb6e   : >> { %v3207_v31 = vpop.permute.xlu1 %3206 }
 0xb6f   : >> { %v3209_v44 = vmul.f32 %v7119_v25, %v3207_v31 }
 0xb70   : >> { %6155 = vmatpush3.bf16.xpose.msra.mxu1 %v3127_v43 }
 0xb71   : >> { %6172 = vmatprep.subr.bf16.mxu1 %v6789_v47 }
 0xb77   : >> { %6157 = vmatmul.mubr.msk.bf16.vlgmr.msra.gmra.mrb[36].mxu1 %vm1583_vm2, %v7519_v27  ;;  %v3125_v27 = vmul.f32 %v7088_v16, %v3123_v10 }
 0xb78   : >> { %6176 = vmatprep.mubr.msk.bf16.mxu1 %vm6790_vm15, %v6789_v47 }
 0xc35   : >> { %v7598_v0 = vpop.f32.mrb[28].mxu1 }
 0xc36   : >> { %v6122_v12 = vpop.f32.mrb[29].mxu1 }
 0xc37   : >> { %v2871_v51 = vpop.f32.mrb[30].mxu1 }
 0xc38   : >> { %v6123_v63 = vpop.f32.mrb[31].mxu1 }
 0xc3d   : >> { %v7600_v3 = vpop.f32.mrb[32].mxu1 }
 0xc3e   : >> { %v6146_v4 = vpop.f32.mrb[33].mxu1 }
 0xc3f   : >> { %v3073_v5 = vpop.f32.mrb[34].mxu1 }
 0xc40   : >> { %v6147_v7 = vpop.f32.mrb[35].mxu1 }
 0xc4a   : >> { %v3163_v13 = vpop.f32.mrb[36].mxu1 }
 0xc4b   : >> { %v3164_v57 = vadd.f32 %v3163_v13, %v3125_v27  ;;  %v6158_v35 = vpop.f32.mrb[37].mxu1 }
 0xc4c   : >> { %v3166_v15 = vpop.f32.mrb[38].mxu1 }
 0xc4d   : >> { %v3174_v30 = vadd.f32 %v3173_v14, %v3164_v57  ;;  %v6159_v28 = vpop.f32.mrb[39].mxu1 }
 0xc4f   : >> { %v3180_v58 = vadd.f32 %v3179_v11, %v3174_v30 }
 0xc51   : >> { %v3186_v36 = vadd.f32 %v3185_v29, %v3180_v58 }
 0xc53   : >> { %v3192_v41 = vadd.f32 %v3191_v33, %v3186_v36 }
 0xc55   : >> { %v3198_v37 = vadd.f32 %v3197_v34, %v3192_v41 }
 0xc57   : >> { %v3204_v40 = vadd.f32 %v3203_v53, %v3198_v37  ;;  %v5608_v37 = vld [vmem:[%s7327_s22 + $0x3] ss:$0 sm:$0xff]  ;;  %s7999_s22 = smov 24  }
 0xc59   : >> { %v3210_v48 = vadd.f32 %v3209_v44, %v3204_v40 }
 0xc5b   : >> { %v3216_v49 = vadd.f32 %v3215_v38, %v3210_v48 }
 0xc5d   : >> { %v3217_v6 = vsel %vm7091_vm6, %v3216_v49, -10000.0 }
 0xc5e   : >> { %v3218_v54 = vsel %vm1583_vm2, %v3217_v6, -inf }
 0xc5f   : >> { %3219 = vmax.xlane.f32.xlu1 %v3218_v54 }
 0xcec   : >> { %v3220_v62 = vpop.xlane.xlu1 %3219 }
 0xced   : >> { %v3221_v50 = vsub.f32 %v3217_v6, %v3220_v62 }
 0xcef   : >> { %v3222_v56 = vmul.f32 1.442695, %v3221_v50 }
 0xcf1   : >> { %6612 = vpow2.f32 %v3222_v56  ;;  %v6562_v56 = vld [vmem:[%s3382_s2] sm:$0xff]  }
 0xcf2   : >> { %6173 = vmatpush3.bf16.msra.mxu1 %v6562_v56 }
 0xcf3   : >> { %6174 = vmatprep.subr.bf16.mxu1 %v6789_v47 }
 0xcfb   : >> { %v6613_v59 = vpop.eup %6612 }
 0xcfc   : >> { %v3224_v43 = vsel %vm1583_vm2, %v6613_v59, 0.0 }
 0xcfd   : >> { %3225 = vadd.xlane.f32.xlu0 %v3224_v43 }
 0xd8a   : >> { %v3226_v61 = vpop.xlane.xlu0 %3225 }
 0xd8b   : >> { %6614 = vrcp.f32 %v3226_v61 }
 0xd95   : >> { %v6615_v42 = vpop.eup %6614 }
 0xd96   : >> { %v3228_v12 = vmul.f32 %v6615_v42, %v6613_v59  ;;  %v6563_v59 = vld [vmem:[%s3382_s2 + $0x8] sm:$0xff]   ;;  %s8048_s2 = sld [smem:[#allocation24_spill]] }
 0xd97   : >> { %6175 = vmatpush3.bf16.msra.mxu1 %v6563_v59 }
 0xd98   : >> { %v3234_v51 = vmul.f32 %v7100_v19, %v3228_v12  ;;  %v3230_v63 = vmul.f32 %v7088_v16, %v3228_v12  ;;  %v3242_v5 = vmul.f32 %v7107_v21, %v3228_v12  ;;  %v3238_v7 = vmul.f32 %v7103_v20, %v3228_v12  ;;  %6180 = vmatprep.subr.bf16.mxu1 %v6789_v47 }
 0xd99   : >> { %v3250_v10 = vmul.f32 %v7113_v23, %v3228_v12  ;;  %v3246_v27 = vmul.f32 %v7110_v22, %v3228_v12  ;;  %v3258_v57 = vmul.f32 %v7119_v25, %v3228_v12  ;;  %v3254_v35 = vmul.f32 %v7116_v24, %v3228_v12 }
 0xd9a   : >> { %v3235_v55 = vsel %vm1583_vm2, %v3234_v51, 0.0  ;;  %v3231_v4 = vsel %vm1583_vm2, %v3230_v63, 0.0  ;;  %v3243_v8 = vsel %vm1583_vm2, %v3242_v5, 0.0  ;;  %v3239_v9 = vsel %vm1583_vm2, %v3238_v7, 0.0 }
 0xd9b   : >> { %3236 = vadd.xlane.f32.xlu0 %v3235_v55  ;;  %3232 = vadd.xlane.f32.xlu1 %v3231_v4  ;;  %v3251_v13 = vsel %vm1583_vm2, %v3250_v10, 0.0  ;;  %v3247_v14 = vsel %vm1583_vm2, %v3246_v27, 0.0  ;;  %v3259_v15 = vsel %vm1583_vm2, %v3258_v57, 0.0  ;;  %v3255_v11 = vsel %vm1583_vm2, %v3254_v35, 0.0 }
 0xd9c   : >> { %v3262_v30 = vmul.f32 %v7122_v26, %v3228_v12  ;;  %s7677_s3 = scalar_lea.vmem %s8048_s2, %s7149_s6 }
 0xd9e   : >> { %v3263_v28 = vsel %vm1583_vm2, %v3262_v30, 0.0 }
 0xd9f   : >> { %3244 = vadd.xlane.f32.xlu0 %v3243_v8  ;;  %3240 = vadd.xlane.f32.xlu1 %v3239_v9  ;;  %v5617_v9 = vld [vmem:[%s3387_s29] ss:$0 sm:$0xff]  ;;  %s8050_s29 = sld [smem:[#allocation20_spill]] }
 0xda3   : >> { %3252 = vadd.xlane.f32.xlu0 %v3251_v13  ;;  %3248 = vadd.xlane.f32.xlu1 %v3247_v14 }
 0xda5   : >> { %s3451_s13 = scalar_lea.vmem %s8050_s29, %s6744_s15  ;;  %s8055_s29 = sld [smem:[#allocation27_spill]] }
 0xda7   : >> { %3260 = vadd.xlane.f32.xlu0 %v3259_v15  ;;  %3256 = vadd.xlane.f32.xlu1 %v3255_v11 }
 0xdab   : >> { %3264 = vadd.xlane.f32.xlu1 %v3263_v28 }
 0xdbc   : >> { %3369 = vrot.lane.b32.xlu1 %v7598_v0, %s8000_s9  ;;  %v3071_v0 = vadd.f32 %v5608_v37, %v7600_v3  ;;  %v3229_v3 = vpack.c.bf16 %v3228_v12, %v3228_v12  ;;  %s8051_s9 = sld [smem:[#allocation21_spill]] }
 0xdbd   : >> { %3365 = vrot.lane.b32.xlu0 %v7491_v2, %s8001_s8  ;;  %s8052_s8 = sld [smem:[#allocation25_spill]] }
 0xdbe   : >> { %v3076_v48 = vpack.c.bf16 %v3071_v0, %v3071_v0 }
 0xdc0   : >> { %v3322_v50 = vsel %vm1801_vm4, %v3076_v48, 0  ;;  %vm3378_vm4 = vcmask 195584  }
 0xdc2   : >> { %s3453_s14 = scalar_lea.vmem %s8051_s9, %s6744_s15 }
 0xdc3   : >> { %s7711_s9 = scalar_lea.vmem %s8052_s8, %s7207_s4 }
 0xe28   : >> { %v3237_v32 = vpop.xlane.xlu0 %3236  ;;  %v3233_v29 = vpop.xlane.xlu1 %3232 }
 0xe29   : >> { %v3266_v58 = vsel %vm1776_vm8, %v3233_v29, %v3237_v32  ;;  %v6564_v29 = vld [vmem:[%s7677_s3] sm:$0xff]   ;;  %vm3740_vm8 = vcmask 97280  }
 0xe2c   : >> { %v3245_v33 = vpop.xlane.xlu0 %3244  ;;  %v3241_v36 = vpop.xlane.xlu1 %3240 }
 0xe2d   : >> { %v3267_v34 = vsel %vm1778_vm9, %v3266_v58, %v3241_v36  ;;  %vm3756_vm9 = vcmask 1045504  }
 0xe2e   : >> { %v3268_v31 = vsel %vm1780_vm10, %v3267_v34, %v3245_v33 }
 0xe30   : >> { %v3253_v41 = vpop.xlane.xlu0 %3252  ;;  %v3249_v53 = vpop.xlane.xlu1 %3248 }
 0xe31   : >> { %v3269_v60 = vsel %vm1782_vm11, %v3268_v31, %v3249_v53  ;;  %v5621_v53 = vld [vmem:[%s3451_s13] ss:$0 sm:$0xff] }
 0xe32   : >> { %v3270_v44 = vsel %vm1784_vm12, %v3269_v60, %v3253_v41  ;;  %v5622_v60 = vld [vmem:[%s3453_s14] ss:$0 sm:$0xff]  ;;  %s8054_s14 = sld [smem:[#allocation26_spill]] }
 0xe34   : >> { %v3257_v2 = vpop.xlane.xlu1 %3256  ;;  %v3261_v40 = vpop.xlane.xlu0 %3260 }
 0xe35   : >> { %v3271_v38 = vsel %vm1786_vm13, %v3270_v44, %v3257_v2 }
 0xe36   : >> { %v3272_v49 = vsel %vm1788_vm14, %v3271_v38, %v3261_v40  ;;  %v5629_v40 = vld [vmem:[%s7711_s9] ss:$0 sm:$0xff] }
 0xe38   : >> { %v3265_v6 = vpop.xlane.xlu1 %3264  ;;  %v3366_v51 = vpop.permute.xlu0 %3365  ;;  %s7734_s8 = scalar_lea.vmem %s8054_s14, %s7149_s6  ;;  %s8060_s14 = smov 24  }
 0xe39   : >> { %v3273_v54 = vsel %vm1583_vm2, %v3272_v49, %v3265_v6  ;;  %v3376_v55 = vsel %vm1583_vm2, %v7381_v52, %v3366_v51 }
 0xe3a   : >> { %v3274_v62 = vpack.c.bf16 %v3273_v54, %v3273_v54 }
 0xe3c   : >> { %6163 = vmatmul.mubr.msk.bf16.vlgmr.msra.gmra.mrb[52].mxu0 %vm1797_vm5, %v3274_v62  ;;  %v3370_v63 = vpop.permute.xlu1 %3369 }
 0xe3d   : >> { %6167 = vmatpush3.bf16.msra.mxu0 %v3322_v50  ;;  %6168 = vmatprep.mubr.msk.bf16.mxu0 %vm6790_vm15, %v6789_v47  ;;  %v3377_v4 = vsel %vm1223_vm1, %v3376_v55, %v3370_v63 }
 0xe3e   : >> { %6188 = vmatprep.subr.bf16.mxu0 %v6789_v47 }
 0xe48   : >> { %6169 = vmatmul.mubr.msk.bf16.vlgmr.msra.gmra.mrb[52].mxu0 %vm1583_vm2, %v3229_v3 }
 0xe49   : >> { %6192 = vmatprep.mubr.msk.bf16.mxu0 %vm6790_vm15, %v6789_v47  ;;  %6189 = vmatpush3.bf16.msra.mxu0 %v6564_v29 }
 0xe4a   : >> { %6190 = vmatprep.subr.bf16.mxu0 %v6789_v47 }
 0xf1b   : >> { %v3358_v43 = vpop.f32.mrb[52].mxu0 }
 0xf1c   : >> { %3373 = vrot.lane.b32.xlu1 %v3358_v43, %s7999_s22  ;;  %v6170_v61 = vpop.f32.mrb[53].mxu0  ;;  %s8049_s22 = sld [smem:[#allocation22_spill]] }
 0xf1d   : >> { %v3361_v42 = vpop.f32.mrb[54].mxu0 }
 0xf1e   : >> { %v6171_v12 = vpop.f32.mrb[55].mxu0 }
 0xf22   : >> { %s7689_s2 = scalar_lea.vmem %s8049_s22, %s7149_s6  ;;  %s8053_s22 = sld [smem:[#allocation23_spill]] }
 0xf23   : >> { %v6566_v58 = vld [vmem:[%s7689_s2] sm:$0xff]   ;;  %v6567_v33 = vld [vmem:[%s7689_s2 + $0x8] sm:$0xff]   ;;  %v6568_v12 = vld [vmem:[%s7689_s2 + $0x10] sm:$0xff]  }
 0xf24   : >> { %v6569_v55 = vld [vmem:[%s7689_s2 + $0x18] sm:$0xff]  }
 0xf28   : >> { %s7718_s13 = scalar_lea.vmem %s8053_s22, %s7207_s4  ;;  %s7749_s22 = scalar_lea.vmem %s8055_s29, %s7207_s4 }
 0xf29   : >> { %v5624_v56 = vld [vmem:[%s7718_s13] ss:$0 sm:$0xff]  ;;  %s8056_s4 = smov 8   ;;  %s8061_s29 = sld [smem:[#allocation32_spill]] }
 0xf8e   : >> { %v3374_v5 = vpop.permute.xlu1 %3373 }
 0xf8f   : >> { %v3379_v7 = vsel %vm3378_vm4, %v3377_v4, %v3374_v5  ;;  %v6570_v4 = vld [vmem:[%s7734_s8] sm:$0xff]   ;;  %v6571_v5 = vld [vmem:[%s7734_s8 + $0x8] sm:$0xff]  }
 0xf90   : >> { %v3380_v8 = vpack.c.bf16 %v3379_v7, %v3379_v7 }
 0xf92   : >> { %6177 = vmatmul.mubr.msk.bf16.vlgmr.msra.gmra.mrb[40].mxu1 %vm1399_vm3, %v3380_v8 }
 0xf93   : >> { %6184 = vmatprep.mubr.msk.bf16.mxu1 %vm6790_vm15, %v6789_v47  ;;  %6181 = vmatpush3.bf16.msra.mxu1 %v6566_v58 }
 0xf94   : >> { %6182 = vmatprep.subr.bf16.mxu1 %v6789_v47 }
 0xf97   : >> { %6183 = vmatpush3.bf16.msra.mxu1 %v6567_v33 }
 0xf98   : >> { %6196 = vmatprep.subr.bf16.mxu1 %v6789_v47 }
0x1065   : >> { %v3444_v10 = vpop.f32.mrb[40].mxu1 }
0x1066   : >> { %v3445_v27 = vadd.f32 %v5617_v9, %v3444_v10  ;;  %v6178_v13 = vpop.f32.mrb[41].mxu1 }
0x1067   : >> { %v3447_v14 = vpop.f32.mrb[42].mxu1 }
0x1068   : >> { %v6179_v52 = vpop.f32.mrb[43].mxu1  ;;  %v3450_v57 = vadd.f32 %v6740_v45, %v3445_v27  ;;  %v6565_v45 = vld [vmem:[%s7677_s3 + $0x8] sm:$0xff]  }
0x1069   : >> { %6191 = vmatpush3.bf16.msra.mxu0 %v6565_v45 }
0x106a   : >> { %v3455_v35 = vsel %vm1399_vm3, %v3450_v57, 0.0  ;;  %6204 = vmatprep.subr.bf16.mxu0 %v6789_v47 }
0x106b   : >> { %3456 = vadd.xlane.f32.xlu0 %v3455_v35 }
0x106c   : >> { %6193 = vmatmul.mubr.msk.bf16.vlgmr.msra.gmra.mrb[56].mxu0 %vm1399_vm3, %v7132_v46 }
0x106d   : >> { %6206 = vmatprep.mubr.msk.bf16.mxu0 %vm6790_vm15, %v6789_v47 }
0x10f8   : >> { %v3457_v15 = vpop.xlane.xlu0 %3456 }
0x10f9   : >> { %v3459_v11 = vmul.f32 0.03125, %v3457_v15  ;;  %v5634_v15 = vld [vmem:[%s7749_s22] ss:$0 sm:$0xff] }
0x10fb   : >> { %v3460_v30 = vsub.f32 %v3450_v57, %v3459_v11 }
0x10fd   : >> { %v3461_v28 = vmul.f32 %v3460_v30, %v3460_v30 }
0x10ff   : >> { %v3462_v32 = vsel %vm1399_vm3, %v3461_v28, 0.0 }
0x1100   : >> { %3463 = vadd.xlane.f32.xlu1 %v3462_v32 }
0x113f   : >> { %v3617_v38 = vpop.f32.mrb[56].mxu0 }
0x1140   : >> { %v3618_v48 = vadd.f32 %v5629_v40, %v3617_v38  ;;  %v6194_v49 = vpop.f32.mrb[57].mxu0 }
0x1141   : >> { %v3620_v6 = vpop.f32.mrb[58].mxu0 }
0x1142   : >> { %v3621_v54 = vadd.f32 %v5629_v40, %v3620_v6  ;;  %v6195_v62 = vpop.f32.mrb[59].mxu0  ;;  %v6572_v40 = vld [vmem:[%s7677_s3 + $0x10] sm:$0xff]  }
0x1144   : >> { %v3624_v50 = vpack.c.bf16 %v3621_v54, %v3618_v48  ;;  %v6573_v48 = vld [vmem:[%s7677_s3 + $0x18] sm:$0xff]  }
0x1146   : >> { %v3697_v3 = vsel %vm1583_vm2, %v3624_v50, 0  ;;  %v5660_v50 = vld [vmem:[%s7711_s9 + $0x1] ss:$0 sm:$0xff] }
0x1147   : >> { %6205 = vmatpush3.bf16.xpose.msra.mxu0 %v3697_v3 }
0x1148   : >> { %6216 = vmatprep.subr.bf16.mxu0 %v6789_v47 }
0x118d   : >> { %v3464_v36 = vpop.xlane.xlu1 %3463 }
0x118e   : >> { %v3465_v34 = vmul.f32 0.03125, %v3464_v36 }
0x1190   : >> { %v3466_v41 = vadd.f32 1e-05, %v3465_v34 }
0x1192   : >> { %6616 = vrsqrt.f32 %v3466_v41 }
0x119c   : >> { %v6617_v31 = vpop.eup %6616 }
0x119d   : >> { %v3468_v37 = vmul.f32 %v6617_v31, %v3460_v30 }
0x119f   : >> { %v3475_v0 = vmul.f32 %v5621_v53, %v3468_v37 }
0x11a1   : >> { %v7699_v44 = vadd.f32 %v5622_v60, %v3475_v0 }
0x11a3   : >> { %v7703_v2 = vpack.c.bf16 %v7699_v44, %v7699_v44 }
0x11a5   : >> { %6185 = vmatmul.mubr.msk.bf16.vlgmr.msra.gmra.mrb[44].mxu1 %vm1399_vm3, %v7703_v2 }
0x11a6   : >> { %6200 = vmatprep.mubr.msk.bf16.mxu1 %vm6790_vm15, %v6789_v47  ;;  %6197 = vmatpush3.bf16.msra.mxu1 %v6570_v4  ;;  %v6574_v4 = vld [vmem:[%s7689_s2 + $0x20] sm:$0xff]  }
0x11a7   : >> { %6198 = vmatprep.subr.bf16.mxu1 %v6789_v47 }
0x11aa   : >> { %6199 = vmatpush3.bf16.msra.mxu1 %v6571_v5 }
0x11ab   : >> { %6210 = vmatprep.subr.bf16.mxu1 %v6789_v47 }
0x11ad   : >> { %6201 = vmatmul.mubr.msk.bf16.vlgmr.msra.gmra.mrb[48].mxu1 %vm1399_vm3, %v7132_v46 }
0x11ae   : >> { %6212 = vmatprep.mubr.msk.bf16.mxu1 %vm6790_vm15, %v6789_v47 }
0x1278   : >> { %v3547_v59 = vpop.f32.mrb[44].mxu1 }
0x1279   : >> { %v3548_v43 = vadd.f32 %v5624_v56, %v3547_v59  ;;  %v6186_v61 = vpop.f32.mrb[45].mxu1 }
0x127a   : >> { %v3550_v42 = vpop.f32.mrb[46].mxu1 }
0x127b   : >> { %v3553_v51 = vpack.c.bf16 %v3548_v43, %v3548_v43  ;;  %v6187_v63 = vpop.f32.mrb[47].mxu1 }
0x127d   : >> { %6207 = vmatmul.mubr.msk.bf16.vlgmr.msra.gmra.mrb[60].mxu0 %vm1583_vm2, %v3553_v51  ;;  %v5648_v51 = vld [vmem:[%s7718_s13 + $0x1] ss:$0 sm:$0xff] }
0x127e   : >> { %6217 = vmatpush3.bf16.msra.mxu0 %v6568_v12  ;;  %6220 = vmatprep.mubr.msk.bf16.mxu0 %vm6790_vm15, %v6789_v47 }
0x127f   : >> { %6218 = vmatprep.subr.bf16.mxu0 %v6789_v47 }
0x1280   : >> { %v3685_v11 = vpop.f32.mrb[48].mxu1 }
0x1281   : >> { %v3686_v30 = vadd.f32 %v5634_v15, %v3685_v11  ;;  %v6202_v28 = vpop.f32.mrb[49].mxu1 }
0x1282   : >> { %6219 = vmatpush3.bf16.msra.mxu0 %v6569_v55  ;;  %v3688_v32 = vpop.f32.mrb[50].mxu1 }
0x1283   : >> { %6232 = vmatprep.subr.bf16.mxu0 %v6789_v47  ;;  %v3689_v29 = vadd.f32 %v5634_v15, %v3688_v32  ;;  %v6203_v45 = vpop.f32.mrb[51].mxu1 }
0x1285   : >> { %6221 = vmatmul.mubr.msk.bf16.vlgmr.msra.gmra.mrb[64].mxu0 %vm1399_vm3, %v7703_v2  ;;  %v3692_v58 = vpack.c.bf16 %v3689_v29, %v3686_v30 }
0x1286   : >> { %6236 = vmatprep.mubr.msk.bf16.mxu0 %vm6790_vm15, %v6789_v47 }
0x1287   : >> { %v3758_v53 = vsel %vm3756_vm9, %v3692_v58, 0 }
0x1288   : >> { %6211 = vmatpush3.bf16.msra.mxu1 %v3758_v53 }
0x1289   : >> { %6224 = vmatprep.subr.bf16.mxu1 %v6789_v47 }
0x1350   : >> { %v3733_v7 = vpop.f32.mrb[60].mxu0 }
0x1351   : >> { %v3739_v8 = vsel %vm7095_vm7, %v3733_v7, -10000.0  ;;  %v6208_v9 = vpop.f32.mrb[61].mxu0  ;;  %v6575_v7 = vld [vmem:[%s7689_s2 + $0x28] sm:$0xff]  }
0x1352   : >> { %v3736_v10 = vpop.f32.mrb[62].mxu0  ;;  %v3741_v27 = vsel %vm3740_vm8, %v3739_v8, -inf  ;;  %v6577_v9 = vld [vmem:[%s7734_s8 + $0x18] sm:$0xff]  }
0x1353   : >> { %3742 = vmax.xlane.f32.xlu0 %v3741_v27  ;;  %v6209_v13 = vpop.f32.mrb[63].mxu0 }
0x1358   : >> { %v3860_v14 = vpop.f32.mrb[64].mxu0 }
0x1359   : >> { %v6222_v52 = vpop.f32.mrb[65].mxu0  ;;  %v3861_v55 = vadd.f32 %v5648_v51, %v3860_v14 }
0x135a   : >> { %v3863_v57 = vpop.f32.mrb[66].mxu0 }
0x135b   : >> { %v6223_v35 = vpop.f32.mrb[67].mxu0  ;;  %v3866_v5 = vpack.c.bf16 %v3861_v55, %v3861_v55 }
0x13e0   : >> { %v3743_v33 = vpop.xlane.xlu0 %3742 }
0x13e1   : >> { %v3744_v36 = vsub.f32 %v3739_v8, %v3743_v33  ;;  %v6576_v8 = vld [vmem:[%s7734_s8 + $0x10] sm:$0xff]  }
0x13e2   : >> { %6233 = vmatpush3.bf16.msra.mxu0 %v6576_v8 }
0x13e3   : >> { %v3745_v34 = vmul.f32 1.442695, %v3744_v36  ;;  %6234 = vmatprep.subr.bf16.mxu0 %v6789_v47 }
0x13e5   : >> { %6618 = vpow2.f32 %v3745_v34  ;;  %v5672_v34 = vld [vmem:[%s7749_s22 + $0x1] ss:$0 sm:$0xff] }
0x13e6   : >> { %6235 = vmatpush3.bf16.msra.mxu0 %v6577_v9  ;;  %v6580_v9 = vld [vmem:[%s7689_s2 + $0x30] sm:$0xff]  }
0x13e7   : >> { %6246 = vmatprep.subr.bf16.mxu0 %v6789_v47 }
0x13e9   : >> { %6237 = vmatmul.mubr.msk.bf16.vlgmr.msra.gmra.mrb[68].mxu0 %vm1399_vm3, %v7132_v46 }
0x13ea   : >> { %6248 = vmatprep.mubr.msk.bf16.mxu0 %vm6790_vm15, %v6789_v47 }
0x13ef   : >> { %v6619_v41 = vpop.eup %6618 }
0x13f0   : >> { %v3747_v31 = vsel %vm3740_vm8, %v6619_v41, 0.0 }
0x13f1   : >> { %3748 = vadd.xlane.f32.xlu0 %v3747_v31 }
0x147e   : >> { %v3749_v37 = vpop.xlane.xlu0 %3748 }
0x147f   : >> { %6620 = vrcp.f32 %v3749_v37 }
0x1489   : >> { %v6621_v60 = vpop.eup %6620 }
0x148a   : >> { %v3751_v0 = vmul.f32 %v6621_v60, %v6619_v41 }
0x148c   : >> { %v3752_v38 = vpack.c.bf16 %v3751_v0, %v3751_v0 }
0x148e   : >> { %6213 = vmatmul.mubr.msk.bf16.vlgmr.msra.gmra.mrb[52].mxu1 %vm3740_vm8, %v3752_v38 }
0x148f   : >> { %6225 = vmatpush3.bf16.msra.mxu1 %v6572_v40  ;;  %6228 = vmatprep.mubr.msk.bf16.mxu1 %vm6790_vm15, %v6789_v47 }
0x1490   : >> { %6226 = vmatprep.subr.bf16.mxu1 %v6789_v47 }
0x1493   : >> { %6227 = vmatpush3.bf16.msra.mxu1 %v6573_v48 }
0x1494   : >> { %6240 = vmatprep.subr.bf16.mxu1 %v6789_v47 }
0x1496   : >> { %6229 = vmatmul.mubr.msk.bf16.vlgmr.msra.gmra.mrb[56].mxu1 %vm1399_vm3, %v7132_v46 }
0x1497   : >> { %6242 = vmatprep.mubr.msk.bf16.mxu1 %vm6790_vm15, %v6789_v47 }
0x14bc   : >> { %v3995_v28 = vpop.f32.mrb[68].mxu0 }
0x14bd   : >> { %v6238_v32 = vpop.f32.mrb[69].mxu0  ;;  %v3996_v41 = vadd.f32 %v5672_v34, %v3995_v28 }
0x14be   : >> { %v3998_v31 = vpop.f32.mrb[70].mxu0 }
0x14bf   : >> { %v6239_v53 = vpop.f32.mrb[71].mxu0  ;;  %v3999_v37 = vadd.f32 %v5672_v34, %v3998_v31 }
0x14c1   : >> { %v4002_v60 = vpack.c.bf16 %v3999_v37, %v3996_v41 }
0x14c3   : >> { %v4066_v0 = vsel %vm3756_vm9, %v4002_v60, 0 }
0x14c4   : >> { %6247 = vmatpush3.bf16.msra.mxu0 %v4066_v0 }
0x14c5   : >> { %6260 = vmatprep.subr.bf16.mxu0 %v6789_v47 }
0x1561   : >> { %v7766_v49 = vpop.f32.mrb[52].mxu1 }
0x1562   : >> { %v6214_v6 = vpop.f32.mrb[53].mxu1 }
0x1563   : >> { %v3797_v54 = vpop.f32.mrb[54].mxu1  ;;  %v6578_v6 = vld [vmem:[%s7677_s3 + $0x20] sm:$0xff]  }
0x1564   : >> { %v6215_v62 = vpop.f32.mrb[55].mxu1 }
0x1565   : >> { %v6579_v62 = vld [vmem:[%s7677_s3 + $0x28] sm:$0xff]  }
0x1569   : >> { %v3927_v3 = vpop.f32.mrb[56].mxu1 }
0x156a   : >> { %v6230_v56 = vpop.f32.mrb[57].mxu1  ;;  %v3928_v43 = vadd.f32 %v5660_v50, %v3927_v3 }
0x156b   : >> { %v3930_v59 = vpop.f32.mrb[58].mxu1 }
0x156c   : >> { %v3931_v61 = vadd.f32 %v5660_v50, %v3930_v59  ;;  %v6231_v42 = vpop.f32.mrb[59].mxu1 }
0x156e   : >> { %v3934_v12 = vpack.c.bf16 %v3931_v61, %v3928_v43  ;;  %v5698_v43 = vld [vmem:[%s7711_s9 + $0x2] ss:$0 sm:$0xff] }
0x1570   : >> { %v4007_v63 = vsel %vm1583_vm2, %v3934_v12, 0 }
0x1571   : >> { %6241 = vmatpush3.bf16.xpose.msra.mxu1 %v4007_v63 }
0x1572   : >> { %6252 = vmatprep.subr.bf16.mxu1 %v6789_v47 }
0x1578   : >> { %6243 = vmatmul.mubr.msk.bf16.vlgmr.msra.gmra.mrb[60].mxu1 %vm1583_vm2, %v3866_v5  ;;  %v5686_v5 = vld [vmem:[%s7718_s13 + $0x2] ss:$0 sm:$0xff] }
0x1579   : >> { %6253 = vmatpush3.bf16.msra.mxu1 %v6574_v4  ;;  %6256 = vmatprep.mubr.msk.bf16.mxu1 %vm6790_vm15, %v6789_v47 }
0x157a   : >> { %6254 = vmatprep.subr.bf16.mxu1 %v6789_v47 }
0x157d   : >> { %6255 = vmatpush3.bf16.msra.mxu1 %v6575_v7 }
0x157e   : >> { %6268 = vmatprep.subr.bf16.mxu1 %v6789_v47 }
0x1580   : >> { %6257 = vmatmul.mubr.msk.bf16.vlgmr.msra.gmra.mrb[64].mxu1 %vm1399_vm3, %v7703_v2 }
0x1581   : >> { %6272 = vmatprep.mubr.msk.bf16.mxu1 %vm6790_vm15, %v6789_v47 }
0x164b   : >> { %v4043_v10 = vpop.f32.mrb[60].mxu1 }
0x164c   : >> { %v4049_v27 = vsel %vm7095_vm7, %v4043_v10, -10000.0  ;;  %v6244_v13 = vpop.f32.mrb[61].mxu1 }
0x164d   : >> { %v4050_v14 = vsel %vm3740_vm8, %v4049_v27, -inf  ;;  %v4046_v52 = vpop.f32.mrb[62].mxu1  ;;  %v6582_v13 = vld [vmem:[%s7734_s8 + $0x20] sm:$0xff]  }
0x164e   : >> { %4051 = vmax.xlane.f32.xlu1 %v4050_v14  ;;  %v6245_v57 = vpop.f32.mrb[63].mxu1  ;;  %6269 = vmatpush3.bf16.msra.mxu1 %v6582_v13  ;;  %v6583_v14 = vld [vmem:[%s7734_s8 + $0x28] sm:$0xff]  }
0x164f   : >> { %6270 = vmatprep.subr.bf16.mxu1 %v6789_v47 }
0x1652   : >> { %6271 = vmatpush3.bf16.msra.mxu1 %v6583_v14 }
0x1653   : >> { %v4168_v35 = vpop.f32.mrb[64].mxu1  ;;  %6282 = vmatprep.subr.bf16.mxu1 %v6789_v47 }
0x1654   : >> { %v6258_v15 = vpop.f32.mrb[65].mxu1  ;;  %v4169_v8 = vadd.f32 %v5686_v5, %v4168_v35 }
0x1655   : >> { %v4171_v11 = vpop.f32.mrb[66].mxu1  ;;  %6273 = vmatmul.mubr.msk.bf16.vlgmr.msra.gmra.mrb[68].mxu1 %vm1399_vm3, %v7132_v46 }
0x1656   : >> { %v6259_v30 = vpop.f32.mrb[67].mxu1  ;;  %v4174_v10 = vpack.c.bf16 %v4169_v8, %v4169_v8  ;;  %6284 = vmatprep.mubr.msk.bf16.mxu1 %vm6790_vm15, %v6789_v47 }
0x16db   : >> { %v4052_v29 = vpop.xlane.xlu1 %4051 }
0x16dc   : >> { %v4053_v45 = vsub.f32 %v4049_v27, %v4052_v29  ;;  %v6581_v27 = vld [vmem:[%s7689_s2 + $0x38] sm:$0xff]   ;;  %s8058_s2 = smov 16  }
0x16de   : >> { %v4054_v58 = vmul.f32 1.442695, %v4053_v45  ;;  %v5710_v45 = vld [vmem:[%s7749_s22 + $0x2] ss:$0 sm:$0xff] }
0x16e0   : >> { %6622 = vpow2.f32 %v4054_v58 }
0x16ea   : >> { %v6623_v33 = vpop.eup %6622 }
0x16eb   : >> { %v4056_v36 = vsel %vm3740_vm8, %v6623_v33, 0.0 }
0x16ec   : >> { %4057 = vadd.xlane.f32.xlu0 %v4056_v36 }
0x1728   : >> { %v4303_v58 = vpop.f32.mrb[68].mxu1 }
0x1729   : >> { %v6274_v36 = vpop.f32.mrb[69].mxu1 }
0x172a   : >> { %v4306_v34 = vpop.f32.mrb[70].mxu1 }
0x172b   : >> { %v4307_v41 = vadd.f32 %v5710_v45, %v4306_v34  ;;  %v6275_v31 = vpop.f32.mrb[71].mxu1 }
0x1779   : >> { %v4058_v40 = vpop.xlane.xlu0 %4057 }
0x177a   : >> { %6624 = vrcp.f32 %v4058_v40 }
0x1784   : >> { %v6625_v38 = vpop.eup %6624 }
0x1785   : >> { %v4060_v48 = vmul.f32 %v6625_v38, %v6623_v33  ;;  %v4304_v33 = vadd.f32 %v5710_v45, %v4303_v58 }
0x1787   : >> { %v4061_v54 = vpack.c.bf16 %v4060_v48, %v4060_v48  ;;  %v4310_v53 = vpack.c.bf16 %v4307_v41, %v4304_v33  ;;  %v5748_v41 = vld [vmem:[%s7749_s22 + $0x3] ss:$0 sm:$0xff]  ;;  %s8062_s22 = sld [smem:[#allocation34_spill]] }
0x1789   : >> { %6249 = vmatmul.mubr.msk.bf16.vlgmr.msra.gmra.mrb[72].mxu0 %vm3740_vm8, %v4061_v54  ;;  %v4374_v48 = vsel %vm3756_vm9, %v4310_v53, 0 }
0x178a   : >> { %6261 = vmatpush3.bf16.msra.mxu0 %v6578_v6  ;;  %6264 = vmatprep.mubr.msk.bf16.mxu0 %vm6790_vm15, %v6789_v47 }
0x178b   : >> { %6262 = vmatprep.subr.bf16.mxu0 %v6789_v47  ;;  %6283 = vmatpush3.bf16.msra.mxu1 %v4374_v48 }
0x178c   : >> { %6296 = vmatprep.subr.bf16.mxu1 %v6789_v47 }
0x178e   : >> { %6263 = vmatpush3.bf16.msra.mxu0 %v6579_v62 }
0x178f   : >> { %6276 = vmatprep.subr.bf16.mxu0 %v6789_v47 }
0x1791   : >> { %6265 = vmatmul.mubr.msk.bf16.vlgmr.msra.gmra.mrb[76].mxu0 %vm1399_vm3, %v7132_v46 }
0x1792   : >> { %6278 = vmatprep.mubr.msk.bf16.mxu0 %vm6790_vm15, %v6789_v47 }
0x185c   : >> { %v7809_v50 = vpop.f32.mrb[72].mxu0 }
0x185d   : >> { %v6250_v3 = vpop.f32.mrb[73].mxu0 }
0x185e   : >> { %v4105_v56 = vpop.f32.mrb[74].mxu0  ;;  %v6584_v3 = vld [vmem:[%s7677_s3 + $0x30] sm:$0xff]  }
0x185f   : >> { %v6251_v59 = vpop.f32.mrb[75].mxu0 }
0x1860   : >> { %v6585_v59 = vld [vmem:[%s7677_s3 + $0x38] sm:$0xff]   ;;  %s8057_s3 = sld [smem:[#allocation28_spill]] }
0x1864   : >> { %v4235_v61 = vpop.f32.mrb[76].mxu0 }
0x1865   : >> { %v6266_v42 = vpop.f32.mrb[77].mxu0  ;;  %v4236_v51 = vadd.f32 %v5698_v43, %v4235_v61 }
0x1866   : >> { %v4238_v12 = vpop.f32.mrb[78].mxu0 }
0x1867   : >> { %v4239_v63 = vadd.f32 %v5698_v43, %v4238_v12  ;;  %v6267_v55 = vpop.f32.mrb[79].mxu0 }
0x1869   : >> { %v4242_v4 = vpack.c.bf16 %v4239_v63, %v4236_v51  ;;  %v5736_v51 = vld [vmem:[%s7711_s9 + $0x3] ss:$0 sm:$0xff]  ;;  %s4741_s9 = scalar_lea.vmem %s8057_s3, %s7656_s26  ;;  %s7902_s3 = scalar_lea.vmem %s8062_s22, %s7149_s6 }
0x186a   : >> { %s8064_s6 = sld [smem:[#allocation31_spill]]  ;;  %s8067_s22 = sld [smem:[#allocation36_spill]] }
0x186b   : >> { %v4315_v7 = vsel %vm1583_vm2, %v4242_v4, 0 }
0x186c   : >> { %6277 = vmatpush3.bf16.xpose.msra.mxu0 %v4315_v7 }
0x186d   : >> { %6288 = vmatprep.subr.bf16.mxu0 %v6789_v47 }
0x1873   : >> { %6279 = vmatmul.mubr.msk.bf16.vlgmr.msra.gmra.mrb[80].mxu0 %vm1583_vm2, %v4174_v10  ;;  %v5724_v10 = vld [vmem:[%s7718_s13 + $0x3] ss:$0 sm:$0xff]  ;;  %s8059_s13 = sld [smem:[#allocation29_spill]] }
0x1874   : >> { %6289 = vmatpush3.bf16.msra.mxu0 %v6580_v9  ;;  %6292 = vmatprep.mubr.msk.bf16.mxu0 %vm6790_vm15, %v6789_v47 }
0x1875   : >> { %6290 = vmatprep.subr.bf16.mxu0 %v6789_v47 }
0x1878   : >> { %6291 = vmatpush3.bf16.msra.mxu0 %v6581_v27 }
0x1879   : >> { %6304 = vmatprep.subr.bf16.mxu0 %v6789_v47 }
0x187b   : >> { %6293 = vmatmul.mubr.msk.bf16.vlgmr.msra.gmra.mrb[84].mxu0 %vm1399_vm3, %v7703_v2 }
0x187c   : >> { %6308 = vmatprep.mubr.msk.bf16.mxu0 %vm6790_vm15, %v6789_v47 }
0x1946   : >> { %v4351_v52 = vpop.f32.mrb[80].mxu0 }
0x1947   : >> { %v4357_v2 = vsel %vm7095_vm7, %v4351_v52, -10000.0  ;;  %v6280_v57 = vpop.f32.mrb[81].mxu0  ;;  %v6586_v52 = vld [vmem:[%s7734_s8 + $0x30] sm:$0xff]  }
0x1948   : >> { %v4358_v35 = vsel %vm3740_vm8, %v4357_v2, -inf  ;;  %v4354_v15 = vpop.f32.mrb[82].mxu0  ;;  %6305 = vmatpush3.bf16.msra.mxu0 %v6586_v52 }
0x1949   : >> { %4359 = vmax.xlane.f32.xlu1 %v4358_v35  ;;  %v6281_v11 = vpop.f32.mrb[83].mxu0  ;;  %6306 = vmatprep.subr.bf16.mxu0 %v6789_v47 }
0x194e   : >> { %v4476_v30 = vpop.f32.mrb[84].mxu0 }
0x194f   : >> { %v6294_v28 = vpop.f32.mrb[85].mxu0  ;;  %v4477_v13 = vadd.f32 %v5724_v10, %v4476_v30 }
0x1950   : >> { %v4479_v32 = vpop.f32.mrb[86].mxu0 }
0x1951   : >> { %v6295_v29 = vpop.f32.mrb[87].mxu0  ;;  %v4482_v14 = vpack.c.bf16 %v4477_v13, %v4477_v13 }
0x19d6   : >> { %v4360_v37 = vpop.xlane.xlu1 %4359 }
0x19d7   : >> { %v4361_v60 = vsub.f32 %v4357_v2, %v4360_v37  ;;  %v6587_v2 = vld [vmem:[%s7734_s8 + $0x38] sm:$0xff]   ;;  %s4746_s8 = scalar_lea.vmem %s8059_s13, %s6744_s15  ;;  %s4812_s13 = scalar_lea.vmem %s8064_s6, %s6744_s15 }
0x19d8   : >> { %6307 = vmatpush3.bf16.msra.mxu0 %v6587_v2 }
0x19d9   : >> { %v4362_v0 = vmul.f32 1.442695, %v4361_v60  ;;  %6318 = vmatprep.subr.bf16.mxu0 %v6789_v47 }
0x19db   : >> { %6626 = vpow2.f32 %v4362_v0  ;;  %6309 = vmatmul.mubr.msk.bf16.vlgmr.msra.gmra.mrb[88].mxu0 %vm1399_vm3, %v7132_v46 }
0x19dc   : >> { %6320 = vmatprep.mubr.msk.bf16.mxu0 %vm6790_vm15, %v6789_v47 }
0x19e5   : >> { %v6627_v40 = vpop.eup %6626 }
0x19e6   : >> { %v4364_v38 = vsel %vm3740_vm8, %v6627_v40, 0.0 }
0x19e7   : >> { %4365 = vadd.xlane.f32.xlu0 %v4364_v38 }
0x1a74   : >> { %v4366_v6 = vpop.xlane.xlu0 %4365 }
0x1a75   : >> { %6628 = vrcp.f32 %v4366_v6 }
0x1a7f   : >> { %v6629_v54 = vpop.eup %6628 }
0x1a80   : >> { %v4368_v62 = vmul.f32 %v6629_v54, %v6627_v40  ;;  %v6588_v54 = vld [vmem:[%s4741_s9] sm:$0xff]  }
0x1a82   : >> { %v4369_v56 = vpack.c.bf16 %v4368_v62, %v4368_v62  ;;  %v6589_v62 = vld [vmem:[%s4741_s9 + $0x8] sm:$0xff]   ;;  %s8065_s9 = sld [smem:[#allocation33_spill]] }
0x1a84   : >> { %6285 = vmatmul.mubr.msk.bf16.vlgmr.msra.gmra.mrb[72].mxu1 %vm3740_vm8, %v4369_v56 }
0x1a85   : >> { %6297 = vmatpush3.bf16.msra.mxu1 %v6584_v3  ;;  %6300 = vmatprep.mubr.msk.bf16.mxu1 %vm6790_vm15, %v6789_v47 }
0x1a86   : >> { %6298 = vmatprep.subr.bf16.mxu1 %v6789_v47 }
0x1a89   : >> { %6299 = vmatpush3.bf16.msra.mxu1 %v6585_v59 }
0x1a8a   : >> { %6312 = vmatprep.subr.bf16.mxu1 %v6789_v47 }
0x1a8c   : >> { %6301 = vmatmul.mubr.msk.bf16.vlgmr.msra.gmra.mrb[76].mxu1 %vm1399_vm3, %v7132_v46 }
0x1a8d   : >> { %6314 = vmatprep.mubr.msk.bf16.mxu1 %vm6790_vm15, %v6789_v47 }
0x1aae   : >> { %v4611_v32 = vpop.f32.mrb[88].mxu0 }
0x1aaf   : >> { %v6310_v29 = vpop.f32.mrb[89].mxu0  ;;  %v4612_v31 = vadd.f32 %v5748_v41, %v4611_v32  ;;  %v6595_v32 = vld [vmem:[%s7902_s3 + $0x18] sm:$0xff]  }
0x1ab0   : >> { %v4614_v53 = vpop.f32.mrb[90].mxu0  ;;  %v6596_v29 = vld [vmem:[%s7902_s3 + $0x20] sm:$0xff]  }
0x1ab1   : >> { %v6311_v37 = vpop.f32.mrb[91].mxu0  ;;  %v4615_v60 = vadd.f32 %v5748_v41, %v4614_v53  ;;  %v5760_v53 = vld [vmem:[%s4812_s13] ss:$0 sm:$0xff] }
0x1b57   : >> { %v4410_v43 = vpop.f32.mrb[72].mxu1 }
0x1b58   : >> { %v6286_v61 = vpop.f32.mrb[73].mxu1 }
0x1b59   : >> { %v4413_v42 = vpop.f32.mrb[74].mxu1 }
0x1b5a   : >> { %v6287_v12 = vpop.f32.mrb[75].mxu1 }
0x1b5f   : >> { %v4543_v63 = vpop.f32.mrb[76].mxu1 }
0x1b60   : >> { %v6302_v55 = vpop.f32.mrb[77].mxu1  ;;  %v4544_v5 = vadd.f32 %v5736_v51, %v4543_v63 }
0x1b61   : >> { %v4546_v4 = vpop.f32.mrb[78].mxu1 }
0x1b62   : >> { %v4547_v7 = vadd.f32 %v5736_v51, %v4546_v4  ;;  %v6303_v8 = vpop.f32.mrb[79].mxu1 }
0x1b64   : >> { %v4550_v9 = vpack.c.bf16 %v4547_v7, %v4544_v5  ;;  %v5755_v5 = vld [vmem:[%s4746_s8] ss:$0 sm:$0xff]  ;;  %s4849_s8 = scalar_lea.vmem %s8065_s9, %s6744_s15 }
0x1b66   : >> { %v4623_v27 = vsel %vm1583_vm2, %v4550_v9, 0 }
0x1b67   : >> { %6313 = vmatpush3.bf16.xpose.msra.mxu1 %v4623_v27 }
0x1b68   : >> { %6324 = vmatprep.subr.bf16.mxu1 %v6789_v47 }
0x1b6e   : >> { %6315 = vmatmul.mubr.msk.bf16.vlgmr.msra.gmra.mrb[80].mxu1 %vm1583_vm2, %v4482_v14 }
0x1b6f   : >> { %6328 = vmatprep.mubr.msk.bf16.mxu1 %vm6790_vm15, %v6789_v47  ;;  %6325 = vmatpush3.bf16.msra.mxu1 %v6588_v54 }
0x1b70   : >> { %6326 = vmatprep.subr.bf16.mxu1 %v6789_v47 }
0x1b73   : >> { %6327 = vmatpush3.bf16.msra.mxu1 %v6589_v62 }
0x1b74   : >> { %6340 = vmatprep.subr.bf16.mxu1 %v6789_v47 }
0x1c41   : >> { %v4659_v57 = vpop.f32.mrb[80].mxu1 }
0x1c42   : >> { %v4665_v35 = vsel %vm7095_vm7, %v4659_v57, -10000.0  ;;  %v6316_v15 = vpop.f32.mrb[81].mxu1 }
0x1c43   : >> { %v4666_v11 = vsel %vm3740_vm8, %v4665_v35, -inf  ;;  %v4662_v30 = vpop.f32.mrb[82].mxu1 }
0x1c44   : >> { %4667 = vmax.xlane.f32.xlu1 %v4666_v11  ;;  %v6317_v28 = vpop.f32.mrb[83].mxu1  ;;  %v6593_v30 = vld [vmem:[%s7902_s3 + $0x8] sm:$0xff]  }
0x1c45   : >> { %v6594_v28 = vld [vmem:[%s7902_s3 + $0x10] sm:$0xff]  }
0x1c55   : >> { %4725 = vrot.lane.b32.xlu1 %v7809_v50, %s8056_s4  ;;  %v4618_v50 = vpack.c.bf16 %v4615_v60, %v4612_v31  ;;  %s4844_s4 = scalar_lea.vmem %s8061_s29, %s7656_s26  ;;  %s8063_s26 = sld [smem:[#allocation30_spill]] }
0x1c56   : >> { %v6590_v15 = vld [vmem:[%s4844_s4] sm:$0xff]   ;;  %v6591_v11 = vld [vmem:[%s4844_s4 + $0x8] sm:$0xff]   ;;  %s5031_s4 = scalar_lea.vmem %s8067_s22, %s6744_s15 }
0x1c57   : >> { %v4682_v0 = vsel %vm3756_vm9, %v4618_v50, 0 }
0x1c58   : >> { %6319 = vmatpush3.bf16.msra.mxu0 %v4682_v0 }
0x1c59   : >> { %6332 = vmatprep.subr.bf16.mxu0 %v6789_v47 }
0x1cd1   : >> { %v4668_v45 = vpop.xlane.xlu1 %4667 }
0x1cd2   : >> { %v4669_v58 = vsub.f32 %v4665_v35, %v4668_v45  ;;  %v6597_v45 = vld [vmem:[%s7902_s3 + $0x28] sm:$0xff]  }
0x1cd4   : >> { %v4670_v33 = vmul.f32 1.442695, %v4669_v58 }
0x1cd5   : >> { %v4726_v61 = vpop.permute.xlu1 %4725 }
0x1cd6   : >> { %6630 = vpow2.f32 %v4670_v33  ;;  %v4736_v12 = vsel %vm1583_vm2, %v7766_v49, %v4726_v61 }
0x1ce0   : >> { %v6631_v36 = vpop.eup %6630 }
0x1ce1   : >> { %v4672_v34 = vsel %vm3740_vm8, %v6631_v36, 0.0 }
0x1ce2   : >> { %4673 = vadd.xlane.f32.xlu0 %v4672_v34 }
0x1cf8   : >> { %4729 = vrot.lane.b32.xlu0 %v4410_v43, %s8058_s2  ;;  %s4810_s2 = scalar_lea.vmem %s8063_s26, %s6744_s15 }
0x1cf9   : >> { %v5759_v41 = vld [vmem:[%s4810_s2] ss:$0 sm:$0xff] }
0x1d6f   : >> { %v4674_v40 = vpop.xlane.xlu0 %4673 }
0x1d70   : >> { %6632 = vrcp.f32 %v4674_v40  ;;  %v6598_v40 = vld [vmem:[%s7902_s3 + $0x30] sm:$0xff]  }
0x1d73   : >> { %v4730_v42 = vpop.permute.xlu0 %4729 }
0x1d74   : >> { %v4737_v51 = vsel %vm1223_vm1, %v4736_v12, %v4730_v42 }
0x1d7a   : >> { %v6633_v38 = vpop.eup %6632 }
0x1d7b   : >> { %v4676_v48 = vmul.f32 %v6633_v38, %v6631_v36  ;;  %v6599_v38 = vld [vmem:[%s7902_s3 + $0x38] sm:$0xff]  }
0x1d7d   : >> { %v4677_v6 = vpack.c.bf16 %v4676_v48, %v4676_v48  ;;  %v5762_v48 = vld [vmem:[%s4849_s8] ss:$0 sm:$0xff] }
0x1d7f   : >> { %6321 = vmatmul.mubr.msk.bf16.vlgmr.msra.gmra.mrb[92].mxu0 %vm3740_vm8, %v4677_v6 }
0x1d80   : >> { %6336 = vmatprep.mubr.msk.bf16.mxu0 %vm6790_vm15, %v6789_v47  ;;  %6333 = vmatpush3.bf16.msra.mxu0 %v6590_v15 }
0x1d81   : >> { %6334 = vmatprep.subr.bf16.mxu0 %v6789_v47 }
0x1d84   : >> { %6335 = vmatpush3.bf16.msra.mxu0 %v6591_v11 }
0x1e52   : >> { %v4718_v3 = vpop.f32.mrb[92].mxu0 }
0x1e53   : >> { %4733 = vrot.lane.b32.xlu1 %v4718_v3, %s8060_s14  ;;  %v6322_v56 = vpop.f32.mrb[93].mxu0  ;;  %s8066_s14 = sld [smem:[#allocation35_spill]] }
0x1e54   : >> { %v4721_v59 = vpop.f32.mrb[94].mxu0 }
0x1e55   : >> { %v6323_v43 = vpop.f32.mrb[95].mxu0 }
0x1e59   : >> { %s4933_s29 = scalar_lea.vmem %s8066_s14, %s6744_s15 }
0x1e5a   : >> { %v5767_v42 = vld [vmem:[%s4933_s29] ss:$0 sm:$0xff] }
0x1ec5   : >> { %v4734_v63 = vpop.permute.xlu1 %4733 }
0x1ec6   : >> { %v4738_v55 = vsel %vm3378_vm4, %v4737_v51, %v4734_v63 }
0x1ec7   : >> { %v4739_v4 = vpack.c.bf16 %v4738_v55, %v4738_v55 }
0x1ec9   : >> { %6329 = vmatmul.mubr.msk.bf16.vlgmr.msra.gmra.mrb[84].mxu1 %vm1399_vm3, %v4739_v4 }
0x1eca   : >> { %6356 = vmatprep.mubr.msk.bf16.mxu1 %vm6790_vm15, %v6789_v47 }
0x1f9c   : >> { %v4803_v7 = vpop.f32.mrb[84].mxu1 }
0x1f9d   : >> { %v4804_v8 = vadd.f32 %v5755_v5, %v4803_v7  ;;  %v6330_v9 = vpop.f32.mrb[85].mxu1 }
0x1f9e   : >> { %v4806_v10 = vpop.f32.mrb[86].mxu1 }
0x1f9f   : >> { %v4809_v49 = vadd.f32 %v4804_v8, %v7699_v44  ;;  %v6331_v27 = vpop.f32.mrb[87].mxu1  ;;  %v6592_v44 = vld [vmem:[%s7902_s3] sm:$0xff]   ;;  %s5033_s3 = scalar_lea.vmem %s6988_s20, %s6744_s15  ;;  %s1359_s15 = sadd.s32 1, %s6744_s15  }
0x1fa0   : >> { %6341 = vmatpush3.bf16.msra.mxu1 %v6592_v44  ;;  %v5777_v15 = vld [vmem:[%s5033_s3] ss:$0 sm:$0xff]  ;;  %p1356_p7 = scmp.ge.s32.totalorder %s1359_s15, 2  }
0x1fa1   : >> { %v4814_v13 = vsel %vm1399_vm3, %v4809_v49, 0.0  ;;  %6342 = vmatprep.subr.bf16.mxu1 %v6789_v47  ;;  %6360 = vmatprep.subr.bf16.mxu0 (%p1356_p7), %v6787_v1  ;;  %v5778_v16 = vld [vmem:[%s6998_s10] ss:$0 sm:$0xff] (%p1356_p7)  ;;  %s5783_s15 = sshll.u32 (%p1356_p7), %s7030_s23, 7  ;;  %s8069_s26 = scalar_lea.vmem (%p1356_p7), [#allocation5], %s7064_s5 }
0x1fa2   : >> { %4815 = vadd.xlane.f32.xlu1 %v4814_v13  ;;  %s5146_s6 = sshll.u32 (%p1356_p7), %s8069_s26, 4  ;;  %s7955_s2 = scalar_lea.hbm (%p1356_p7), %s7003_s16, %s5783_s15  ;;  %s7957_s6 = int_to_ptr.vmem [resolvable:$true] %s5146_s6 }
0x1fa3   : > { %s8070_s9 = smov (%p1356_p7), %s8069_s26  ;;  %s8071_s13 = sand.u32 (%p1356_p7), 1, %s6728_s7  }
0x1fa4   : >> { %6343 = vmatpush3.bf16.msra.mxu1 %v6593_v30  ;;  %v6638_v30 = vld [vmem:[%s6993_s1] sm:$0xff] (%p1356_p7)   ;;  %s5133_s14 = scalar_lea.sflag (%p1356_p7), [#allocation6], %s8071_s13  ;;  %s6664_s23 = scalar_lea.vmem (%p1356_p7), %s7957_s6, 128 }
0x1fa5   : >> { %6344 = vmatprep.subr.bf16.mxu1 %v6789_v47  ;;  %p6665_p8 = scmp.ne.s32.totalorder (%p1356_p7), %s7957_s6, %s6664_s23  ;;  %s6804_s8 = smov (%p1356_p7), [#allocation5]  }
0x1fa6   : > { %s6668_s29 = sshll.u32 (%p1356_p7), %s6804_s8, 4  ;;  %s6669_s29 = int_to_ptr.vmem [resolvable:$false] %s6668_s29 }
0x1fa7   : > { %p6666_p9 = pnand (%p1356_p7), %p6665_p8, %p7047_p1  ;;  %s6670_s22 = scalar_lea.vmem (%p1356_p7), %s6669_s29, 256 }
0x1fa8   : >> { %6345 = vmatpush3.bf16.msra.mxu1 %v6594_v28  ;;  %v6639_v28 = vld [vmem:[%s6993_s1 + $0x8] sm:$0xff] (%p1356_p7)   ;;  %p6671_p11 = scmp.lt.s32.totalorder (%p1356_p7), %s7957_s6, %s6669_s29  ;;  %p6672_p12 = scmp.lt.s32.totalorder (%p1356_p7), %s6670_s22, %s6664_s23 }
0x1fa9   : >> { %6346 = vmatprep.subr.bf16.mxu1 %v6789_v47  ;;  %p6667_p10 = pneg (%p1356_p7), %p6666_p9 }
0x1faa   : > { %p6673_p13 = por (%p1356_p7), %p6672_p12, %p6671_p11 }
0x1fac   : >> { %6347 = vmatpush3.bf16.msra.mxu1 %v6595_v32  ;;  %p6674_p0 = pnand (%p1356_p7), %p6673_p13, %p6667_p10 }
0x1fad   : >> { %6348 = vmatprep.subr.bf16.mxu1 %v6789_v47 }
0x1fb0   : >> { %6349 = vmatpush3.bf16.msra.mxu1 %v6596_v29 }
0x1fb1   : >> { %6350 = vmatprep.subr.bf16.mxu1 %v6789_v47 }
0x1fb4   : >> { %6351 = vmatpush3.bf16.msra.mxu1 %v6597_v45 }
0x1fb5   : >> { %6352 = vmatprep.subr.bf16.mxu1 %v6789_v47 }
0x1fb8   : >> { %6353 = vmatpush3.bf16.msra.mxu1 %v6598_v40 }
0x1fb9   : >> { %6354 = vmatprep.subr.bf16.mxu1 %v6789_v47 }
0x1fbc   : >> { %6355 = vmatpush3.bf16.msra.mxu1 %v6599_v38 }
0x202f   : >> { %v4816_v14 = vpop.xlane.xlu1 %4815 }
0x2030   : >> { %v4817_v52 = vmul.f32 0.03125, %v4816_v14 }
0x2032   : >> { %v4818_v2 = vsub.f32 %v4809_v49, %v4817_v52 }
0x2034   : >> { %v4819_v57 = vmul.f32 %v4818_v2, %v4818_v2 }
0x2036   : >> { %v4820_v35 = vsel %vm1399_vm3, %v4819_v57, 0.0  ;;  %v5776_v57 = vld [vmem:[%s5031_s4] ss:$0 sm:$0xff] }
0x2037   : >> { %4821 = vadd.xlane.f32.xlu0 %v4820_v35 }
0x20c4   : >> { %v4822_v58 = vpop.xlane.xlu0 %4821 }
0x20c5   : >> { %v4823_v33 = vmul.f32 0.03125, %v4822_v58 }
0x20c7   : >> { %v4824_v36 = vadd.f32 1e-05, %v4823_v33 }
0x20c9   : >> { %6634 = vrsqrt.f32 %v4824_v36 }
0x20d3   : >> { %v6635_v34 = vpop.eup %6634 }
0x20d4   : >> { %v4826_v31 = vmul.f32 %v6635_v34, %v4818_v2 }
0x20d6   : >> { %v4833_v37 = vmul.f32 %v5759_v41, %v4826_v31 }
0x20d8   : >> { %v4840_v60 = vadd.f32 %v5760_v53, %v4833_v37 }
0x20da   : >> { %v4841_v50 = vmul.f32 %v7129_v39, %v4840_v60 }
0x20dc   : >> { %v4842_v0 = vpack.c.bf16 %v4841_v50, %v4841_v50 }
0x20de   : >> { %6337 = vmatmul.mubr.msk.bf16.vlgmr.msra.gmra.mrb[96].mxu0 %vm1399_vm3, %v4842_v0 }
0x20df   : > { %6364 = vmatprep.mubr.msk.bf16.mxu0 (%p1356_p7), %vm6788_vm0, %v6787_v1  ;;  %6361 = vmatpush3.bf16.msra.mxu0 (%p1356_p7), %v6638_v30 }
0x20e0   : > { %6362 = vmatprep.subr.bf16.mxu0 (%p1356_p7), %v6787_v1 }
0x20e3   : > { %6363 = vmatpush3.bf16.msra.mxu0 (%p1356_p7), %v6639_v28 }
0x21b1   : >> { %v4906_v6 = vpop.f32.mrb[96].mxu0 }
0x21b2   : >> { %v4907_v54 = vadd.f32 %v5762_v48, %v4906_v6  ;;  %v6338_v62 = vpop.f32.mrb[97].mxu0 }
0x21b3   : >> { %v4909_v3 = vpop.f32.mrb[98].mxu0 }
0x21b4   : >> { %v4912_v56 = vmax.f32 %v4907_v54, 0.0  ;;  %v6339_v59 = vpop.f32.mrb[99].mxu0 }
0x21b6   : >> { %v4913_v43 = vmul.f32 %v7129_v39, %v4912_v56 }
0x21b8   : >> { %v4914_v61 = vpack.c.bf16 %v4913_v43, %v4913_v43 }
0x21ba   : >> { %6357 = vmatmul.mubr.bf16.vlgmr.msra.gmra.mrb[88].mxu1 %v4914_v61 }
0x228d   : >> { %v5023_v12 = vpop.f32.mrb[88].mxu1 }
0x228e   : >> { %v5024_v51 = vadd.f32 %v5767_v42, %v5023_v12  ;;  %v6358_v63 = vpop.f32.mrb[89].mxu1 }
0x228f   : >> { %v5026_v47 = vpop.f32.mrb[90].mxu1 }
0x2290   : >> { %v5029_v55 = vmul.f32 %v7129_v39, %v5024_v51  ;;  %v6359_v4 = vpop.f32.mrb[91].mxu1 }
0x2292   : >> { %v5030_v5 = vadd.f32 %v5029_v55, %v4840_v60 }
0x2294   : >> { %v5035_v7 = vsel %vm1399_vm3, %v5030_v5, 0.0 }
0x2295   : >> { %5036 = vadd.xlane.f32.xlu0 %v5035_v7 }
0x2322   : >> { %v5037_v8 = vpop.xlane.xlu0 %5036 }
0x2323   : >> { %v5038_v9 = vmul.f32 0.03125, %v5037_v8 }
0x2325   : >> { %v5039_v10 = vsub.f32 %v5030_v5, %v5038_v9 }
0x2327   : >> { %v5040_v49 = vmul.f32 %v5039_v10, %v5039_v10 }
0x2329   : >> { %v5041_v27 = vsel %vm1399_vm3, %v5040_v49, 0.0 }
0x232a   : >> { %5042 = vadd.xlane.f32.xlu1 %v5041_v27 }
0x23b7   : >> { %v5043_v13 = vpop.xlane.xlu1 %5042 }
0x23b8   : >> { %v5044_v14 = vmul.f32 0.03125, %v5043_v13 }
0x23ba   : >> { %v5045_v52 = vadd.f32 1e-05, %v5044_v14 }
0x23bc   : >> { %6636 = vrsqrt.f32 %v5045_v52 }
0x23c6   : >> { %v6637_v2 = vpop.eup %6636 }
0x23c7   : >> { %v5047_v35 = vmul.f32 %v6637_v2, %v5039_v10  ;;  %1358 = sbr.rel (!%p1356_p7) target bundleno = 340 (0x154), region = 319 }
0x23c9   : >> { %v5054_v11 = vmul.f32 %v5776_v57, %v5047_v35 }
0x23cb   : >> { %v5061_v44 = vadd.f32 %v5777_v15, %v5054_v11  }
0x23cd   : >> { %v8068_v45 = vmov %v5061_v44  ;;  %v5062_v32 = vpack.c.bf16 (%p1356_p7), %v5061_v44, %v5061_v44 }
0x23cf   : > { %6365 = vmatmul.mubr.msk.bf16.vlgmr.msra.gmra.mrb[0].mxu0 %vm1399_vm3, %v5062_v32 }
0x24a2   : > { %v5124_v17 = vpop.f32.mrb[0].mxu0 }
0x24a3   : > { %v5125_v18 = vadd.f32 %v5778_v16, %v5124_v17  ;;  %v6366_v19 = vpop.f32.mrb[1].mxu0 }
0x24a4   : > { %v5127_v20 = vpop.f32.mrb[2].mxu0 }
0x24a5   : > { %v5130_v21 = vmul.f32 %v7129_v39, %v5125_v18  ;;  %v6367_v22 = vpop.f32.mrb[3].mxu0 }
0x24a7   : > { %5131 = vst [vmem:[%s8070_s9] sm:$0xff] %v5130_v21 }
0x24a8   : > { %6677 = shalt.err (!%p6674_p0)
}
0x24a9   : > { %s6678_s5 = scalar_lea.hbm %s7955_s2, 128  ;;  %s6682_s4 = scalar_lea.hbm %s7003_s16, 256 }
0x24aa   : > { %p6679_p3 = scmp.ne.s32.totalorder %s7955_s2, %s6678_s5  ;;  %p6683_p6 = scmp.lt.u32.totalorder %s7955_s2, %s7003_s16 }
0x24ab   : > { %p6684_p7 = scmp.lt.u32.totalorder %s6682_s4, %s6678_s5  ;;  %p6686_p9 = scmp.lt.u32.totalorder %s6678_s5, %s7955_s2 }
0x24ac   : > { %p6680_p4 = pnand %p6679_p3, %p7047_p1 }
0x24ad   : > { %p6685_p8 = por %p6684_p7, %p6683_p6 }
0x24ae   : > { %p6681_p5 = pneg %p6680_p4 }
0x24af   : > { %p6687_p11 = por %p6686_p9, %p6685_p8 }
0x24b1   : > { %p6688_p10 = pnand %p6687_p11, %p6681_p5 }
0x24b3   : > { %6691 = shalt.err (!%p6688_p10)
}
0x24b4   : > { %6384 = dma.vmem_to_hbm [thread:$0]  (%p7047_p1), %s7957_s6, 128, %s7955_s2, %s5133_s14  }
0x24b5 PF: > { %p6390_p12 = scmp.ge.s32.totalorder %s6736_s11, 2  ;;  %s5158_s3 = sand.u32 1, %s6724_s12  }
0x24b6   : > { %s5159_s15 = scalar_lea.sflag [#allocation6], %s5158_s3 }
0x24b7   : > { %p6387_p13 = pnand %p6390_p12, %p7051_p2 }
0x24b9   : > { %6719 = dma.done.wait (!%p6387_p13), %s5159_s15, 128  }
0x24ba   : > { %6721 = vsyncadd (!%p6387_p13), %s5159_s15, 4294967168  ;;  %s8072_s26 = sld [smem:[#allocation37_spill]]  ;;  %p99_p0 = scmp.ge.s32.totalorder %s7034_s18, 4  }
0x24bb   : > { %s8073_s12 = smov %s6728_s7  ;;  %s8074_s7 = smov %s6732_s0 }
0x24bc   : > { %s8076_s11 = smov %s7034_s18  ;;  %101 = sbr.rel (!%p99_p0) target bundleno = 96 (0x60), region = 330 }
0x24c0   : > { %s8075_s0 = smov %s8072_s26 }
0x24c3   :  { %5164 = vsyncpa [#allocation6], 1 }
0x24c4   :  { %5166 = vsyncpa [#allocation6 + $0x1], 1 }

</bundles_post_ra>
